<compile_context>
chip_gen: v5e
topology: v5e:2x2
jax: 0.10.0
libtpu: 0.0.40
codegen_flags: <defaults>
</compile_context>

<pallas_src>
import functools

import jax
import jax.numpy as jnp
from jax.experimental import pallas as pl
from jax.experimental.pallas import tpu as pltpu


def causal_vgg_kernel(*refs, channels, ksizes, bblk, M, f, pool, compute_dtype):
    """refs = (x_ref, W_1, b_1, ..., W_n, b_n, o_ref).

    x_ref : (B_blk, M, f, C0)                        channels-last input block
    W_l   : (k_l, k_l * C_in_l, C_out_l)             compact per-time-tap weights
    b_l   : (1, C_out_l)                             f32 bias
    o_ref : (B_blk, M // pool, (f // pool) * C_last) lane-dense pooled output
    """
    n_conv = len(ksizes)
    x_ref = refs[0]
    o_ref = refs[-1]
    wb = refs[1:-1]

    a = x_ref[...].astype(jnp.float32)                     # (B_blk, M, f, c0)

    for l in range(n_conv):
        k = ksizes[l]
        c_in = channels[l]
        c_out = channels[l + 1]
        kc = k * c_in
        w_ref = wb[2 * l]                                  # (k, k*c_in, c_out)
        b_vec = wb[2 * l + 1][...]                         # (1, c_out) f32

        # --- build the feature-tap im2col base once per layer -------------
        a_c = a.astype(compute_dtype)                      # bf16 MXU operands
        if k > 1:
            # causal zero-pad at the START of the feature axis
            a_c = jnp.concatenate(
                [jnp.zeros((bblk, M, k - 1, c_in), compute_dtype), a_c], axis=2)
        # k feature-shifted slabs, concatenated along the channel/lane axis:
        # rbase[b, t, u, dv*c_in + ci] = x[b, ci, t, u + dv - (k-1)]  (0 if OOB)
        rbase = jnp.concatenate(
            [a_c[:, :, dv:dv + f, :] for dv in range(k)], axis=3)
        if k > 1:
            # causal zero-pad at the START of the time axis (leading dim: cheap)
            rbase = jnp.concatenate(
                [jnp.zeros((bblk, k - 1, f, kc), compute_dtype), rbase], axis=1)

        # --- k accumulated matmuls (one per time tap dh) -------------------
        acc = jnp.zeros((bblk * M * f, c_out), jnp.float32)
        for dh in range(k):
            # time shift = leading-dim slice; reshape keeps the lane dim fixed.
            r_dh = rbase[:, dh:dh + M].reshape(bblk * M * f, kc)
            acc = acc + jnp.dot(r_dh, w_ref[dh],
                                preferred_element_type=jnp.float32)
        a = (acc + b_vec).reshape(bblk, M, f, c_out)        # f32 activations

    # --- MaxPool2d(kernel=stride=pool), floor mode ------------------------
    c_last = channels[-1]
    m_out = M // pool
    f_out = f // pool
    # time pooling: split the (leading) time dim and reduce over the pool axis
    t = jnp.max(a[:, :m_out * pool].reshape(bblk, m_out, pool, f, c_last),
                axis=2)                                     # (B_blk, m_out, f, c)
    # feature pooling + lane-dense packing: f_out small sublane-slice maxes,
    # concatenated along lanes -> (B_blk, m_out, f_out*c_last)
    pieces = [jnp.max(t[:, :, uo * pool:(uo + 1) * pool, :], axis=2)
              for uo in range(f_out)]
    packed = jnp.concatenate(pieces, axis=-1)
    o_ref[...] = packed.astype(o_ref.dtype)


def causal_vgg_block(x, lengths, weights, biases, kernel_sizes,
                     pooling_kernel_size, *, batch_block=1,
                     compute_dtype=jnp.bfloat16):
    """x: (B, C0, M, f); weights[l]: (c_out_l, c_in_l, k_l, k_l); biases[l]: (c_out_l,)."""
    B, c0, M, f = x.shape
    n_conv = len(weights)
    channels = [int(c0)] + [int(w.shape[0]) for w in weights]
    ks = [int(k) for k in kernel_sizes]
    p = int(pooling_kernel_size)
    m_out, f_out = M // p, f // p
    c_last = channels[-1]
    assert B % batch_block == 0, "batch_block must divide B"

    itemsize_c = jnp.finfo(compute_dtype).bits // 8

    # NCHW -> channels-last (B, M, f, C): layout plumbing done in plain XLA.
    x_t = jnp.transpose(x, (0, 2, 3, 1))

    operands = [x_t]
    in_specs = [pl.BlockSpec((batch_block, M, f, c0), lambda b: (b, 0, 0, 0))]
    for l in range(n_conv):
        w = weights[l]
        c_out_l, c_in_l, kh, kw = (int(s) for s in w.shape)
        assert kh == kw == ks[l] and c_in_l == channels[l]
        # (c_out, c_in, kh, kw) -> (kh, kw*c_in, c_out); row index dv*c_in + ci.
        w_mat = jnp.transpose(w, (2, 3, 1, 0)).reshape(kh, kw * c_in_l, c_out_l)
        operands.append(w_mat.astype(compute_dtype))
        in_specs.append(pl.BlockSpec(w_mat.shape, lambda b: (0, 0, 0)))
        b_vec = biases[l].reshape(1, c_out_l).astype(jnp.float32)
        operands.append(b_vec)
        in_specs.append(pl.BlockSpec(b_vec.shape, lambda b: (0, 0)))

    kern = functools.partial(
        causal_vgg_kernel, channels=tuple(channels), ksizes=tuple(ks),
        bblk=batch_block, M=M, f=f, pool=p, compute_dtype=compute_dtype)

    # ---- explicit VMEM budget (double-buffered I/O + weights + working set),
    # kept under the v7x 64 MiB per-core budget; re-tile M/B for larger shapes.
    blk_in = batch_block * M * f * c0 * x.dtype.itemsize
    blk_out = batch_block * m_out * f_out * c_last * x.dtype.itemsize
    wb_bytes = sum(ks[l] * ks[l] * channels[l] * channels[l + 1] * itemsize_c
                   + channels[l + 1] * 4 for l in range(n_conv))
    work = 0
    for l in range(n_conv):
        k, cin, cout = ks[l], channels[l], channels[l + 1]
        rbase_b = batch_block * (M + k - 1) * f * k * cin * itemsize_c
        act_b = batch_block * M * f * (cin + 2 * cout) * 4
        work = max(work, rbase_b + act_b)
    vmem_limit = int(min(max(2 * (blk_in + blk_out) + 2 * wb_bytes + 2 * work,
                             16 << 20), 48 << 20))

    flops = int(2 * B * M * f * sum(channels[l] * channels[l + 1] * ks[l] * ks[l]
                                    for l in range(n_conv)))
    bytes_accessed = int(x.size * x.dtype.itemsize
                         + B * m_out * f_out * c_last * x.dtype.itemsize
                         + sum(int(w.size) for w in weights) * itemsize_c
                         + sum(int(b.size) for b in biases) * 4)

    out_packed = pl.pallas_call(
        kern,
        out_shape=jax.ShapeDtypeStruct((B, m_out, f_out * c_last), x.dtype),
        grid=(B // batch_block,),
        in_specs=in_specs,
        out_specs=pl.BlockSpec((batch_block, m_out, f_out * c_last),
                               lambda b: (b, 0, 0)),
        compiler_params=pltpu.CompilerParams(
            dimension_semantics=("parallel",),
            vmem_limit_bytes=vmem_limit),
        cost_estimate=pl.CostEstimate(flops=flops, transcendentals=0,
                                      bytes_accessed=bytes_accessed),
    )(*operands)

    # Unpack the lane-dense slab back to PyTorch layout (plain XLA).
    out = out_packed.reshape(B, m_out, f_out, c_last).transpose(0, 3, 1, 2)
    new_lengths = lengths // p      # trivial integer op, done in the wrapper
    return out, new_lengths


def reference_forward(x, lengths, weights, biases, kernel_sizes, p):
    """Plain-JAX reference matching PyTorch CausalVGGBlock.forward."""
    for w, b, k in zip(weights, biases, kernel_sizes):
        x = jnp.pad(x, ((0, 0), (0, 0), (k - 1, 0), (k - 1, 0)))
        x = jax.lax.conv_general_dilated(
            x, w, window_strides=(1, 1), padding="VALID",
            dimension_numbers=("NCHW", "OIHW", "NCHW"),
            precision=jax.lax.Precision.HIGHEST) + b[None, :, None, None]
    B, C, M, f = x.shape
    m_out, f_out = M // p, f // p
    x = x[:, :, :m_out * p, :f_out * p]
    x = x.reshape(B, C, m_out, p, f_out, p).max(axis=(3, 5))
    return x, lengths // p


if __name__ == "__main__":
    B, c_in, M, f = 2, 4, 16, 16
    out_channels = [8, 16]
    kernel_sizes = [3, 3]
    pooling_kernel_size = 2

    key = jax.random.PRNGKey(0)
    kx, kw, kb = jax.random.split(key, 3)
    x = jax.random.normal(kx, (B, c_in, M, f), dtype=jnp.float32)
    lengths = jnp.array([16, 12], dtype=jnp.int32)

    chans = [c_in] + out_channels
    wkeys = jax.random.split(kw, len(out_channels))
    bkeys = jax.random.split(kb, len(out_channels))
    weights = [jax.random.normal(wkeys[i],
                                 (chans[i + 1], chans[i], kernel_sizes[i], kernel_sizes[i]),
                                 dtype=jnp.float32) * 0.1
               for i in range(len(out_channels))]
    biases = [jax.random.normal(bkeys[i], (chans[i + 1],), dtype=jnp.float32) * 0.1
              for i in range(len(out_channels))]

    ref_out, ref_len = reference_forward(x, lengths, weights, biases,
                                         kernel_sizes, pooling_kernel_size)

    # 1) f32 MXU path: tight correctness check.
    out32, len32 = causal_vgg_block(x, lengths, weights, biases, kernel_sizes,
                                    pooling_kernel_size,
                                    compute_dtype=jnp.float32)
    out32 = jax.block_until_ready(out32)
    assert out32.shape == (B, out_channels[-1], M // pooling_kernel_size,
                           f // pooling_kernel_size), out32.shape
    assert jnp.allclose(out32, ref_out, atol=5e-3, rtol=5e-3), (
        "f32 mismatch vs reference: max abs diff = "
        f"{float(jnp.max(jnp.abs(out32 - ref_out)))}")
    assert jnp.array_equal(len32, ref_len), "lengths mismatch"

    # 2) bf16 MXU path (production setting per perf review): looser tolerance.
    out16, len16 = causal_vgg_block(x, lengths, weights, biases, kernel_sizes,
                                    pooling_kernel_size,
                                    compute_dtype=jnp.bfloat16)
    out16 = jax.block_until_ready(out16)
    assert out16.shape == ref_out.shape, out16.shape
    assert jnp.allclose(out16, ref_out, atol=4e-2, rtol=4e-2), (
        "bf16 mismatch vs reference: max abs diff = "
        f"{float(jnp.max(jnp.abs(out16 - ref_out)))}")
    assert jnp.array_equal(len16, ref_len), "lengths mismatch"

    print("KERNEL_OK")
</pallas_src>

<mosaic_0001>
module attributes {stable_mosaic.version = 11 : i64} {
  func.func @causal_vgg_kernel(%arg0: i32, %arg1: memref<1x16x16x4xf32, #tpu.memory_space<vmem>>, %arg2: memref<3x12x8xf32, #tpu.memory_space<vmem>>, %arg3: memref<1x8xf32, #tpu.memory_space<vmem>>, %arg4: memref<3x24x16xf32, #tpu.memory_space<vmem>>, %arg5: memref<1x16xf32, #tpu.memory_space<vmem>>, %arg6: memref<1x8x128xf32, #tpu.memory_space<vmem>>) attributes {dimension_semantics = [#tpu.dimension_semantics<parallel>], iteration_bounds = array<i64: 2>, scalar_prefetch = 0 : i64, scratch_operands = 0 : i64, tpu.core_type = #tpu.core_type<tc>, window_params = [{transform_indices = @transform_0, window_bounds = array<i64: 1, 16, 16, 4>}, {pipeline_mode = #tpu.pipeline_mode<synchronous>, transform_indices = @transform_1, window_bounds = array<i64: 3, 12, 8>}, {pipeline_mode = #tpu.pipeline_mode<synchronous>, transform_indices = @transform_2, window_bounds = array<i64: 1, 8>}, {pipeline_mode = #tpu.pipeline_mode<synchronous>, transform_indices = @transform_3, window_bounds = array<i64: 3, 24, 16>}, {pipeline_mode = #tpu.pipeline_mode<synchronous>, transform_indices = @transform_4, window_bounds = array<i64: 1, 16>}, {transform_indices = @transform_5, window_bounds = array<i64: 1, 8, 128>}]} {
    %c0 = arith.constant 0 : index
    %c0_0 = arith.constant 0 : index
    %c0_1 = arith.constant 0 : index
    %c0_2 = arith.constant 0 : index
    %0 = vector.load %arg1[%c0, %c0_0, %c0_1, %c0_2] : memref<1x16x16x4xf32, #tpu.memory_space<vmem>>, vector<1x16x16x4xf32>
    %c0_3 = arith.constant 0 : index
    %c0_4 = arith.constant 0 : index
    %1 = vector.load %arg3[%c0_3, %c0_4] : memref<1x8xf32, #tpu.memory_space<vmem>>, vector<1x8xf32>
    %cst = arith.constant 0.000000e+00 : f32
    %2 = vector.broadcast %cst : f32 to vector<1x16x2x4xf32>
    %3 = tpu.concatenate %2, %0 in 2 : vector<1x16x2x4xf32>, vector<1x16x16x4xf32> -> vector<1x16x18x4xf32>
    %4 = vector.extract_strided_slice %3 {offsets = [0, 0, 0, 0], sizes = [1, 16, 16, 4], strides = [1, 1, 1, 1]} : vector<1x16x18x4xf32> to vector<1x16x16x4xf32>
    %5 = vector.extract_strided_slice %3 {offsets = [0, 0, 1, 0], sizes = [1, 16, 16, 4], strides = [1, 1, 1, 1]} : vector<1x16x18x4xf32> to vector<1x16x16x4xf32>
    %6 = vector.extract_strided_slice %3 {offsets = [0, 0, 2, 0], sizes = [1, 16, 16, 4], strides = [1, 1, 1, 1]} : vector<1x16x18x4xf32> to vector<1x16x16x4xf32>
    %7 = tpu.concatenate %4, %5, %6 in 3 : vector<1x16x16x4xf32>, vector<1x16x16x4xf32>, vector<1x16x16x4xf32> -> vector<1x16x16x12xf32>
    %cst_5 = arith.constant 0.000000e+00 : f32
    %8 = vector.broadcast %cst_5 : f32 to vector<1x2x16x12xf32>
    %9 = tpu.concatenate %8, %7 in 1 : vector<1x2x16x12xf32>, vector<1x16x16x12xf32> -> vector<1x18x16x12xf32>
    %cst_6 = arith.constant 0.000000e+00 : f32
    %10 = vector.broadcast %cst_6 : f32 to vector<256x8xf32>
    %11 = vector.extract_strided_slice %9 {offsets = [0, 0, 0, 0], sizes = [1, 16, 16, 12], strides = [1, 1, 1, 1]} : vector<1x18x16x12xf32> to vector<1x16x16x12xf32>
    %12 = vector.shape_cast %11 : vector<1x16x16x12xf32> to vector<256x12xf32>
    %c0_7 = arith.constant 0 : index
    %c0_8 = arith.constant 0 : index
    %c0_9 = arith.constant 0 : index
    %13 = vector.load %arg2[%c0_7, %c0_8, %c0_9] : memref<3x12x8xf32, #tpu.memory_space<vmem>>, vector<1x12x8xf32>
    %14 = vector.shape_cast %13 : vector<1x12x8xf32> to vector<12x8xf32>
    %cst_10 = arith.constant dense<0.000000e+00> : vector<256x8xf32>
    %15 = tpu.matmul %12, %14, %cst_10 {dimension_numbers = #tpu.dot_dimension_numbers<[1], [0], [0], [1], [0, 0, 1, 1], [], []>} : vector<256x12xf32>, vector<12x8xf32>, vector<256x8xf32> -> vector<256x8xf32>
    %16 = arith.addf %10, %15 : vector<256x8xf32>
    %17 = vector.extract_strided_slice %9 {offsets = [0, 1, 0, 0], sizes = [1, 16, 16, 12], strides = [1, 1, 1, 1]} : vector<1x18x16x12xf32> to vector<1x16x16x12xf32>
    %18 = vector.shape_cast %17 : vector<1x16x16x12xf32> to vector<256x12xf32>
    %c1 = arith.constant 1 : index
    %c0_11 = arith.constant 0 : index
    %c0_12 = arith.constant 0 : index
    %19 = vector.load %arg2[%c1, %c0_11, %c0_12] : memref<3x12x8xf32, #tpu.memory_space<vmem>>, vector<1x12x8xf32>
    %20 = vector.shape_cast %19 : vector<1x12x8xf32> to vector<12x8xf32>
    %cst_13 = arith.constant dense<0.000000e+00> : vector<256x8xf32>
    %21 = tpu.matmul %18, %20, %cst_13 {dimension_numbers = #tpu.dot_dimension_numbers<[1], [0], [0], [1], [0, 0, 1, 1], [], []>} : vector<256x12xf32>, vector<12x8xf32>, vector<256x8xf32> -> vector<256x8xf32>
    %22 = arith.addf %16, %21 : vector<256x8xf32>
    %23 = vector.extract_strided_slice %9 {offsets = [0, 2, 0, 0], sizes = [1, 16, 16, 12], strides = [1, 1, 1, 1]} : vector<1x18x16x12xf32> to vector<1x16x16x12xf32>
    %24 = vector.shape_cast %23 : vector<1x16x16x12xf32> to vector<256x12xf32>
    %c2 = arith.constant 2 : index
    %c0_14 = arith.constant 0 : index
    %c0_15 = arith.constant 0 : index
    %25 = vector.load %arg2[%c2, %c0_14, %c0_15] : memref<3x12x8xf32, #tpu.memory_space<vmem>>, vector<1x12x8xf32>
    %26 = vector.shape_cast %25 : vector<1x12x8xf32> to vector<12x8xf32>
    %cst_16 = arith.constant dense<0.000000e+00> : vector<256x8xf32>
    %27 = tpu.matmul %24, %26, %cst_16 {dimension_numbers = #tpu.dot_dimension_numbers<[1], [0], [0], [1], [0, 0, 1, 1], [], []>} : vector<256x12xf32>, vector<12x8xf32>, vector<256x8xf32> -> vector<256x8xf32>
    %28 = arith.addf %22, %27 : vector<256x8xf32>
    %29 = vector.broadcast %1 : vector<1x8xf32> to vector<256x8xf32>
    %30 = arith.addf %28, %29 : vector<256x8xf32>
    %31 = vector.shape_cast %30 : vector<256x8xf32> to vector<1x16x16x8xf32>
    %c0_17 = arith.constant 0 : index
    %c0_18 = arith.constant 0 : index
    %32 = vector.load %arg5[%c0_17, %c0_18] : memref<1x16xf32, #tpu.memory_space<vmem>>, vector<1x16xf32>
    %cst_19 = arith.constant 0.000000e+00 : f32
    %33 = vector.broadcast %cst_19 : f32 to vector<1x16x2x8xf32>
    %34 = tpu.concatenate %33, %31 in 2 : vector<1x16x2x8xf32>, vector<1x16x16x8xf32> -> vector<1x16x18x8xf32>
    %35 = vector.extract_strided_slice %34 {offsets = [0, 0, 0, 0], sizes = [1, 16, 16, 8], strides = [1, 1, 1, 1]} : vector<1x16x18x8xf32> to vector<1x16x16x8xf32>
    %36 = vector.extract_strided_slice %34 {offsets = [0, 0, 1, 0], sizes = [1, 16, 16, 8], strides = [1, 1, 1, 1]} : vector<1x16x18x8xf32> to vector<1x16x16x8xf32>
    %37 = vector.extract_strided_slice %34 {offsets = [0, 0, 2, 0], sizes = [1, 16, 16, 8], strides = [1, 1, 1, 1]} : vector<1x16x18x8xf32> to vector<1x16x16x8xf32>
    %38 = tpu.concatenate %35, %36, %37 in 3 : vector<1x16x16x8xf32>, vector<1x16x16x8xf32>, vector<1x16x16x8xf32> -> vector<1x16x16x24xf32>
    %cst_20 = arith.constant 0.000000e+00 : f32
    %39 = vector.broadcast %cst_20 : f32 to vector<1x2x16x24xf32>
    %40 = tpu.concatenate %39, %38 in 1 : vector<1x2x16x24xf32>, vector<1x16x16x24xf32> -> vector<1x18x16x24xf32>
    %cst_21 = arith.constant 0.000000e+00 : f32
    %41 = vector.broadcast %cst_21 : f32 to vector<256x16xf32>
    %42 = vector.extract_strided_slice %40 {offsets = [0, 0, 0, 0], sizes = [1, 16, 16, 24], strides = [1, 1, 1, 1]} : vector<1x18x16x24xf32> to vector<1x16x16x24xf32>
    %43 = vector.shape_cast %42 : vector<1x16x16x24xf32> to vector<256x24xf32>
    %c0_22 = arith.constant 0 : index
    %c0_23 = arith.constant 0 : index
    %c0_24 = arith.constant 0 : index
    %44 = vector.load %arg4[%c0_22, %c0_23, %c0_24] : memref<3x24x16xf32, #tpu.memory_space<vmem>>, vector<1x24x16xf32>
    %45 = vector.shape_cast %44 : vector<1x24x16xf32> to vector<24x16xf32>
    %cst_25 = arith.constant dense<0.000000e+00> : vector<256x16xf32>
    %46 = tpu.matmul %43, %45, %cst_25 {dimension_numbers = #tpu.dot_dimension_numbers<[1], [0], [0], [1], [0, 0, 1, 1], [], []>} : vector<256x24xf32>, vector<24x16xf32>, vector<256x16xf32> -> vector<256x16xf32>
    %47 = arith.addf %41, %46 : vector<256x16xf32>
    %48 = vector.extract_strided_slice %40 {offsets = [0, 1, 0, 0], sizes = [1, 16, 16, 24], strides = [1, 1, 1, 1]} : vector<1x18x16x24xf32> to vector<1x16x16x24xf32>
    %49 = vector.shape_cast %48 : vector<1x16x16x24xf32> to vector<256x24xf32>
    %c1_26 = arith.constant 1 : index
    %c0_27 = arith.constant 0 : index
    %c0_28 = arith.constant 0 : index
    %50 = vector.load %arg4[%c1_26, %c0_27, %c0_28] : memref<3x24x16xf32, #tpu.memory_space<vmem>>, vector<1x24x16xf32>
    %51 = vector.shape_cast %50 : vector<1x24x16xf32> to vector<24x16xf32>
    %cst_29 = arith.constant dense<0.000000e+00> : vector<256x16xf32>
    %52 = tpu.matmul %49, %51, %cst_29 {dimension_numbers = #tpu.dot_dimension_numbers<[1], [0], [0], [1], [0, 0, 1, 1], [], []>} : vector<256x24xf32>, vector<24x16xf32>, vector<256x16xf32> -> vector<256x16xf32>
    %53 = arith.addf %47, %52 : vector<256x16xf32>
    %54 = vector.extract_strided_slice %40 {offsets = [0, 2, 0, 0], sizes = [1, 16, 16, 24], strides = [1, 1, 1, 1]} : vector<1x18x16x24xf32> to vector<1x16x16x24xf32>
    %55 = vector.shape_cast %54 : vector<1x16x16x24xf32> to vector<256x24xf32>
    %c2_30 = arith.constant 2 : index
    %c0_31 = arith.constant 0 : index
    %c0_32 = arith.constant 0 : index
    %56 = vector.load %arg4[%c2_30, %c0_31, %c0_32] : memref<3x24x16xf32, #tpu.memory_space<vmem>>, vector<1x24x16xf32>
    %57 = vector.shape_cast %56 : vector<1x24x16xf32> to vector<24x16xf32>
    %cst_33 = arith.constant dense<0.000000e+00> : vector<256x16xf32>
    %58 = tpu.matmul %55, %57, %cst_33 {dimension_numbers = #tpu.dot_dimension_numbers<[1], [0], [0], [1], [0, 0, 1, 1], [], []>} : vector<256x24xf32>, vector<24x16xf32>, vector<256x16xf32> -> vector<256x16xf32>
    %59 = arith.addf %53, %58 : vector<256x16xf32>
    %60 = vector.broadcast %32 : vector<1x16xf32> to vector<256x16xf32>
    %61 = arith.addf %59, %60 : vector<256x16xf32>
    %62 = vector.shape_cast %61 : vector<256x16xf32> to vector<1x16x16x16xf32>
    %63 = vector.shape_cast %62 : vector<1x16x16x16xf32> to vector<1x8x2x16x16xf32>
    %cst_34 = arith.constant dense<0xFF800000> : vector<1x8x16x16xf32>
    %64 = vector.multi_reduction <maximumf>, %63, %cst_34 [2] : vector<1x8x2x16x16xf32> to vector<1x8x16x16xf32>
    %65 = vector.extract_strided_slice %64 {offsets = [0, 0, 0, 0], sizes = [1, 8, 2, 16], strides = [1, 1, 1, 1]} : vector<1x8x16x16xf32> to vector<1x8x2x16xf32>
    %cst_35 = arith.constant dense<0xFF800000> : vector<1x8x16xf32>
    %66 = vector.multi_reduction <maximumf>, %65, %cst_35 [2] : vector<1x8x2x16xf32> to vector<1x8x16xf32>
    %67 = vector.extract_strided_slice %64 {offsets = [0, 0, 2, 0], sizes = [1, 8, 2, 16], strides = [1, 1, 1, 1]} : vector<1x8x16x16xf32> to vector<1x8x2x16xf32>
    %cst_36 = arith.constant dense<0xFF800000> : vector<1x8x16xf32>
    %68 = vector.multi_reduction <maximumf>, %67, %cst_36 [2] : vector<1x8x2x16xf32> to vector<1x8x16xf32>
    %69 = vector.extract_strided_slice %64 {offsets = [0, 0, 4, 0], sizes = [1, 8, 2, 16], strides = [1, 1, 1, 1]} : vector<1x8x16x16xf32> to vector<1x8x2x16xf32>
    %cst_37 = arith.constant dense<0xFF800000> : vector<1x8x16xf32>
    %70 = vector.multi_reduction <maximumf>, %69, %cst_37 [2] : vector<1x8x2x16xf32> to vector<1x8x16xf32>
    %71 = vector.extract_strided_slice %64 {offsets = [0, 0, 6, 0], sizes = [1, 8, 2, 16], strides = [1, 1, 1, 1]} : vector<1x8x16x16xf32> to vector<1x8x2x16xf32>
    %cst_38 = arith.constant dense<0xFF800000> : vector<1x8x16xf32>
    %72 = vector.multi_reduction <maximumf>, %71, %cst_38 [2] : vector<1x8x2x16xf32> to vector<1x8x16xf32>
    %73 = vector.extract_strided_slice %64 {offsets = [0, 0, 8, 0], sizes = [1, 8, 2, 16], strides = [1, 1, 1, 1]} : vector<1x8x16x16xf32> to vector<1x8x2x16xf32>
    %cst_39 = arith.constant dense<0xFF800000> : vector<1x8x16xf32>
    %74 = vector.multi_reduction <maximumf>, %73, %cst_39 [2] : vector<1x8x2x16xf32> to vector<1x8x16xf32>
    %75 = vector.extract_strided_slice %64 {offsets = [0, 0, 10, 0], sizes = [1, 8, 2, 16], strides = [1, 1, 1, 1]} : vector<1x8x16x16xf32> to vector<1x8x2x16xf32>
    %cst_40 = arith.constant dense<0xFF800000> : vector<1x8x16xf32>
    %76 = vector.multi_reduction <maximumf>, %75, %cst_40 [2] : vector<1x8x2x16xf32> to vector<1x8x16xf32>
    %77 = vector.extract_strided_slice %64 {offsets = [0, 0, 12, 0], sizes = [1, 8, 2, 16], strides = [1, 1, 1, 1]} : vector<1x8x16x16xf32> to vector<1x8x2x16xf32>
    %cst_41 = arith.constant dense<0xFF800000> : vector<1x8x16xf32>
    %78 = vector.multi_reduction <maximumf>, %77, %cst_41 [2] : vector<1x8x2x16xf32> to vector<1x8x16xf32>
    %79 = vector.extract_strided_slice %64 {offsets = [0, 0, 14, 0], sizes = [1, 8, 2, 16], strides = [1, 1, 1, 1]} : vector<1x8x16x16xf32> to vector<1x8x2x16xf32>
    %cst_42 = arith.constant dense<0xFF800000> : vector<1x8x16xf32>
    %80 = vector.multi_reduction <maximumf>, %79, %cst_42 [2] : vector<1x8x2x16xf32> to vector<1x8x16xf32>
    %81 = tpu.concatenate %66, %68, %70, %72, %74, %76, %78, %80 in 2 : vector<1x8x16xf32>, vector<1x8x16xf32>, vector<1x8x16xf32>, vector<1x8x16xf32>, vector<1x8x16xf32>, vector<1x8x16xf32>, vector<1x8x16xf32>, vector<1x8x16xf32> -> vector<1x8x128xf32>
    %c0_43 = arith.constant 0 : index
    %c0_44 = arith.constant 0 : index
    %c0_45 = arith.constant 0 : index
    %82 = vector.load %arg6[%c0_43, %c0_44, %c0_45] : memref<1x8x128xf32, #tpu.memory_space<vmem>>, vector<1x8x128xf32>
    tpu.vector_store %arg6[%c0_43, %c0_44, %c0_45], %81 {strides = array<i32>} : memref<1x8x128xf32, #tpu.memory_space<vmem>>, vector<1x8x128xf32>,
    return
  }
  func.func @transform_0(%arg0: i32) -> (i32, i32, i32, i32) {
    %c0_i32 = arith.constant 0 : i32
    %c0_i32_0 = arith.constant 0 : i32
    %c0_i32_1 = arith.constant 0 : i32
    %c0_i32_2 = arith.constant 0 : i32
    return %arg0, %c0_i32, %c0_i32_0, %c0_i32_1 : i32, i32, i32, i32
  }
  func.func @transform_1(%arg0: i32) -> (i32, i32, i32) {
    %c0_i32 = arith.constant 0 : i32
    %c0_i32_0 = arith.constant 0 : i32
    %c0_i32_1 = arith.constant 0 : i32
    %c0_i32_2 = arith.constant 0 : i32
    return %c0_i32, %c0_i32_0, %c0_i32_1 : i32, i32, i32
  }
  func.func @transform_2(%arg0: i32) -> (i32, i32) {
    %c0_i32 = arith.constant 0 : i32
    %c0_i32_0 = arith.constant 0 : i32
    %c0_i32_1 = arith.constant 0 : i32
    return %c0_i32, %c0_i32_0 : i32, i32
  }
  func.func @transform_3(%arg0: i32) -> (i32, i32, i32) {
    %c0_i32 = arith.constant 0 : i32
    %c0_i32_0 = arith.constant 0 : i32
    %c0_i32_1 = arith.constant 0 : i32
    %c0_i32_2 = arith.constant 0 : i32
    return %c0_i32, %c0_i32_0, %c0_i32_1 : i32, i32, i32
  }
  func.func @transform_4(%arg0: i32) -> (i32, i32) {
    %c0_i32 = arith.constant 0 : i32
    %c0_i32_0 = arith.constant 0 : i32
    %c0_i32_1 = arith.constant 0 : i32
    return %c0_i32, %c0_i32_0 : i32, i32
  }
  func.func @transform_5(%arg0: i32) -> (i32, i32, i32) {
    %c0_i32 = arith.constant 0 : i32
    %c0_i32_0 = arith.constant 0 : i32
    %c0_i32_1 = arith.constant 0 : i32
    return %arg0, %c0_i32, %c0_i32_0 : i32, i32, i32
  }
}

</mosaic_0001>

<bundles_post_ra>
// kernel: tpu_custom_call.1
= control target key start
LH: loop header
LB: loop body
LE: loop exit
PB: predicated region body
PF: predicated region fallthrough
CT: control target
= control target key end

     0   :  { %10 = vsyncpa [#allocation3], 0  ;;  %s5366_s0 = inlined_call_operand.vmem [shape: f32[2,16,16,4], index: 0, kind: input, shape index: {}]   ;;  %s5367_s1 = inlined_call_operand.vmem [shape: f32[3,12,8], index: 1, kind: input, shape index: {}]   ;;  %s5368_s2 = inlined_call_operand.vmem [shape: f32[1,8], index: 2, kind: input, shape index: {}]   ;;  %s5369_s3 = inlined_call_operand.vmem [shape: f32[3,24,16], index: 3, kind: input, shape index: {}]   ;;  %s5370_s4 = inlined_call_operand.vmem [shape: f32[1,16], index: 4, kind: input, shape index: {}]   ;;  %s5371_s5 = inlined_call_operand.hbm [shape: f32[2,8,128], index: 5, kind: output, shape index: {}]  }
   0x1   :  { %12 = vsyncpa [#allocation3 + $0x1], 0  ;;  %s3527_s18 = smov 0   ;;  %s3529_s19 = smov 0  }
   0x2   :  { %s3531_s20 = smov 0   ;;  %s3533_s21 = smov 0  }
   0x3 LB: > { %s3548_s22 = sadd.s32 4294967295, %s3485_s21   ;;  %s3161_s23 = sadd.s32 4294967294, %s3485_s21   ;;  %s3485_s21 = sphi %s3533_s21, %s5377_s21   ;;  %s3481_s20 = sphi %s3531_s20, %s5376_s20   ;;  %s3477_s19 = sphi %s3529_s19, %s5375_s19   ;;  %s3473_s18 = sphi %s3527_s18, %s5374_s18  }
   0x4   : > { %s3552_s24 = sadd.s32 1, %s3485_s21   ;;  %s135_s25 = sadd.s32 1, %s3481_s20 }
   0x5   : > { %s132_s26 = ssub.s32 %s3485_s21, %s3552_s24  ;;  %p145_p0 = scmp.ne.s32.totalorder %s3481_s20, %s3477_s19 }
   0x6   : > { %p133_p1 = scmp.eq.s32.totalorder %s132_s26, 0  ;;  %p146_p2 = scmp.eq.s32.totalorder %s3548_s22, 1 }
   0x7   : > { %p151_p3 = scmp.ne.s32.totalorder %s3477_s19, %s3473_s18  ;;  %p152_p4 = scmp.eq.s32.totalorder %s3161_s23, 1 }
   0x8   : > { %s3563_s27 = scalar_select %p133_p1, %s3481_s20, %s135_s25  }
   0x9   : > { %p3565_p5 = por %p146_p2, %p145_p0  ;;  %p3569_p6 = por %p152_p4, %p151_p3 }
   0xa   : > { %p3164_p7 = scmp.ge.s32.totalorder %s3485_s21, 1  ;;  %p190_p8 = scmp.lt.s32.totalorder %s3485_s21, 3 }
   0xc   : > { %p191_p9 = pnand %p3164_p7, %p190_p8 }
   0xd   : > { %p218_p10 = scmp.lt.s32.totalorder (!%p191_p9), %s3548_s22, 1  ;;  %s3487_s10 = smov (!%p191_p9), 4  }
   0xe   : > { %194 = sbr.rel (%p191_p9) target bundleno = 1149 (0x47d), region = 40  ;;  %s3488_s11 = smov (!%p191_p9), 8  }
   0xf   : > { %s3490_s13 = smov (!%p191_p9), 16   ;;  %s3494_s7 = smov (!%p191_p9), 80  }
  0x10   : > { %s3495_s8 = smov (!%p191_p9), 64   ;;  %s3496_s12 = smov (!%p191_p9), 112  }
  0x11   : > { %s3362_s15 = sshll.u32 (!%p191_p9), %s3548_s22, 3 }
  0x12   : > { %s3097_s23 = scalar_lea.hbm (!%p191_p9), %s5371_s5, %s3362_s15 }
  0x13   : > { %s219_s30 = scalar_select %p218_p10, %s3548_s22, 1  ;;  %vm288_vm0 = vcmask 1041408   ;;  %vm401_vm1 = vcmask 1046528   ;;  %vm578_vm2 = vcmask 1045504   ;;  %vm920_vm3 = vcmask 1043456  }
  0x14   : > { %vm755_vm4 = vcmask 31744   ;;  %vm788_vm5 = vcmask 64512   ;;  %vm826_vm6 = vcmask 97280   ;;  %vm1874_vm7 = vcmask 130048  }
  0x15   : > { %s3365_s6 = sshll.u32 %s219_s30, 8  ;;  %vm1914_vm8 = vcmask 195584   ;;  %vm2471_vm9 = vcmask 123904   ;;  %vm2528_vm10 = vcmask 125954   ;;  %vm2585_vm11 = vcmask 128004  }
  0x16   : > { %s3580_s9 = scalar_lea.vmem %s5366_s0, %s3365_s6  ;;  %vm2642_vm12 = vcmask 130054   ;;  %vm2931_vm13 = vcmask 1041409   ;;  %vm2933_vm14 = vcmask 1042434   ;;  %vm2935_vm15 = vcmask 1043459   ;;  %s3491_s6 = smov 48  }
  0x17   : > { %v237_v0 = vld [vmem:[%s3580_s9 + $0x70] sm:$0xff]  ;;  %v238_v1 = vld [vmem:[%s3580_s9 + $0x78] sm:$0xff]  ;;  %v239_v2 = vld [vmem:[%s3580_s9 + $0x80] sm:$0xff] }
  0x18   : > { %v310_v3 = vrot.slane %v237_v0, 6  ;;  %v311_v4 = vrot.slane %v238_v1, 6  ;;  %v240_v5 = vld [vmem:[%s3580_s9 + $0x88] sm:$0xff]  ;;  %v313_v6 = vrot.slane %v239_v2, 6  ;;  %v241_v25 = vld [vmem:[%s3580_s9 + $0x90] sm:$0xff]  ;;  %v242_v26 = vld [vmem:[%s3580_s9 + $0x98] sm:$0xff] }
  0x19   : > { %v314_v10 = vrot.slane %v240_v5, 6  ;;  %v316_v31 = vrot.slane %v241_v25, 6  ;;  %v317_v32 = vrot.slane %v242_v26, 6  ;;  %v243_v38 = vld [vmem:[%s3580_s9 + $0xa0] sm:$0xff]  ;;  %v244_v39 = vld [vmem:[%s3580_s9 + $0xa8] sm:$0xff]  ;;  %v245_v52 = vld [vmem:[%s3580_s9 + $0xb0] sm:$0xff] }
  0x1a   : > { %v3587_v7 = vsel %vm288_vm0, %v310_v3, %v311_v4  ;;  %v440_v8 = vrot.slane %v311_v4, 1  ;;  %v3590_v9 = vsel %vm288_vm0, 0.0, %v310_v3  ;;  %v617_v17 = vrot.slane %v311_v4, 2  ;;  %v246_v53 = vld [vmem:[%s3580_s9 + $0xb8] sm:$0xff]  ;;  %v249_v26 = vld [vmem:[%s3580_s9 + $0xd0] sm:$0xff] }
  0x1b   : > { %v438_v11 = vrot.slane %v3587_v7, 1  ;;  %v437_v12 = vrot.slane %v3590_v9, 1  ;;  %v3599_v15 = vsel %vm288_vm0, %v313_v6, %v314_v10  ;;  %v615_v16 = vrot.slane %v3587_v7, 2 }
  0x1c   : > { %v614_v18 = vrot.slane %v3590_v9, 2  ;;  %v3604_v19 = vsel %vm288_vm0, 0.0, %v313_v6  ;;  %v443_v20 = vrot.slane %v3599_v15, 1  ;;  %v620_v28 = vrot.slane %v3599_v15, 2 }
  0x1d   : > { %v441_v13 = vsel %vm401_vm1, %v438_v11, %v440_v8  ;;  %v439_v14 = vsel %vm401_vm1, %v437_v12, %v438_v11  ;;  %v442_v21 = vrot.slane %v3604_v19, 1  ;;  %v618_v22 = vsel %vm578_vm2, %v615_v16, %v617_v17  ;;  %v247_v11 = vld [vmem:[%s3580_s9 + $0xc0] sm:$0xff]  ;;  %v248_v12 = vld [vmem:[%s3580_s9 + $0xc8] sm:$0xff] }
  0x1e   : > { %512 = vrot.lane.b32.xlu1 %v441_v13, %s3487_s10  ;;  %510 = vrot.lane.b32.xlu0 %v439_v14, %s3487_s10  ;;  %v616_v23 = vsel %vm578_vm2, %v614_v18, %v615_v16  ;;  %v619_v27 = vrot.slane %v3604_v19, 2  ;;  %v622_v29 = vrot.slane %v314_v10, 2  ;;  %v445_v30 = vrot.slane %v314_v10, 1 }
  0x1f   : > { %v444_v24 = vsel %vm401_vm1, %v442_v21, %v443_v20  ;;  %v3622_v36 = vsel %vm288_vm0, %v316_v31, %v317_v32  ;;  %v3625_v37 = vsel %vm288_vm0, 0.0, %v316_v31  ;;  %v450_v42 = vrot.slane %v317_v32, 1 }
  0x20   : > { %514 = vrot.lane.b32.xlu2 %v444_v24, %s3487_s10  ;;  %v621_v33 = vsel %vm578_vm2, %v619_v27, %v620_v28  ;;  %v623_v34 = vsel %vm578_vm2, %v620_v28, %v622_v29  ;;  %v446_v35 = vsel %vm401_vm1, %v443_v20, %v445_v30  ;;  %v447_v40 = vrot.slane %v3625_v37, 1  ;;  %v250_v27 = vld [vmem:[%s3580_s9 + $0xd8] sm:$0xff] }
  0x21   : > { %v448_v41 = vrot.slane %v3622_v36, 1  ;;  %v624_v43 = vrot.slane %v3625_v37, 2  ;;  %v625_v44 = vrot.slane %v3622_v36, 2  ;;  %v319_v45 = vrot.slane %v243_v38, 6 }
  0x22   : > { %v320_v46 = vrot.slane %v244_v39, 6  ;;  %v627_v54 = vrot.slane %v317_v32, 2  ;;  %v322_v59 = vrot.slane %v245_v52, 6  ;;  %v323_v60 = vrot.slane %v246_v53, 6 }
  0x23   : > { %v449_v47 = vsel %vm401_vm1, %v447_v40, %v448_v41  ;;  %v451_v48 = vsel %vm401_vm1, %v448_v41, %v450_v42  ;;  %v626_v49 = vsel %vm578_vm2, %v624_v43, %v625_v44  ;;  %v3643_v51 = vsel %vm288_vm0, 0.0, %v319_v45  ;;  %v251_v42 = vld [vmem:[%s3580_s9 + $0xe0] sm:$0xff]  ;;  %v252_v43 = vld [vmem:[%s3580_s9 + $0xe8] sm:$0xff] }
  0x24   : > { %v3640_v50 = vsel %vm288_vm0, %v319_v45, %v320_v46  ;;  %v629_v55 = vrot.slane %v3643_v51, 2  ;;  %v452_v57 = vrot.slane %v3643_v51, 1  ;;  %v628_v61 = vsel %vm578_vm2, %v625_v44, %v627_v54 }
  0x25   : > { %v630_v56 = vrot.slane %v3640_v50, 2  ;;  %v453_v58 = vrot.slane %v3640_v50, 1  ;;  %v3658_v0 = vsel %vm288_vm0, %v322_v59, %v323_v60  ;;  %v3661_v1 = vsel %vm288_vm0, 0.0, %v322_v59 }
  0x26   : > { %689 = vrot.lane.b32.xlu1 %v618_v22, %s3488_s11  ;;  %687 = vrot.lane.b32.xlu0 %v616_v23, %s3488_s11  ;;  %v455_v2 = vrot.slane %v320_v46, 1  ;;  %v457_v3 = vrot.slane %v3661_v1, 1  ;;  %v458_v4 = vrot.slane %v3658_v0, 1  ;;  %v632_v5 = vrot.slane %v320_v46, 2 }
  0x27   : > { %v631_v62 = vsel %vm578_vm2, %v629_v55, %v630_v56  ;;  %v454_v63 = vsel %vm401_vm1, %v452_v57, %v453_v58  ;;  %v634_v13 = vrot.slane %v3661_v1, 2  ;;  %v635_v14 = vrot.slane %v3658_v0, 2 }
  0x28   : > { %691 = vrot.lane.b32.xlu2 %v621_v33, %s3488_s11  ;;  %v456_v6 = vsel %vm401_vm1, %v453_v58, %v455_v2  ;;  %v459_v8 = vsel %vm401_vm1, %v457_v3, %v458_v4  ;;  %v633_v10 = vsel %vm578_vm2, %v630_v56, %v632_v5  ;;  %v637_v16 = vrot.slane %v323_v60, 2  ;;  %v223_v3 = vld [vmem:[%s3580_s9] sm:$0xff] }
  0x29   : > { %v460_v17 = vrot.slane %v323_v60, 1  ;;  %v325_v18 = vrot.slane %v247_v11, 6  ;;  %v326_v20 = vrot.slane %v248_v12, 6  ;;  %v636_v21 = vsel %vm578_vm2, %v634_v13, %v635_v14 }
  0x2a   : > { %v638_v22 = vsel %vm578_vm2, %v635_v14, %v637_v16  ;;  %v328_v33 = vrot.slane %v249_v26, 6  ;;  %v332_v52 = vrot.slane %v252_v43, 6  ;;  %v289_v11 = vrot.slane %v223_v3, 6  ;;  %v3169_v43 = vld [vmem:[%s5367_s1 + $0x18] sm:$0xf] }
  0x2b   : > { %v461_v23 = vsel %vm401_vm1, %v458_v4, %v460_v17  ;;  %v3682_v24 = vsel %vm288_vm0, %v325_v18, %v326_v20  ;;  %v3685_v25 = vsel %vm288_vm0, 0.0, %v325_v18  ;;  %v465_v30 = vrot.slane %v326_v20, 1  ;;  %v224_v4 = vld [vmem:[%s3580_s9 + $0x8] sm:$0xff]  ;;  %3366 = vmatpush.msk.msra.mxu2 %vm920_vm3, %v3169_v43  ;;  %3170 = vmatpush.msk.msra.mxu0 %vm920_vm3, %v3169_v43 }
  0x2c   : > { %v462_v28 = vrot.slane %v3685_v25, 1  ;;  %v463_v29 = vrot.slane %v3682_v24, 1  ;;  %v639_v31 = vrot.slane %v3685_v25, 2  ;;  %v640_v32 = vrot.slane %v3682_v24, 2 }
  0x2d   : > { %v3703_v41 = vsel %vm288_vm0, 0.0, %v328_v33  ;;  %v642_v44 = vrot.slane %v326_v20, 2  ;;  %v290_v12 = vrot.slane %v224_v4, 6  ;;  %v3745_v18 = vsel %vm288_vm0, 0.0, %v289_v11  ;;  %v225_v20 = vld [vmem:[%s3580_s9 + $0x10] sm:$0xff] }
  0x2e   : > { %693 = vrot.lane.b32.xlu1 %v623_v34, %s3488_s11  ;;  %516 = vrot.lane.b32.xlu0 %v446_v35, %s3487_s10  ;;  %v329_v34 = vrot.slane %v250_v27, 6  ;;  %v464_v35 = vsel %vm401_vm1, %v462_v28, %v463_v29  ;;  %v466_v38 = vsel %vm401_vm1, %v463_v29, %v465_v30  ;;  %v641_v39 = vsel %vm578_vm2, %v639_v31, %v640_v32 }
  0x2f   : > { %v644_v45 = vrot.slane %v3703_v41, 2  ;;  %v643_v53 = vsel %vm578_vm2, %v640_v32, %v642_v44  ;;  %v3742_v17 = vsel %vm288_vm0, %v289_v11, %v290_v12  ;;  %v405_v28 = vrot.slane %v290_v12, 1  ;;  %v235_v11 = vld [vmem:[%s3580_s9 + $0x60] sm:$0xff] }
  0x30   : > { %518 = vrot.lane.b32.xlu2 %v449_v47, %s3487_s10  ;;  %v3700_v40 = vsel %vm288_vm0, %v328_v33, %v329_v34  ;;  %v467_v47 = vrot.slane %v3703_v41, 1  ;;  %v470_v58 = vrot.slane %v329_v34, 1  ;;  %v580_v26 = vrot.slane %v3742_v17, 2 }
  0x31   : > { %v645_v46 = vrot.slane %v3700_v40, 2  ;;  %v403_v27 = vrot.slane %v3742_v17, 1  ;;  %v292_v29 = vrot.slane %v225_v20, 6 }
  0x33   : > { %v646_v54 = vsel %vm578_vm2, %v644_v45, %v645_v46  ;;  %v406_v33 = vsel %vm401_vm1, %v403_v27, %v405_v28 }
  0x36   : > { %520 = vrot.lane.b32.xlu1 %v451_v48, %s3487_s10  ;;  %695 = vrot.lane.b32.xlu0 %v626_v49, %s3488_s11  ;;  %v468_v48 = vrot.slane %v3700_v40, 1  ;;  %v331_v49 = vrot.slane %v251_v42, 6  ;;  %v582_v42 = vrot.slane %v290_v12, 2  ;;  %v236_v12 = vld [vmem:[%s3580_s9 + $0x68] sm:$0xff] }
  0x38   : > { %697 = vrot.lane.b32.xlu2 %v628_v61, %s3488_s11  ;;  %v469_v55 = vsel %vm401_vm1, %v467_v47, %v468_v48  ;;  %v3718_v56 = vsel %vm288_vm0, %v331_v49, %v332_v52  ;;  %v3721_v57 = vsel %vm288_vm0, 0.0, %v331_v49  ;;  %v647_v61 = vrot.slane %v329_v34, 2 }
  0x39   : > { %v472_v59 = vrot.slane %v3721_v57, 1  ;;  %v473_v60 = vrot.slane %v3718_v56, 1  ;;  %v649_v5 = vrot.slane %v3721_v57, 2 }
  0x3a   : > { %v648_v2 = vsel %vm578_vm2, %v645_v46, %v647_v61 }
  0x3e   : > { %699 = vrot.lane.b32.xlu1 %v631_v62, %s3488_s11  ;;  %522 = vrot.lane.b32.xlu0 %v454_v63, %s3487_s10  ;;  %v471_v62 = vsel %vm401_vm1, %v468_v48, %v470_v58  ;;  %v474_v63 = vsel %vm401_vm1, %v472_v59, %v473_v60 }
  0x40   : > { %524 = vrot.lane.b32.xlu2 %v456_v6, %s3487_s10  ;;  %v650_v6 = vrot.slane %v3718_v56, 2 }
  0x42   : > { %v651_v13 = vsel %vm578_vm2, %v649_v5, %v650_v6 }
  0x46   : > { %526 = vrot.lane.b32.xlu1 %v459_v8, %s3487_s10  ;;  %701 = vrot.lane.b32.xlu0 %v633_v10, %s3488_s11  ;;  %v652_v8 = vrot.slane %v332_v52, 2  ;;  %v475_v10 = vrot.slane %v332_v52, 1  ;;  %v3168_v52 = vld [vmem:[%s5367_s1 + $0x10] sm:$0xff] }
  0x47   : > { %3367 = vmatpush.msra.mxu2 %v3168_v52  ;;  %939 = vmatpush.msra.mxu0 %v3168_v52 }
  0x48   : > { %703 = vrot.lane.b32.xlu2 %v636_v21, %s3488_s11  ;;  %v653_v14 = vsel %vm578_vm2, %v650_v6, %v652_v8  ;;  %v476_v16 = vsel %vm401_vm1, %v473_v60, %v475_v10  ;;  %v226_v21 = vld [vmem:[%s3580_s9 + $0x18] sm:$0xff]  ;;  %v229_v8 = vld [vmem:[%s3580_s9 + $0x30] sm:$0xff] }
  0x49   : > { %v293_v30 = vrot.slane %v226_v21, 6  ;;  %v230_v10 = vld [vmem:[%s3580_s9 + $0x38] sm:$0xff] }
  0x4b   : > { %v3760_v34 = vsel %vm288_vm0, %v292_v29, %v293_v30  ;;  %v410_v61 = vrot.slane %v293_v30, 1 }
  0x4c   : > { %v408_v45 = vrot.slane %v3760_v34, 1  ;;  %v585_v47 = vrot.slane %v3760_v34, 2 }
  0x4e   : > { %705 = vrot.lane.b32.xlu1 %v638_v22, %s3488_s11  ;;  %528 = vrot.lane.b32.xlu0 %v461_v23, %s3487_s10  ;;  %v402_v22 = vrot.slane %v3745_v18, 1  ;;  %v579_v23 = vrot.slane %v3745_v18, 2  ;;  %v411_v4 = vsel %vm401_vm1, %v408_v45, %v410_v61  ;;  %v232_v61 = vld [vmem:[%s3580_s9 + $0x48] sm:$0xff] }
  0x50   : > { %530 = vrot.lane.b32.xlu2 %v464_v35, %s3487_s10  ;;  %v404_v31 = vsel %vm401_vm1, %v402_v22, %v403_v27  ;;  %v581_v32 = vsel %vm578_vm2, %v579_v23, %v580_v26  ;;  %v3763_v35 = vsel %vm288_vm0, 0.0, %v292_v29  ;;  %v298_v22 = vrot.slane %v229_v8, 6 }
  0x51   : > { %v407_v44 = vrot.slane %v3763_v35, 1  ;;  %v584_v46 = vrot.slane %v3763_v35, 2  ;;  %v299_v23 = vrot.slane %v230_v10, 6  ;;  %v3816_v27 = vrot.slane %v236_v12, 6 }
  0x53   : > { %v586_v58 = vsel %vm578_vm2, %v584_v46, %v585_v47 }
  0x56   : > { %532 = vrot.lane.b32.xlu1 %v466_v38, %s3487_s10  ;;  %707 = vrot.lane.b32.xlu0 %v641_v39, %s3488_s11  ;;  %v227_v38 = vld [vmem:[%s3580_s9 + $0x20] sm:$0xff]  ;;  %v228_v39 = vld [vmem:[%s3580_s9 + $0x28] sm:$0xff] }
  0x57   : > { %v295_v48 = vrot.slane %v227_v38, 6  ;;  %v296_v49 = vrot.slane %v228_v39, 6 }
  0x58   : > { %709 = vrot.lane.b32.xlu2 %v643_v53, %s3488_s11  ;;  %v583_v53 = vsel %vm578_vm2, %v580_v26, %v582_v42  ;;  %v307_v26 = vrot.slane %v235_v11, 6  ;;  %v302_v11 = vrot.slane %v232_v61, 6 }
  0x59   : > { %v3790_v59 = vsel %vm288_vm0, %v295_v48, %v296_v49  ;;  %v3793_v60 = vsel %vm288_vm0, 0.0, %v295_v48  ;;  %v592_v21 = vrot.slane %v296_v49, 2 }
  0x5a   : > { %v413_v3 = vrot.slane %v3790_v59, 1  ;;  %v590_v20 = vrot.slane %v3790_v59, 2  ;;  %v3832_v38 = vsel %vm288_vm0, 0.0, %v307_v26 }
  0x5b   : > { %v432_v46 = vrot.slane %v3832_v38, 1 }
  0x5e   : > { %711 = vrot.lane.b32.xlu1 %v646_v54, %s3488_s11  ;;  %534 = vrot.lane.b32.xlu0 %v469_v55, %s3487_s10  ;;  %v3231_v54 = vld [vmem:[%s5367_s1 + $0x28] sm:$0xf]  ;;  %v409_v55 = vsel %vm401_vm1, %v407_v44, %v408_v45 }
  0x5f   : > { %3232 = vmatpush.msk.msrb.mxu2 %vm920_vm3, %v3231_v54 }
  0x60   : > { %536 = vrot.lane.b32.xlu2 %v471_v62, %s3487_s10 }
  0x66   : > { %538 = vrot.lane.b32.xlu1 %v474_v63, %s3487_s10  ;;  %713 = vrot.lane.b32.xlu0 %v648_v2, %s3488_s11  ;;  %v587_v63 = vrot.slane %v293_v30, 2  ;;  %v412_v2 = vrot.slane %v3793_v60, 1  ;;  %v593_v30 = vsel %vm578_vm2, %v590_v20, %v592_v21 }
  0x68   : > { %715 = vrot.lane.b32.xlu2 %v651_v13, %s3488_s11  ;;  %v588_v5 = vsel %vm578_vm2, %v585_v47, %v587_v63  ;;  %v414_v6 = vsel %vm401_vm1, %v412_v2, %v413_v3  ;;  %v589_v13 = vrot.slane %v3793_v60, 2  ;;  %v609_v2 = vrot.slane %v3832_v38, 2 }
  0x6a   : > { %v591_v28 = vsel %vm578_vm2, %v589_v13, %v590_v20 }
  0x6e   : > { %717 = vrot.lane.b32.xlu1 %v653_v14, %s3488_s11  ;;  %540 = vrot.lane.b32.xlu0 %v476_v16, %s3487_s10  ;;  %v415_v16 = vrot.slane %v296_v49, 1 }
  0x70   : > { %482 = vrot.lane.b32.xlu2 %v404_v31, %s3487_s10  ;;  %v416_v29 = vsel %vm401_vm1, %v413_v3, %v415_v16  ;;  %v3822_v31 = vsel %vm288_vm0, %v298_v22, %v299_v23 }
  0x71   : > { %v418_v42 = vrot.slane %v3822_v31, 1  ;;  %v595_v45 = vrot.slane %v3822_v31, 2 }
  0x76   : > { %659 = vrot.lane.b32.xlu0 %v581_v32, %s3488_s11  ;;  %484 = vrot.lane.b32.xlu1 %v406_v33, %s3487_s10  ;;  %v3825_v32 = vsel %vm288_vm0, 0.0, %v298_v22  ;;  %v3829_v33 = vsel %vm288_vm0, %v307_v26, %v3816_v27  ;;  %v435_v22 = vrot.slane %v3816_v27, 1 }
  0x77   : > { %v417_v39 = vrot.slane %v3825_v32, 1  ;;  %v594_v44 = vrot.slane %v3825_v32, 2  ;;  %v433_v47 = vrot.slane %v3829_v33, 1  ;;  %v610_v3 = vrot.slane %v3829_v33, 2 }
  0x78   : > { %661 = vrot.lane.b32.xlu2 %v583_v53, %s3488_s11 }
  0x79   : > { %v419_v52 = vsel %vm401_vm1, %v417_v39, %v418_v42  ;;  %v596_v53 = vsel %vm578_vm2, %v594_v44, %v595_v45  ;;  %v434_v54 = vsel %vm401_vm1, %v432_v46, %v433_v47  ;;  %v611_v16 = vsel %vm578_vm2, %v609_v2, %v610_v3 }
  0x7a   : > { %v3798_v62 = vpop.permute.xlu2 %514 }
  0x7e   : > { %486 = vrot.lane.b32.xlu0 %v409_v55, %s3487_s10  ;;  %663 = vrot.lane.b32.xlu1 %v586_v58, %s3488_s11  ;;  %v420_v55 = vrot.slane %v299_v23, 1  ;;  %v231_v58 = vld [vmem:[%s3580_s9 + $0x40] sm:$0xff] }
  0x7f   : > { %v301_v10 = vrot.slane %v231_v58, 6 }
  0x80   : > { %488 = vrot.lane.b32.xlu2 %v411_v4, %s3487_s10  ;;  %v597_v4 = vrot.slane %v299_v23, 2  ;;  %v421_v13 = vsel %vm401_vm1, %v418_v42, %v420_v55 }
  0x81   : > { %v3872_v21 = vsel %vm288_vm0, 0.0, %v301_v10 }
  0x82   : > { %v3813_v14 = vpop.permute.xlu2 %691  ;;  %v598_v20 = vsel %vm578_vm2, %v595_v45, %v597_v4 }
  0x86   : > { %665 = vrot.lane.b32.xlu0 %v588_v5, %s3488_s11  ;;  %490 = vrot.lane.b32.xlu1 %v414_v6, %s3487_s10 }
  0x88   : > { %667 = vrot.lane.b32.xlu2 %v591_v28, %s3488_s11  ;;  %v612_v28 = vrot.slane %v3816_v27, 2  ;;  %v233_v27 = vld [vmem:[%s3580_s9 + $0x50] sm:$0xff] }
  0x89   : > { %v304_v61 = vrot.slane %v233_v27, 6  ;;  %v821_v27 = vld [vmem:[%s5367_s1] sm:$0xff] }
  0x8a   : > { %v3839_v43 = vpop.permute.xlu2 %518  ;;  %v613_v45 = vsel %vm578_vm2, %v610_v3, %v612_v28  ;;  %v822_v28 = vld [vmem:[%s5367_s1 + $0x8] sm:$0xf] }
  0x8b   : > { %3201 = vmatpush.msk.msra.mxu1 %vm920_vm3, %v822_v28  ;;  %3368 = vmatpush.msk.msra.mxu3 %vm920_vm3, %v822_v28  ;;  %vm2943_vm3 = vcmask 1047559  }
  0x8d   : > { %1055 = vmatpush.msra.mxu1 %v821_v27  ;;  %3369 = vmatpush.msra.mxu3 %v821_v27 }
  0x8e   : > { %492 = vrot.lane.b32.xlu0 %v416_v29, %s3487_s10  ;;  %669 = vrot.lane.b32.xlu1 %v593_v30, %s3488_s11  ;;  %v422_v29 = vrot.slane %v3872_v21, 1 }
  0x90   : > { %v513_v48 = vpop.permute.xlu1 %512  ;;  %v511_v49 = vpop.permute.xlu0 %510  ;;  %494 = vrot.lane.b32.xlu2 %v419_v52, %s3487_s10  ;;  %v425_v52 = vrot.slane %v302_v11, 1 }
  0x91   : > { %v770_v5 = vsel %vm755_vm4, %v3590_v9, %v511_v49  ;;  %v3869_v9 = vsel %vm288_vm0, %v301_v10, %v302_v11  ;;  %v771_v23 = vsel %vm755_vm4, %v3587_v7, %v513_v48  ;;  %v436_v7 = vsel %vm401_vm1, %v433_v47, %v435_v22  ;;  %v234_v48 = vld [vmem:[%s3580_s9 + $0x58] sm:$0xff] }
  0x92   : > { %v3853_v63 = vpop.permute.xlu2 %697  ;;  %v423_v30 = vrot.slane %v3869_v9, 1  ;;  %v772_v49 = vsel %vm755_vm4, %v3604_v19, %v3798_v62  ;;  %v305_v2 = vrot.slane %v234_v48, 6  ;;  %v599_v19 = vrot.slane %v3872_v21, 2 }
  0x93   : > { %v3905_v3 = vsel %vm788_vm5, %v772_v49, %v3813_v14  ;;  %v3489_v48 = vmov 0.0  }
  0x94   : > { %v424_v46 = vsel %vm401_vm1, %v422_v29, %v423_v30  ;;  %v426_v4 = vsel %vm401_vm1, %v423_v30, %v425_v52  ;;  %940 = vmatmul.f32.vlgmr.msra.gmra.mxu0 %v3489_v48  ;;  %1056 = vmatmul.f32.vlgmr.msra.gmra.mxu1 %v3489_v48 }
  0x96   : > { %671 = vrot.lane.b32.xlu0 %v596_v53, %s3488_s11  ;;  %506 = vrot.lane.b32.xlu1 %v434_v54, %s3487_s10  ;;  %v600_v53 = vrot.slane %v3869_v9, 2  ;;  %v602_v54 = vrot.slane %v302_v11, 2 }
  0x98   : > { %v690_v6 = vpop.permute.xlu1 %689  ;;  %v688_v8 = vpop.permute.xlu0 %687  ;;  %496 = vrot.lane.b32.xlu2 %v421_v13, %s3487_s10  ;;  %v601_v14 = vsel %vm578_vm2, %v599_v19, %v600_v53 }
  0x99   : > { %v3860_v12 = vsel %vm788_vm5, %v770_v5, %v688_v8  ;;  %v3885_v44 = vsel %vm788_vm5, %v771_v23, %v690_v6  ;;  %v603_v5 = vsel %vm578_vm2, %v600_v53, %v602_v54  ;;  %v3915_v6 = vsel %vm288_vm0, %v304_v61, %v305_v2 }
  0x9a   : > { %3185 = vmatmul.msk.f32.vlgmr.msra.gmra.mxu2 %vm826_vm6, %v3860_v12  ;;  %v3879_v26 = vpop.permute.xlu2 %524  ;;  %v3918_v8 = vsel %vm288_vm0, 0.0, %v304_v61  ;;  %v605_v13 = vrot.slane %v3915_v6, 2  ;;  %v607_v61 = vrot.slane %v305_v2, 2 }
  0x9b   : > { %v604_v11 = vrot.slane %v3918_v8, 2 }
  0x9c   : > { %943 = vmatmul.f32.gmra.mxu0 %v3489_v48  ;;  %1059 = vmatmul.f32.gmra.mxu1 %v3489_v48 }
  0x9d   : > { %v606_v29 = vsel %vm578_vm2, %v604_v11, %v605_v13 }
  0x9e   : > { %683 = vrot.lane.b32.xlu0 %v611_v16, %s3488_s11  ;;  %673 = vrot.lane.b32.xlu1 %v598_v20, %s3488_s11  ;;  %v428_v16 = vrot.slane %v3915_v6, 1  ;;  %v430_v20 = vrot.slane %v305_v2, 1  ;;  %v777_v2 = vsel %vm755_vm4, %v3640_v50, %v3879_v26 }
  0xa0   : > { %v694_v39 = vpop.permute.xlu1 %693  ;;  %v517_v42 = vpop.permute.xlu0 %516  ;;  %508 = vrot.lane.b32.xlu2 %v436_v7, %s3487_s10  ;;  %v431_v30 = vsel %vm401_vm1, %v428_v16, %v430_v20 }
  0xa1   : > { %v773_v62 = vsel %vm755_vm4, %v3599_v15, %v517_v42 }
  0xa2   : > { %3186 = vmatmul.msk.f32.gmra.mxu2 %vm826_vm6, %v3885_v44  ;;  %v3900_v47 = vpop.permute.xlu2 %703  ;;  %v3923_v10 = vsel %vm788_vm5, %v773_v62, %v694_v39  ;;  %v774_v39 = vsel %vm755_vm4, %v3625_v37, %v3839_v43  ;;  %v3230_v37 = vld [vmem:[%s5367_s1 + $0x20] sm:$0xff]  ;;  %v427_v43 = vrot.slane %v3918_v8, 1 }
  0xa3   : > { %1180 = vmatpush.msrb.mxu2 %v3230_v37 }
  0xa4   : > { %v429_v52 = vsel %vm401_vm1, %v427_v43, %v428_v16  ;;  %1062 = vmatmul.f32.gmra.mxu1 %v3489_v48 }
  0xa6   : > { %685 = vrot.lane.b32.xlu1 %v613_v45, %s3488_s11  ;;  %498 = vrot.lane.b32.xlu0 %v424_v46, %s3487_s10 }
  0xa8   : > { %v521_v55 = vpop.permute.xlu1 %520  ;;  %v696_v58 = vpop.permute.xlu0 %695  ;;  %675 = vrot.lane.b32.xlu2 %v601_v14, %s3488_s11 }
  0xa9   : > { %v3947_v42 = vsel %vm788_vm5, %v774_v39, %v696_v58  ;;  %v775_v49 = vsel %vm755_vm4, %v3622_v36, %v521_v55  ;;  %v608_v55 = vsel %vm578_vm2, %v605_v13, %v607_v61 }
  0xaa   : > { %3187 = vmatmul.msk.f32.gmra.mxu2 %vm826_vm6, %v3905_v3  ;;  %v3927_v15 = vpop.permute.xlu2 %530  ;;  %v3966_v53 = vsel %vm788_vm5, %v775_v49, %v3853_v63 }
  0xac   : > { %1065 = vmatmul.f32.gmra.mxu1 %v3489_v48 }
  0xae   : > { %500 = vrot.lane.b32.xlu0 %v426_v4, %s3487_s10  ;;  %677 = vrot.lane.b32.xlu1 %v603_v5, %s3488_s11 }
  0xb0   : > { %v700_v22 = vpop.permute.xlu1 %699  ;;  %v523_v23 = vpop.permute.xlu0 %522  ;;  %502 = vrot.lane.b32.xlu2 %v429_v52, %s3487_s10 }
  0xb1   : > { %v776_v36 = vsel %vm755_vm4, %v3643_v51, %v523_v23 }
  0xb2   : > { %3188 = vmatmul.msk.f32.gmra.mxu2 %vm826_vm6, %v3923_v10  ;;  %v710_v46 = vpop.permute.xlu2 %709  ;;  %v3977_v63 = vsel %vm788_vm5, %v776_v36, %v700_v22 }
  0xb6   : > { %679 = vrot.lane.b32.xlu0 %v606_v29, %s3488_s11  ;;  %504 = vrot.lane.b32.xlu1 %v431_v30, %s3487_s10 }
  0xb8   : > { %v527_v7 = vpop.permute.xlu1 %526  ;;  %v702_v45 = vpop.permute.xlu0 %701  ;;  %681 = vrot.lane.b32.xlu2 %v608_v55, %s3488_s11 }
  0xb9   : > { %v3986_v5 = vsel %vm788_vm5, %v777_v2, %v702_v45  ;;  %v778_v13 = vsel %vm755_vm4, %v3661_v1, %v527_v7 }
  0xba   : > { %3189 = vmatmul.msk.f32.gmra.mxu2 %vm826_vm6, %v3947_v42  ;;  %v537_v19 = vpop.permute.xlu2 %536  ;;  %v3995_v16 = vsel %vm788_vm5, %v778_v13, %v3900_v47  ;;  %v780_v47 = vsel %vm755_vm4, %v3685_v25, %v3927_v15 }
  0xc0   : > { %v706_v54 = vpop.permute.xlu1 %705  ;;  %v529_v58 = vpop.permute.xlu0 %528 }
  0xc1   : > { %v779_v22 = vsel %vm755_vm4, %v3658_v0, %v529_v58 }
  0xc2   : > { %3190 = vmatmul.msk.f32.gmra.mxu2 %vm826_vm6, %v3966_v53  ;;  %v716_v51 = vpop.permute.xlu2 %715  ;;  %v4002_v23 = vsel %vm788_vm5, %v779_v22, %v706_v54 }
  0xc8   : > { %v533_v62 = vpop.permute.xlu1 %532  ;;  %v708_v4 = vpop.permute.xlu0 %707 }
  0xc9   : > { %v4012_v39 = vsel %vm788_vm5, %v780_v47, %v708_v4  ;;  %v781_v25 = vsel %vm755_vm4, %v3682_v24, %v533_v62 }
  0xca   : > { %3191 = vmatmul.msk.f32.gmra.mxu2 %vm826_vm6, %v3977_v63  ;;  %v483_v50 = vpop.permute.xlu2 %482  ;;  %v4028_v15 = vsel %vm788_vm5, %v781_v25, %v710_v46 }
  0xcb   : > { %v756_v30 = vsel %vm755_vm4, %v3745_v18, %v483_v50 }
  0xd0   : > { %v712_v14 = vpop.permute.xlu1 %711  ;;  %v535_v11 = vpop.permute.xlu0 %534 }
  0xd1   : > { %v782_v24 = vsel %vm755_vm4, %v3703_v41, %v535_v11  ;;  %v783_v41 = vsel %vm755_vm4, %v3700_v40, %v537_v19 }
  0xd2   : > { %3192 = vmatmul.msk.f32.gmra.mxu2 %vm826_vm6, %v3986_v5  ;;  %v662_v29 = vpop.permute.xlu2 %661  ;;  %v4044_v52 = vsel %vm788_vm5, %v782_v24, %v712_v14 }
  0xd8   : > { %v539_v26 = vpop.permute.xlu1 %538  ;;  %v714_v20 = vpop.permute.xlu0 %713 }
  0xd9   : > { %v4056_v36 = vsel %vm788_vm5, %v783_v41, %v714_v20  ;;  %v784_v40 = vsel %vm755_vm4, %v3721_v57, %v539_v26 }
  0xda   : > { %3193 = vmatmul.msk.f32.gmra.mxu2 %vm826_vm6, %v3995_v16  ;;  %v489_v27 = vpop.permute.xlu2 %488  ;;  %v4068_v19 = vsel %vm788_vm5, %v784_v40, %v716_v51 }
  0xe0   : > { %v718_v28 = vpop.permute.xlu1 %717  ;;  %v541_v1 = vpop.permute.xlu0 %540 }
  0xe1   : > { %v785_v57 = vsel %vm755_vm4, %v3718_v56, %v541_v1 }
  0xe2   : > { %3194 = vmatmul.msk.f32.gmra.mxu2 %vm826_vm6, %v4002_v23  ;;  %v668_v46 = vpop.permute.xlu2 %667  ;;  %v4082_v26 = vsel %vm788_vm5, %v785_v57, %v718_v28 }
  0xe8   : > { %v660_v0 = vpop.permute.xlu0 %659  ;;  %v485_v7 = vpop.permute.xlu1 %484 }
  0xe9   : > { %v4015_v45 = vsel %vm788_vm5, %v756_v30, %v660_v0  ;;  %v757_v18 = vsel %vm755_vm4, %v3742_v17, %v485_v7 }
  0xea   : > { %3195 = vmatmul.msk.f32.gmra.mxu2 %vm826_vm6, %v4012_v39  ;;  %3171 = vmatmul.msk.f32.gmra.mxu0 %vm826_vm6, %v4015_v45  ;;  %v4031_v37 = vsel %vm788_vm5, %v757_v18, %v662_v29  ;;  %v495_v62 = vpop.permute.xlu2 %494 }
  0xeb   : > { %3202 = vmatmul.msk.f32.gmra.mxu1 %vm826_vm6, %v4015_v45 }
  0xf0   : > { %v487_v43 = vpop.permute.xlu0 %486  ;;  %v664_v49 = vpop.permute.xlu1 %663 }
  0xf1   : > { %v758_v17 = vsel %vm755_vm4, %v3763_v35, %v487_v43  ;;  %v759_v35 = vsel %vm755_vm4, %v3760_v34, %v489_v27 }
  0xf2   : > { %3196 = vmatmul.msk.f32.gmra.mxu2 %vm826_vm6, %v4028_v15  ;;  %3172 = vmatmul.msk.f32.gmra.mxu0 %vm826_vm6, %v4031_v37  ;;  %v791_v54 = vsel %vm788_vm5, %v758_v17, %v664_v49  ;;  %v497_v50 = vpop.permute.xlu2 %496 }
  0xf3   : > { %3203 = vmatmul.msk.f32.gmra.mxu1 %vm826_vm6, %v4031_v37 }
  0xf8   : > { %v666_v58 = vpop.permute.xlu0 %665  ;;  %v491_v61 = vpop.permute.xlu1 %490 }
  0xf9   : > { %v792_v55 = vsel %vm788_vm5, %v759_v35, %v666_v58  ;;  %v760_v34 = vsel %vm755_vm4, %v3793_v60, %v491_v61 }
  0xfa   : > { %3197 = vmatmul.msk.f32.gmra.mxu2 %vm826_vm6, %v4044_v52  ;;  %3173 = vmatmul.msk.f32.gmra.mxu0 %vm826_vm6, %v791_v54  ;;  %v793_v14 = vsel %vm788_vm5, %v760_v34, %v668_v46  ;;  %v509_v56 = vpop.permute.xlu2 %508 }
  0xfb   : > { %3204 = vmatmul.msk.f32.gmra.mxu1 %vm826_vm6, %v791_v54 }
 0x100   : > { %v493_v4 = vpop.permute.xlu0 %492  ;;  %v670_v2 = vpop.permute.xlu1 %669 }
 0x101   : > { %v761_v60 = vsel %vm755_vm4, %v3790_v59, %v493_v4  ;;  %v762_v59 = vsel %vm755_vm4, %v3825_v32, %v495_v62  ;;  %v763_v32 = vsel %vm755_vm4, %v3822_v31, %v497_v50 }
 0x102   : > { %3198 = vmatmul.msk.f32.gmra.mxu2 %vm826_vm6, %v4056_v36  ;;  %3174 = vmatmul.msk.f32.gmra.mxu0 %vm826_vm6, %v792_v55  ;;  %v794_v29 = vsel %vm788_vm5, %v761_v60, %v670_v2  ;;  %v676_v27 = vpop.permute.xlu2 %675 }
 0x103   : > { %3205 = vmatmul.msk.f32.gmra.mxu1 %vm826_vm6, %v792_v55 }
 0x108   : > { %v672_v11 = vpop.permute.xlu0 %671  ;;  %v507_v13 = vpop.permute.xlu1 %506 }
 0x109   : > { %v768_v51 = vsel %vm755_vm4, %v3832_v38, %v507_v13  ;;  %v769_v38 = vsel %vm755_vm4, %v3829_v33, %v509_v56  ;;  %v795_v1 = vsel %vm788_vm5, %v762_v59, %v672_v11 }
 0x10a   : > { %3199 = vmatmul.msk.f32.gmra.mxu2 %vm826_vm6, %v4068_v19  ;;  %3175 = vmatmul.msk.f32.gmra.mxu0 %vm826_vm6, %v793_v14  ;;  %v503_v24 = vpop.permute.xlu2 %502 }
 0x10b   : > { %3206 = vmatmul.msk.f32.gmra.mxu1 %vm826_vm6, %v793_v14  ;;  %v766_v46 = vsel %vm755_vm4, %v3918_v8, %v503_v24 }
 0x110   : > { %v684_v20 = vpop.permute.xlu0 %683  ;;  %v674_v22 = vpop.permute.xlu1 %673 }
 0x111   : > { %v4086_v47 = vsel %vm788_vm5, %v768_v51, %v684_v20  ;;  %v796_v0 = vsel %vm788_vm5, %v763_v32, %v674_v22  ;;  %v941_v11 = vpop.f32.mrf.mxu0 }
 0x112   : > { %3200 = vmatmul.msk.f32.gmra.mxu2 %vm826_vm6, %v4082_v26  ;;  %3214 = vmatmul.msk.f32.vlgmr.msra.gmra.mxu3 %vm826_vm6, %v4086_v47  ;;  %v682_v35 = vpop.permute.xlu2 %681 }
 0x113   : > { %3176 = vmatmul.msk.f32.gmra.mxu0 %vm826_vm6, %v794_v29  ;;  %3207 = vmatmul.msk.f32.gmra.mxu1 %vm826_vm6, %v794_v29 }
 0x118   : > { %v686_v28 = vpop.permute.xlu1 %685  ;;  %v499_v7 = vpop.permute.xlu0 %498 }
 0x119   : > { %v4100_v30 = vsel %vm788_vm5, %v769_v38, %v686_v28  ;;  %v764_v31 = vsel %vm755_vm4, %v3872_v21, %v499_v7  ;;  %v944_v57 = vpop.f32.mrf.mxu0 }
 0x11a   : > { %3215 = vmatmul.msk.f32.gmra.mxu3 %vm826_vm6, %v4100_v30  ;;  %3233 = vmatmul.msk.f32.vlgmr.msrb.gmra.mxu2 %vm826_vm6, %v4015_v45  ;;  %v797_v25 = vsel %vm788_vm5, %v764_v31, %v676_v27 }
 0x11b   : > { %3177 = vmatmul.msk.f32.gmra.mxu0 %vm826_vm6, %v795_v1  ;;  %3208 = vmatmul.msk.f32.gmra.mxu1 %vm826_vm6, %v795_v1 }
 0x11d   : > { %v4110_v33 = vpop.f32.mrf.mxu2 }
 0x120   : > { %v501_v18 = vpop.permute.xlu0 %500  ;;  %v678_v49 = vpop.permute.xlu1 %677 }
 0x121   : > { %v765_v43 = vsel %vm755_vm4, %v3869_v9, %v501_v18 }
 0x122   : > { %3216 = vmatmul.msk.f32.gmra.mxu3 %vm826_vm6, %v3860_v12  ;;  %3234 = vmatmul.msk.f32.gmra.mxu2 %vm826_vm6, %v4031_v37  ;;  %v798_v21 = vsel %vm788_vm5, %v765_v43, %v678_v49 }
 0x123   : > { %3178 = vmatmul.msk.f32.gmra.mxu0 %vm826_vm6, %v796_v0  ;;  %3209 = vmatmul.msk.f32.gmra.mxu1 %vm826_vm6, %v796_v0 }
 0x125   : > { %v4119_v45 = vpop.f32.mrf.mxu2 }
 0x128   : > { %v505_v58 = vpop.permute.xlu1 %504 }
 0x129   : > { %v767_v41 = vsel %vm755_vm4, %v3915_v6, %v505_v58 }
 0x12a   : > { %3217 = vmatmul.msk.f32.gmra.mxu3 %vm826_vm6, %v3885_v44  ;;  %3235 = vmatmul.msk.f32.gmra.mxu2 %vm826_vm6, %v791_v54  ;;  %v680_v54 = vpop.permute.xlu0 %679  ;;  %v800_v8 = vsel %vm788_vm5, %v767_v41, %v682_v35 }
 0x12b   : > { %3179 = vmatmul.msk.f32.gmra.mxu0 %vm826_vm6, %v797_v25  ;;  %3210 = vmatmul.msk.f32.gmra.mxu1 %vm826_vm6, %v797_v25  ;;  %v799_v9 = vsel %vm788_vm5, %v766_v46, %v680_v54 }
 0x12d   : > { %v4129_v37 = vpop.f32.mrf.mxu2 }
 0x132   : > { %3218 = vmatmul.msk.f32.gmra.mxu3 %vm826_vm6, %v3905_v3  ;;  %3236 = vmatmul.msk.f32.gmra.mxu2 %vm826_vm6, %v792_v55 }
 0x133   : > { %3180 = vmatmul.msk.f32.gmra.mxu0 %vm826_vm6, %v798_v21  ;;  %3211 = vmatmul.msk.f32.gmra.mxu1 %vm826_vm6, %v798_v21 }
 0x135   : > { %v4139_v17 = vpop.f32.mrf.mxu2 }
 0x13a   : > { %3219 = vmatmul.msk.f32.gmra.mxu3 %vm826_vm6, %v3923_v10  ;;  %3237 = vmatmul.msk.f32.gmra.mxu2 %vm826_vm6, %v793_v14  ;;  %v1057_v14 = vpop.f32.mrf.mxu1 }
 0x13b   : > { %3181 = vmatmul.msk.f32.gmra.mxu0 %vm826_vm6, %v799_v9  ;;  %3212 = vmatmul.msk.f32.gmra.mxu1 %vm826_vm6, %v799_v9  ;;  %v1058_v59 = vadd.f32 %v1057_v14, %v941_v11 }
 0x13d   : > { %v4149_v61 = vpop.f32.mrf.mxu2 }
 0x142   : > { %3220 = vmatmul.msk.f32.gmra.mxu3 %vm826_vm6, %v3947_v42  ;;  %3238 = vmatmul.msk.f32.gmra.mxu2 %vm826_vm6, %v794_v29  ;;  %v1060_v50 = vpop.f32.mrf.mxu1 }
 0x143   : > { %3182 = vmatmul.msk.f32.gmra.mxu0 %vm826_vm6, %v800_v8  ;;  %3213 = vmatmul.msk.f32.gmra.mxu1 %vm826_vm6, %v800_v8 }
 0x145   : > { %v4159_v55 = vpop.f32.mrf.mxu2 }
 0x14a   : > { %3221 = vmatmul.msk.f32.gmra.mxu3 %vm826_vm6, %v3966_v53  ;;  %3239 = vmatmul.msk.f32.gmra.mxu2 %vm826_vm6, %v795_v1  ;;  %v1063_v20 = vpop.f32.mrf.mxu1  ;;  %v1061_v1 = vadd.f32 %v1060_v50, %v944_v57 }
 0x14b   : > { %3183 = vmatmul.msk.f32.gmra.mxu0 %vm826_vm6, %v4086_v47 }
 0x14d   : > { %v4166_v6 = vpop.f32.mrf.mxu2 }
 0x152   : > { %3222 = vmatmul.msk.f32.gmra.mxu3 %vm826_vm6, %v3977_v63  ;;  %3240 = vmatmul.msk.f32.gmra.mxu2 %vm826_vm6, %v796_v0 }
 0x153   : > { %3184 = vmatmul.msk.f32.gmra.mxu0 %vm826_vm6, %v4100_v30 }
 0x155   : > { %v4173_v62 = vpop.f32.mrf.mxu2 }
 0x15a   : > { %3223 = vmatmul.msk.f32.gmra.mxu3 %vm826_vm6, %v3986_v5  ;;  %3241 = vmatmul.msk.f32.gmra.mxu2 %vm826_vm6, %v797_v25 }
 0x15d   : > { %v4178_v4 = vpop.f32.mrf.mxu2 }
 0x162   : > { %3224 = vmatmul.msk.f32.gmra.mxu3 %vm826_vm6, %v3995_v16  ;;  %3242 = vmatmul.msk.f32.gmra.mxu2 %vm826_vm6, %v798_v21 }
 0x165   : > { %v4183_v2 = vpop.f32.mrf.mxu2 }
 0x167   : > { %v947_v22 = vpop.f32.mrf.mxu0 }
 0x168   : > { %v1064_v18 = vadd.f32 %v1063_v20, %v947_v22 }
 0x16a   : > { %3225 = vmatmul.msk.f32.gmra.mxu3 %vm826_vm6, %v4002_v23  ;;  %3243 = vmatmul.msk.f32.gmra.mxu2 %vm826_vm6, %v799_v9 }
 0x16d   : > { %v4188_v40 = vpop.f32.mrf.mxu2 }
 0x16f   : > { %v950_v56 = vpop.f32.mrf.mxu0 }
 0x172   : > { %3226 = vmatmul.msk.f32.gmra.mxu3 %vm826_vm6, %v4012_v39  ;;  %3244 = vmatmul.msk.f32.gmra.mxu2 %vm826_vm6, %v800_v8 }
 0x175   : > { %v4193_v34 = vpop.f32.mrf.mxu2 }
 0x17a   : > { %3227 = vmatmul.msk.f32.gmra.mxu3 %vm826_vm6, %v4028_v15  ;;  %3245 = vmatmul.msk.f32.gmra.mxu2 %vm826_vm6, %v4086_v47  ;;  %v1066_v47 = vpop.f32.mrf.mxu1 }
 0x17b   : > { %v1067_v11 = vadd.f32 %v1066_v47, %v950_v56 }
 0x17d   : > { %v4199_v13 = vpop.f32.mrf.mxu2 }
 0x182   : > { %3228 = vmatmul.msk.f32.gmra.mxu3 %vm826_vm6, %v4044_v52  ;;  %3246 = vmatmul.msk.f32.gmra.mxu2 %vm826_vm6, %v4100_v30  ;;  %v1069_v30 = vpop.f32.mrf.mxu1 }
 0x185   : > { %v4205_v60 = vpop.f32.mrf.mxu2 }
 0x18a   : > { %3229 = vmatmul.msk.f32.gmra.mxu3 %vm826_vm6, %v4056_v36  ;;  %3247 = vmatmul.msk.f32.gmra.mxu2 %vm826_vm6, %v3860_v12  ;;  %v4222_v12 = vld [vmem:[%s5368_s2] ss:$0 sm:$0xff]  ;;  %v1072_v43 = vpop.f32.mrf.mxu1 }
 0x18d   : > { %v4211_v51 = vpop.f32.mrf.mxu2 }
 0x192   : > { %3248 = vmatmul.msk.f32.gmra.mxu2 %vm826_vm6, %v3885_v44  ;;  %v953_v44 = vpop.f32.mrf.mxu0  ;;  %v1075_v20 = vpop.f32.mrf.mxu1 }
 0x195   : > { %v4215_v29 = vpop.f32.mrf.mxu2 }
 0x19a   : > { %3249 = vmatmul.msk.f32.gmra.mxu2 %vm826_vm6, %v3905_v3 }
 0x19d   : > { %v1182_v38 = vpop.f32.mrf.mxu2 }
 0x19e   : > { %v1278_v28 = vadd.f32 %v1182_v38, %v1058_v59 }
 0x1a0   : > { %v1313_v32 = vadd.f32 %v4222_v12, %v1278_v28 }
 0x1a2   : > { %3250 = vmatmul.msk.f32.gmra.mxu2 %vm826_vm6, %v3923_v10  ;;  %v1378_v7 = vrot.slane %v1313_v32, 6  ;;  %v956_v10 = vpop.f32.mrf.mxu0 }
 0x1a4   : > { %v4229_v27 = vsel %vm288_vm0, 0.0, %v1378_v7 }
 0x1a5   : > { %v1185_v0 = vpop.f32.mrf.mxu2  ;;  %v1666_v46 = vrot.slane %v4229_v27, 2  ;;  %v1490_v58 = vrot.slane %v4229_v27, 1 }
 0x1a6   : > { %v1279_v31 = vadd.f32 %v1185_v0, %v1061_v1 }
 0x1a8   : > { %v1314_v3 = vadd.f32 %v4222_v12, %v1279_v31 }
 0x1aa   : > { %v1379_v25 = vrot.slane %v1314_v3, 6  ;;  %3251 = vmatmul.msk.f32.gmra.mxu2 %vm826_vm6, %v3947_v42  ;;  %v959_v38 = vpop.f32.mrf.mxu0 }
 0x1ac   : > { %v4234_v49 = vsel %vm288_vm0, %v1378_v7, %v1379_v25  ;;  %v1493_v21 = vrot.slane %v1379_v25, 1  ;;  %v1669_v50 = vrot.slane %v1379_v25, 2 }
 0x1ad   : > { %v1188_v24 = vpop.f32.mrf.mxu2  ;;  %v1667_v54 = vrot.slane %v4234_v49, 2  ;;  %v1491_v9 = vrot.slane %v4234_v49, 1 }
 0x1ae   : > { %v1280_v41 = vadd.f32 %v1188_v24, %v1064_v18 }
 0x1af   : > { %v1668_v35 = vsel %vm578_vm2, %v1666_v46, %v1667_v54  ;;  %v1494_v42 = vsel %vm401_vm1, %v1491_v9, %v1493_v21  ;;  %v1492_v8 = vsel %vm401_vm1, %v1490_v58, %v1491_v9  ;;  %v1670_v1 = vsel %vm578_vm2, %v1667_v54, %v1669_v50 }
 0x1b0   : > { %1746 = vrot.lane.b32.xlu1 %v1668_v35, %s3490_s13  ;;  %1572 = vrot.lane.b32.xlu2 %v1494_v42, %s3488_s11  ;;  %v1315_v14 = vadd.f32 %v4222_v12, %v1280_v41  ;;  %v1073_v58 = vadd.f32 %v1072_v43, %v956_v10 }
 0x1b1   : > { %1570 = vrot.lane.b32.xlu0 %v1492_v8, %s3488_s11 }
 0x1b2   : > { %3252 = vmatmul.msk.f32.gmra.mxu2 %vm826_vm6, %v3966_v53  ;;  %v1381_v22 = vrot.slane %v1315_v14, 6  ;;  %v1070_v53 = vadd.f32 %v1069_v30, %v953_v44  ;;  %v1078_v44 = vpop.f32.mrf.mxu1  ;;  %v962_v46 = vpop.f32.mrf.mxu0  ;;  %v253_v14 = vld [vmem:[%s3580_s9 + $0xf0] sm:$0xff] }
 0x1b4   : > { %v4253_v32 = vsel %vm288_vm0, 0.0, %v1381_v22 }
 0x1b5   : > { %v1191_v57 = vpop.f32.mrf.mxu2  ;;  %v1671_v31 = vrot.slane %v4253_v32, 2  ;;  %v1495_v18 = vrot.slane %v4253_v32, 1 }
 0x1b6   : > { %v1281_v59 = vadd.f32 %v1191_v57, %v1067_v11  ;;  %v254_v11 = vld [vmem:[%s3580_s9 + $0xf8] sm:$0xff]  ;;  %s215_s9 = sand.u32 1, %s3477_s19  }
 0x1b7   : > { %v4283_v43 = vrot.slane %v254_v11, 6  ;;  %s3165_s14 = sshll.u32 %s215_s9, 3  ;;  %s3087_s22 = scalar_lea.sflag [#allocation3], %s215_s9 }
 0x1b8   : > { %v1316_v28 = vadd.f32 %v4222_v12, %v1281_v59  ;;  %s217_s25 = scalar_lea.vmem [#allocation2], %s3165_s14 }
 0x1b9   : > { %1748 = vrot.lane.b32.xlu0 %v1670_v1, %s3490_s13  ;;  %s3099_s26 = sshll.u32 %s217_s25, 4  ;;  %s3100_s26 = int_to_ptr.vmem [resolvable:$true] %s3099_s26 }
 0x1ba   : > { %v1382_v0 = vrot.slane %v1316_v28, 6  ;;  %3253 = vmatmul.msk.f32.gmra.mxu2 %vm826_vm6, %v3977_v63  ;;  %v1081_v57 = vpop.f32.mrf.mxu1  ;;  %v965_v10 = vpop.f32.mrf.mxu0  ;;  %v1076_v28 = vadd.f32 %v1075_v20, %v959_v38 }
 0x1bc   : > { %v4258_v47 = vsel %vm288_vm0, %v1381_v22, %v1382_v0  ;;  %v1498_v56 = vrot.slane %v1382_v0, 1  ;;  %v1674_v9 = vrot.slane %v1382_v0, 2 }
 0x1bd   : > { %v1194_v7 = vpop.f32.mrf.mxu2  ;;  %v1672_v3 = vrot.slane %v4258_v47, 2  ;;  %v1496_v25 = vrot.slane %v4258_v47, 1 }
 0x1be   : > { %v1282_v21 = vadd.f32 %v1194_v7, %v1070_v53 }
 0x1bf   : > { %v1673_v24 = vsel %vm578_vm2, %v1671_v31, %v1672_v3  ;;  %v1499_v63 = vsel %vm401_vm1, %v1496_v25, %v1498_v56  ;;  %v1497_v30 = vsel %vm401_vm1, %v1495_v18, %v1496_v25  ;;  %v1675_v8 = vsel %vm578_vm2, %v1672_v3, %v1674_v9 }
 0x1c0   : > { %1750 = vrot.lane.b32.xlu2 %v1673_v24, %s3490_s13  ;;  %1574 = vrot.lane.b32.xlu1 %v1497_v30, %s3488_s11  ;;  %v1317_v54 = vadd.f32 %v4222_v12, %v1282_v21 }
 0x1c1   : > { %1576 = vrot.lane.b32.xlu0 %v1499_v63, %s3488_s11 }
 0x1c2   : > { %3254 = vmatmul.msk.f32.gmra.mxu2 %vm826_vm6, %v3986_v5  ;;  %v1384_v35 = vrot.slane %v1317_v54, 6  ;;  %v334_v5 = vrot.slane %v253_v14, 6  ;;  %v1079_v54 = vadd.f32 %v1078_v44, %v962_v46  ;;  %v1084_v9 = vpop.f32.mrf.mxu1 }
 0x1c4   : > { %v4279_v22 = vsel %vm288_vm0, 0.0, %v1384_v35  ;;  %v4297_v20 = vsel %vm288_vm0, 0.0, %v334_v5 }
 0x1c5   : > { %v1197_v41 = vpop.f32.mrf.mxu2  ;;  %v1676_v56 = vrot.slane %v4279_v22, 2  ;;  %v1500_v3 = vrot.slane %v4279_v22, 1  ;;  %v477_v24 = vrot.slane %v4297_v20, 1 }
 0x1c6   : > { %v1283_v42 = vadd.f32 %v1197_v41, %v1073_v58  ;;  %v3267_v41 = vld [vmem:[%s5369_s3 + $0x28] sm:$0xff] }
 0x1c7   : > { %2020 = vmatpush.msrb.mxu3 %v3267_v41  ;;  %v480_v41 = vrot.slane %v4283_v43, 1 }
 0x1c8   : > { %v1318_v50 = vadd.f32 %v4222_v12, %v1283_v42  ;;  %1752 = vrot.lane.b32.xlu1 %v1675_v8, %s3490_s13 }
 0x1ca   : > { %v1385_v59 = vrot.slane %v1318_v50, 6  ;;  %3255 = vmatmul.msk.f32.gmra.mxu2 %vm826_vm6, %v3995_v16  ;;  %v4294_v16 = vsel %vm288_vm0, %v334_v5, %v4283_v43 }
 0x1cb   : > { %v478_v63 = vrot.slane %v4294_v16, 1 }
 0x1cc   : > { %v4286_v1 = vsel %vm288_vm0, %v1384_v35, %v1385_v59  ;;  %v1503_v0 = vrot.slane %v1385_v59, 1  ;;  %v1679_v58 = vrot.slane %v1385_v59, 2  ;;  %v968_v35 = vpop.f32.mrf.mxu0  ;;  %v1082_v59 = vadd.f32 %v1081_v57, %v965_v10  ;;  %v1087_v10 = vpop.f32.mrf.mxu1 }
 0x1cd   : > { %v1200_v53 = vpop.f32.mrf.mxu2  ;;  %v1677_v7 = vrot.slane %v4286_v1, 2  ;;  %v1501_v31 = vrot.slane %v4286_v1, 1  ;;  %v479_v8 = vsel %vm401_vm1, %v477_v24, %v478_v63  ;;  %v655_v24 = vrot.slane %v4294_v16, 2 }
 0x1ce   : > { %v1284_v25 = vadd.f32 %v1200_v53, %v1076_v28  ;;  %v3328_v53 = vld [vmem:[%s5369_s3 + $0x40] sm:$0xff] }
 0x1cf   : > { %v1678_v38 = vsel %vm578_vm2, %v1676_v56, %v1677_v7  ;;  %v1504_v18 = vsel %vm401_vm1, %v1501_v31, %v1503_v0  ;;  %v1502_v21 = vsel %vm401_vm1, %v1500_v3, %v1501_v31  ;;  %v1909_v0 = vld [vmem:[%s5369_s3 + $0x10] sm:$0xff]  ;;  %2256 = vmatpush.msrb.mxu1 %v3328_v53 }
 0x1d0   : > { %1754 = vrot.lane.b32.xlu0 %v1678_v38, %s3490_s13  ;;  %1580 = vrot.lane.b32.xlu1 %v1504_v18, %s3488_s11  ;;  %v1319_v30 = vadd.f32 %v4222_v12, %v1284_v25 }
 0x1d1   : > { %1578 = vrot.lane.b32.xlu2 %v1502_v21, %s3488_s11  ;;  %2133 = vmatpush.msrb.mxu0 %v1909_v0 }
 0x1d2   : > { %3256 = vmatmul.msk.f32.gmra.mxu2 %vm826_vm6, %v4002_v23  ;;  %v1387_v14 = vrot.slane %v1319_v30, 6  ;;  %v1680_v23 = vsel %vm578_vm2, %v1677_v7, %v1679_v58  ;;  %v657_v30 = vrot.slane %v4283_v43, 2  ;;  %v481_v43 = vsel %vm401_vm1, %v478_v63, %v480_v41  ;;  %v3265_v41 = vld [vmem:[%s5369_s3 + $0x18] sm:$0xff] }
 0x1d4   : > { %v4319_v44 = vsel %vm288_vm0, 0.0, %v1387_v14  ;;  %v971_v25 = vpop.f32.mrf.mxu0 }
 0x1d5   : > { %v1203_v42 = vpop.f32.mrf.mxu2  ;;  %v1681_v7 = vrot.slane %v4319_v44, 2  ;;  %v1505_v57 = vrot.slane %v4319_v44, 1 }
 0x1d6   : > { %v1285_v11 = vadd.f32 %v1203_v42, %v1079_v54  ;;  %v654_v54 = vrot.slane %v4297_v20, 2  ;;  %v1908_v42 = vld [vmem:[%s5369_s3 + $0x8] sm:$0xff] }
 0x1d7   : > { %2134 = vmatpush.msrb.mxu0 %v1908_v42 }
 0x1d8   : > { %v1320_v50 = vadd.f32 %v4222_v12, %v1285_v11  ;;  %542 = vrot.lane.b32.xlu1 %v479_v8, %s3487_s10  ;;  %v1085_v8 = vadd.f32 %v1084_v9, %v968_v35 }
 0x1d9   : > { %1756 = vrot.lane.b32.xlu2 %v1680_v23, %s3490_s13  ;;  %v656_v23 = vsel %vm578_vm2, %v654_v54, %v655_v24 }
 0x1da   : > { %v1388_v46 = vrot.slane %v1320_v50, 6  ;;  %3257 = vmatmul.msk.f32.gmra.mxu2 %vm826_vm6, %v4012_v39  ;;  %v658_v50 = vsel %vm578_vm2, %v655_v24, %v657_v30 }
 0x1dc   : > { %v4324_v5 = vsel %vm288_vm0, %v1387_v14, %v1388_v46  ;;  %v1508_v28 = vrot.slane %v1388_v46, 1  ;;  %v1907_v14 = vld [vmem:[%s5369_s3] sm:$0xff]  ;;  %v974_v9 = vpop.f32.mrf.mxu0  ;;  %v1684_v63 = vrot.slane %v1388_v46, 2 }
 0x1dd   : > { %v1206_v56 = vpop.f32.mrf.mxu2  ;;  %v1682_v31 = vrot.slane %v4324_v5, 2  ;;  %v1506_v39 = vrot.slane %v4324_v5, 1  ;;  %2135 = vmatpush.msrb.mxu0 %v1907_v14 }
 0x1de   : > { %v1286_v3 = vadd.f32 %v1206_v56, %v1082_v59  ;;  %2136 = vmatmul.f32.vlgmr.msrb.gmra.mxu0 %v3489_v48  ;;  %v1088_v56 = vadd.f32 %v1087_v10, %v971_v25 }
 0x1df   : > { %v1683_v38 = vsel %vm578_vm2, %v1681_v7, %v1682_v31  ;;  %v1509_v18 = vsel %vm401_vm1, %v1506_v39, %v1508_v28  ;;  %v1507_v21 = vsel %vm401_vm1, %v1505_v57, %v1506_v39  ;;  %v1090_v28 = vpop.f32.mrf.mxu1 }
 0x1e0   : > { %1584 = vrot.lane.b32.xlu1 %v1509_v18, %s3488_s11  ;;  %1582 = vrot.lane.b32.xlu0 %v1507_v21, %s3488_s11  ;;  %v1321_v58 = vadd.f32 %v4222_v12, %v1286_v3  ;;  %v1685_v21 = vsel %vm578_vm2, %v1682_v31, %v1684_v63  ;;  %v3266_v31 = vld [vmem:[%s5369_s3 + $0x20] sm:$0xff]  ;;  %v1091_v54 = vadd.f32 %v1090_v28, %v974_v9 }
 0x1e1   : > { %1758 = vrot.lane.b32.xlu2 %v1683_v38, %s3490_s13  ;;  %2021 = vmatpush.msrb.mxu3 %v3266_v31 }
 0x1e2   : > { %3258 = vmatmul.msk.f32.gmra.mxu2 %vm826_vm6, %v4028_v15  ;;  %v1390_v59 = vrot.slane %v1321_v58, 6 }
 0x1e3   : > { %2022 = vmatpush.msrb.mxu3 %v3265_v41 }
 0x1e4   : > { %v4364_v35 = vsel %vm288_vm0, 0.0, %v1390_v59  ;;  %v977_v25 = vpop.f32.mrf.mxu0  ;;  %2023 = vmatmul.f32.vlgmr.msrb.gmra.mxu3 %v3489_v48 }
 0x1e5   : > { %v1209_v11 = vpop.f32.mrf.mxu2  ;;  %v1510_v38 = vrot.slane %v4364_v35, 1 }
 0x1e6   : > { %v1287_v15 = vadd.f32 %v1209_v11, %v1085_v8  ;;  %2139 = vmatmul.f32.gmra.mxu0 %v3489_v48  ;;  %v1686_v8 = vrot.slane %v4364_v35, 2  ;;  %v4393_v11 = vpop.f32.mrf.mxu3 }
 0x1e7   : > { %v1093_v46 = vpop.f32.mrf.mxu1 }
 0x1e8   : > { %v1322_v0 = vadd.f32 %v4222_v12, %v1287_v15  ;;  %721 = vrot.lane.b32.xlu1 %v658_v50, %s3488_s11  ;;  %719 = vrot.lane.b32.xlu0 %v656_v23, %s3488_s11  ;;  %v1094_v15 = vadd.f32 %v1093_v46, %v977_v25  ;;  %v3326_v25 = vld [vmem:[%s5369_s3 + $0x30] sm:$0xff] }
 0x1e9   : > { %544 = vrot.lane.b32.xlu2 %v481_v43, %s3487_s10  ;;  %s3492_s10 = smov 32  }
 0x1ea   : > { %v1391_v53 = vrot.slane %v1322_v0, 6  ;;  %3259 = vmatmul.msk.f32.gmra.mxu2 %vm826_vm6, %v4044_v52 }
 0x1ec   : > { %v4369_v7 = vsel %vm288_vm0, %v1390_v59, %v1391_v53  ;;  %v1513_v39 = vrot.slane %v1391_v53, 1  ;;  %v1689_v58 = vrot.slane %v1391_v53, 2  ;;  %v980_v63 = vpop.f32.mrf.mxu0  ;;  %2026 = vmatmul.f32.gmra.mxu3 %v3489_v48 }
 0x1ed   : > { %v1212_v57 = vpop.f32.mrf.mxu2  ;;  %v1511_v3 = vrot.slane %v4369_v7, 1  ;;  %v1687_v30 = vrot.slane %v4369_v7, 2 }
 0x1ee   : > { %v1288_v18 = vadd.f32 %v1212_v57, %v1088_v56  ;;  %2142 = vmatmul.f32.gmra.mxu0 %v3489_v48 }
 0x1ef   : > { %v1514_v24 = vsel %vm401_vm1, %v1511_v3, %v1513_v39  ;;  %v1512_v52 = vsel %vm401_vm1, %v1510_v38, %v1511_v3  ;;  %v1688_v50 = vsel %vm578_vm2, %v1686_v8, %v1687_v30  ;;  %v1690_v59 = vsel %vm578_vm2, %v1687_v30, %v1689_v58  ;;  %v1096_v0 = vpop.f32.mrf.mxu1 }
 0x1f0   : > { %1760 = vrot.lane.b32.xlu0 %v1685_v21, %s3490_s13  ;;  %1588 = vrot.lane.b32.xlu1 %v1514_v24, %s3488_s11  ;;  %v1323_v10 = vadd.f32 %v4222_v12, %v1288_v18  ;;  %v1097_v46 = vadd.f32 %v1096_v0, %v980_v63 }
 0x1f1   : > { %1586 = vrot.lane.b32.xlu2 %v1512_v52, %s3488_s11  ;;  %v4419_v52 = vpop.f32.mrf.mxu3 }
 0x1f2   : > { %3260 = vmatmul.msk.f32.gmra.mxu2 %vm826_vm6, %v4056_v36  ;;  %v1393_v14 = vrot.slane %v1323_v10, 6 }
 0x1f4   : > { %v4401_v43 = vsel %vm288_vm0, 0.0, %v1393_v14  ;;  %v983_v41 = vpop.f32.mrf.mxu0 }
 0x1f5   : > { %v1215_v42 = vpop.f32.mrf.mxu2  ;;  %v1691_v39 = vrot.slane %v4401_v43, 2  ;;  %v1515_v38 = vrot.slane %v4401_v43, 1 }
 0x1f6   : > { %v1289_v36 = vadd.f32 %v1215_v42, %v1091_v54  ;;  %2145 = vmatmul.f32.gmra.mxu0 %v3489_v48  ;;  %v3327_v48 = vld [vmem:[%s5369_s3 + $0x38] sm:$0xff] }
 0x1f7   : > { %2257 = vmatpush.msrb.mxu1 %v3327_v48  ;;  %v1099_v42 = vpop.f32.mrf.mxu1 }
 0x1f8   : > { %v1324_v23 = vadd.f32 %v4222_v12, %v1289_v36  ;;  %1762 = vrot.lane.b32.xlu0 %v1688_v50, %s3490_s13 }
 0x1f9   : > { %1764 = vrot.lane.b32.xlu2 %v1690_v59, %s3490_s13  ;;  %2258 = vmatpush.msrb.mxu1 %v3326_v25  ;;  %v4437_v50 = vpop.f32.mrf.mxu3 }
 0x1fa   : > { %v1394_v28 = vrot.slane %v1324_v23, 6  ;;  %3261 = vmatmul.msk.f32.gmra.mxu2 %vm826_vm6, %v4068_v19  ;;  %v1100_v23 = vadd.f32 %v1099_v42, %v983_v41  ;;  %v1106_v42 = vadd.f32 %v4393_v11, %v4110_v33 }
 0x1fc   : > { %v4406_v9 = vsel %vm288_vm0, %v1393_v14, %v1394_v28  ;;  %v1518_v53 = vrot.slane %v1394_v28, 1  ;;  %v1694_v31 = vrot.slane %v1394_v28, 2 }
 0x1fd   : > { %v1218_v56 = vpop.f32.mrf.mxu2  ;;  %v1692_v57 = vrot.slane %v4406_v9, 2  ;;  %v1516_v3 = vrot.slane %v4406_v9, 1 }
 0x1fe   : > { %v1290_v18 = vadd.f32 %v1218_v56, %v1094_v15 }
 0x1ff   : > { %v1693_v19 = vsel %vm578_vm2, %v1691_v39, %v1692_v57  ;;  %v1519_v21 = vsel %vm401_vm1, %v1516_v3, %v1518_v53  ;;  %v1517_v24 = vsel %vm401_vm1, %v1515_v38, %v1516_v3  ;;  %v1695_v8 = vsel %vm578_vm2, %v1692_v57, %v1694_v31 }
 0x200   : > { %1766 = vrot.lane.b32.xlu1 %v1693_v19, %s3490_s13  ;;  %1590 = vrot.lane.b32.xlu0 %v1517_v24, %s3488_s11  ;;  %v1325_v10 = vadd.f32 %v4222_v12, %v1290_v18  ;;  %v986_v18 = vpop.f32.mrf.mxu0  ;;  %v1102_v19 = vpop.f32.mrf.mxu1 }
 0x201   : > { %1592 = vrot.lane.b32.xlu2 %v1519_v21, %s3488_s11  ;;  %v1103_v24 = vadd.f32 %v1102_v19, %v986_v18  ;;  %v1109_v18 = vadd.f32 %v4419_v52, %v4119_v45 }
 0x202   : > { %3262 = vmatmul.msk.f32.gmra.mxu2 %vm826_vm6, %v4082_v26  ;;  %v1396_v54 = vrot.slane %v1325_v10, 6  ;;  %v4453_v10 = vpop.f32.mrf.mxu3 }
 0x204   : > { %v4435_v14 = vsel %vm288_vm0, 0.0, %v1396_v54 }
 0x205   : > { %v1221_v30 = vpop.f32.mrf.mxu2  ;;  %v1696_v0 = vrot.slane %v4435_v14, 2  ;;  %v1520_v56 = vrot.slane %v4435_v14, 1 }
 0x206   : > { %v1291_v58 = vadd.f32 %v1221_v30, %v1097_v46 }
 0x208   : > { %v1326_v26 = vadd.f32 %v4222_v12, %v1291_v58  ;;  %1768 = vrot.lane.b32.xlu0 %v1695_v8, %s3490_s13 }
 0x20a   : > { %v1397_v36 = vrot.slane %v1326_v26, 6 }
 0x20c   : > { %v4440_v59 = vsel %vm288_vm0, %v1396_v54, %v1397_v36  ;;  %v1523_v15 = vrot.slane %v1397_v36, 1  ;;  %v1699_v46 = vrot.slane %v1397_v36, 2 }
 0x20d   : > { %v1224_v28 = vpop.f32.mrf.mxu2  ;;  %v1697_v53 = vrot.slane %v4440_v59, 2  ;;  %v1521_v63 = vrot.slane %v4440_v59, 1 }
 0x20e   : > { %v1292_v39 = vadd.f32 %v1224_v28, %v1100_v23 }
 0x20f   : > { %v1698_v57 = vsel %vm578_vm2, %v1696_v0, %v1697_v53  ;;  %v1524_v3 = vsel %vm401_vm1, %v1521_v63, %v1523_v15  ;;  %v1522_v38 = vsel %vm401_vm1, %v1520_v56, %v1521_v63  ;;  %v1700_v54 = vsel %vm578_vm2, %v1697_v53, %v1699_v46  ;;  %v4470_v63 = vpop.f32.mrf.mxu3 }
 0x210   : > { %1770 = vrot.lane.b32.xlu2 %v1698_v57, %s3490_s13  ;;  %1596 = vrot.lane.b32.xlu0 %v1524_v3, %s3488_s11  ;;  %v1327_v21 = vadd.f32 %v4222_v12, %v1292_v39 }
 0x211   : > { %1594 = vrot.lane.b32.xlu1 %v1522_v38, %s3488_s11 }
 0x212   : > { %v1399_v31 = vrot.slane %v1327_v21, 6 }
 0x214   : > { %v4459_v58 = vsel %vm288_vm0, 0.0, %v1399_v31 }
 0x215   : > { %v1227_v48 = vpop.f32.mrf.mxu2  ;;  %v1701_v23 = vrot.slane %v4459_v58, 2  ;;  %v1525_v0 = vrot.slane %v4459_v58, 1 }
 0x216   : > { %v1293_v25 = vadd.f32 %v1227_v48, %v1103_v24 }
 0x217   : > { %v4490_v45 = vpop.f32.mrf.mxu3 }
 0x218   : > { %v1328_v30 = vadd.f32 %v4222_v12, %v1293_v25  ;;  %v1573_v25 = vpop.permute.xlu2 %1572 }
 0x219   : > { %1772 = vrot.lane.b32.xlu1 %v1700_v54, %s3490_s13  ;;  %v1843_v54 = vsel %vm788_vm5, %v4234_v49, %v1573_v25 }
 0x21a   : > { %v1400_v41 = vrot.slane %v1328_v30, 6 }
 0x21c   : > { %v4464_v8 = vsel %vm288_vm0, %v1399_v31, %v1400_v41  ;;  %v1528_v26 = vrot.slane %v1400_v41, 1  ;;  %v1704_v38 = vrot.slane %v1400_v41, 2 }
 0x21d   : > { %v1230_v36 = vpop.f32.mrf.mxu2  ;;  %v1702_v15 = vrot.slane %v4464_v8, 2  ;;  %v1526_v28 = vrot.slane %v4464_v8, 1 }
 0x21e   : > { %v1294_v53 = vadd.f32 %v1230_v36, %v1106_v42  ;;  %v1112_v42 = vadd.f32 %v4437_v50, %v4129_v37 }
 0x21f   : > { %v1703_v56 = vsel %vm578_vm2, %v1701_v23, %v1702_v15  ;;  %v1529_v33 = vsel %vm401_vm1, %v1526_v28, %v1528_v26  ;;  %v1527_v11 = vsel %vm401_vm1, %v1525_v0, %v1526_v28  ;;  %v1705_v31 = vsel %vm578_vm2, %v1702_v15, %v1704_v38 }
 0x220   : > { %1774 = vrot.lane.b32.xlu0 %v1703_v56, %s3490_s13  ;;  %1598 = vrot.lane.b32.xlu2 %v1527_v11, %s3488_s11  ;;  %v1329_v39 = vadd.f32 %v4222_v12, %v1294_v53 }
 0x221   : > { %1600 = vrot.lane.b32.xlu1 %v1529_v33, %s3488_s11 }
 0x222   : > { %v1747_v57 = vpop.permute.xlu1 %1746  ;;  %v1402_v46 = vrot.slane %v1329_v39, 6 }
 0x223   : > { %v1571_v3 = vpop.permute.xlu0 %1570 }
 0x224   : > { %v1842_v19 = vsel %vm788_vm5, %v4229_v27, %v1571_v3  ;;  %v4493_v27 = vsel %vm288_vm0, 0.0, %v1402_v46  ;;  %v1751_v3 = vpop.permute.xlu2 %1750 }
 0x225   : > { %v1233_v21 = vpop.f32.mrf.mxu2  ;;  %v1875_v24 = vsel %vm1874_vm7, %v1842_v19, %v1747_v57  ;;  %v1530_v28 = vrot.slane %v4493_v27, 1  ;;  %v1706_v53 = vrot.slane %v4493_v27, 2  ;;  %v1123_v57 = vpop.f32.mrf.mxu3  ;;  %v1115_v19 = vadd.f32 %v4453_v10, %v4139_v17 }
 0x226   : > { %v1295_v48 = vadd.f32 %v1233_v21, %v1109_v18  ;;  %3268 = vmatmul.msk.f32.gmra.mxu3 %vm1914_vm8, %v1875_v24  ;;  %3298 = vmatmul.msk.f32.gmra.mxu0 %vm1914_vm8, %v1875_v24 }
 0x227   : > { %3329 = vmatmul.msk.f32.vlgmr.msrb.gmra.mxu1 %vm1914_vm8, %v1875_v24 }
 0x228   : > { %v1330_v30 = vadd.f32 %v4222_v12, %v1295_v48  ;;  %1776 = vrot.lane.b32.xlu2 %v1705_v31, %s3490_s13 }
 0x22a   : > { %v1403_v52 = vrot.slane %v1330_v30, 6 }
 0x22b   : > { %v1749_v41 = vpop.permute.xlu0 %1748 }
 0x22c   : > { %v4500_v26 = vsel %vm288_vm0, %v1402_v46, %v1403_v52  ;;  %v1876_v36 = vsel %vm1874_vm7, %v1843_v54, %v1749_v41  ;;  %v1533_v23 = vrot.slane %v1403_v52, 1  ;;  %v1709_v18 = vrot.slane %v1403_v52, 2 }
 0x22d   : > { %v1236_v15 = vpop.f32.mrf.mxu2  ;;  %v1531_v0 = vrot.slane %v4500_v26, 1  ;;  %v1707_v56 = vrot.slane %v4500_v26, 2  ;;  %v1118_v41 = vadd.f32 %v4470_v63, %v4149_v61  ;;  %v1579_v61 = vpop.permute.xlu2 %1578 }
 0x22e   : > { %v1296_v49 = vadd.f32 %v1236_v15, %v1112_v42  ;;  %3269 = vmatmul.msk.f32.gmra.mxu3 %vm1914_vm8, %v1876_v36  ;;  %3299 = vmatmul.msk.f32.gmra.mxu0 %vm1914_vm8, %v1876_v36 }
 0x22f   : > { %3330 = vmatmul.msk.f32.gmra.mxu1 %vm1914_vm8, %v1876_v36  ;;  %v1532_v37 = vsel %vm401_vm1, %v1530_v28, %v1531_v0  ;;  %v1708_v50 = vsel %vm578_vm2, %v1706_v53, %v1707_v56  ;;  %v1534_v33 = vsel %vm401_vm1, %v1531_v0, %v1533_v23  ;;  %v1710_v25 = vsel %vm578_vm2, %v1707_v56, %v1709_v18  ;;  %v4539_v23 = vpop.f32.mrf.mxu3 }
 0x230   : > { %1602 = vrot.lane.b32.xlu0 %v1532_v37, %s3488_s11  ;;  %1778 = vrot.lane.b32.xlu1 %v1708_v50, %s3490_s13  ;;  %v1331_v11 = vadd.f32 %v4222_v12, %v1296_v49  ;;  %v1846_v50 = vsel %vm788_vm5, %v4279_v22, %v1579_v61  ;;  %v1121_v18 = vadd.f32 %v4490_v45, %v4159_v55 }
 0x231   : > { %1604 = vrot.lane.b32.xlu2 %v1534_v33, %s3488_s11 }
 0x232   : > { %v1575_v39 = vpop.permute.xlu1 %1574  ;;  %v1405_v46 = vrot.slane %v1331_v11, 6 }
 0x233   : > { %v1844_v38 = vsel %vm788_vm5, %v4253_v32, %v1575_v39  ;;  %v1577_v31 = vpop.permute.xlu0 %1576 }
 0x234   : > { %v1877_v21 = vsel %vm1874_vm7, %v1844_v38, %v1751_v3  ;;  %v4529_v17 = vsel %vm288_vm0, 0.0, %v1405_v46  ;;  %v1845_v10 = vsel %vm788_vm5, %v4258_v47, %v1577_v31 }
 0x235   : > { %v1239_v24 = vpop.f32.mrf.mxu2  ;;  %v1535_v0 = vrot.slane %v4529_v17, 1  ;;  %v1711_v47 = vrot.slane %v4529_v17, 2  ;;  %v1757_v31 = vpop.permute.xlu2 %1756 }
 0x236   : > { %v1297_v48 = vadd.f32 %v1239_v24, %v1115_v19  ;;  %3270 = vmatmul.msk.f32.gmra.mxu3 %vm1914_vm8, %v1877_v21  ;;  %3300 = vmatmul.msk.f32.gmra.mxu0 %vm1914_vm8, %v1877_v21 }
 0x237   : > { %3331 = vmatmul.msk.f32.gmra.mxu1 %vm1914_vm8, %v1877_v21 }
 0x238   : > { %v1332_v32 = vadd.f32 %v4222_v12, %v1297_v48  ;;  %1780 = vrot.lane.b32.xlu0 %v1710_v25, %s3490_s13 }
 0x23a   : > { %v1406_v30 = vrot.slane %v1332_v32, 6  ;;  %v1753_v52 = vpop.permute.xlu1 %1752  ;;  %v1124_v32 = vadd.f32 %v1123_v57, %v4166_v6 }
 0x23b   : > { %v1878_v54 = vsel %vm1874_vm7, %v1845_v10, %v1753_v52 }
 0x23c   : > { %v4537_v42 = vsel %vm288_vm0, %v1405_v46, %v1406_v30  ;;  %v1538_v36 = vrot.slane %v1406_v30, 1  ;;  %v1714_v38 = vrot.slane %v1406_v30, 2  ;;  %v1129_v46 = vpop.f32.mrf.mxu3 }
 0x23d   : > { %v1242_v15 = vpop.f32.mrf.mxu2  ;;  %v1536_v28 = vrot.slane %v4537_v42, 1  ;;  %v1712_v53 = vrot.slane %v4537_v42, 2 }
 0x23e   : > { %v1298_v56 = vadd.f32 %v1242_v15, %v1118_v41  ;;  %3271 = vmatmul.msk.f32.gmra.mxu3 %vm1914_vm8, %v1878_v54  ;;  %3301 = vmatmul.msk.f32.gmra.mxu0 %vm1914_vm8, %v1878_v54 }
 0x23f   : > { %3332 = vmatmul.msk.f32.gmra.mxu1 %vm1914_vm8, %v1878_v54  ;;  %v1539_v63 = vsel %vm401_vm1, %v1536_v28, %v1538_v36  ;;  %v1537_v49 = vsel %vm401_vm1, %v1535_v0, %v1536_v28  ;;  %v1713_v37 = vsel %vm578_vm2, %v1711_v47, %v1712_v53  ;;  %v1715_v22 = vsel %vm578_vm2, %v1712_v53, %v1714_v38 }
 0x240   : > { %1608 = vrot.lane.b32.xlu0 %v1539_v63, %s3488_s11  ;;  %1606 = vrot.lane.b32.xlu1 %v1537_v49, %s3488_s11  ;;  %v1333_v33 = vadd.f32 %v4222_v12, %v1298_v56  ;;  %v1759_v63 = vpop.permute.xlu2 %1758 }
 0x241   : > { %1782 = vrot.lane.b32.xlu2 %v1713_v37, %s3490_s13  ;;  %v1127_v37 = vadd.f32 %v4539_v23, %v4173_v62 }
 0x242   : > { %v1755_v11 = vpop.permute.xlu0 %1754  ;;  %v1581_v39 = vpop.permute.xlu1 %1580  ;;  %v1408_v21 = vrot.slane %v1333_v33, 6 }
 0x243   : > { %v1879_v3 = vsel %vm1874_vm7, %v1846_v50, %v1755_v11  ;;  %v1847_v55 = vsel %vm788_vm5, %v4286_v1, %v1581_v39 }
 0x244   : > { %v4569_v45 = vsel %vm288_vm0, 0.0, %v1408_v21  ;;  %v1880_v52 = vsel %vm1874_vm7, %v1847_v55, %v1757_v31  ;;  %v1132_v53 = vpop.f32.mrf.mxu3 }
 0x245   : > { %v1245_v19 = vpop.f32.mrf.mxu2  ;;  %v1716_v36 = vrot.slane %v4569_v45, 2  ;;  %v1540_v28 = vrot.slane %v4569_v45, 1 }
 0x246   : > { %v1299_v24 = vadd.f32 %v1245_v19, %v1121_v18  ;;  %3272 = vmatmul.msk.f32.gmra.mxu3 %vm1914_vm8, %v1879_v3  ;;  %3302 = vmatmul.msk.f32.gmra.mxu0 %vm1914_vm8, %v1879_v3 }
 0x247   : > { %3333 = vmatmul.msk.f32.gmra.mxu1 %vm1914_vm8, %v1879_v3 }
 0x248   : > { %v1334_v48 = vadd.f32 %v4222_v12, %v1299_v24  ;;  %1784 = vrot.lane.b32.xlu1 %v1715_v22, %s3490_s13 }
 0x24a   : > { %v1409_v25 = vrot.slane %v1334_v48, 6  ;;  %v543_v30 = vpop.permute.xlu1 %542  ;;  %v1130_v48 = vadd.f32 %v1129_v46, %v4178_v4 }
 0x24b   : > { %v786_v62 = vsel %vm755_vm4, %v4297_v20, %v543_v30 }
 0x24c   : > { %v4573_v10 = vsel %vm288_vm0, %v1408_v21, %v1409_v25  ;;  %v1543_v54 = vrot.slane %v1409_v25, 1  ;;  %v1719_v33 = vrot.slane %v1409_v25, 2  ;;  %v1135_v24 = vpop.f32.mrf.mxu3  ;;  %v545_v25 = vpop.permute.xlu2 %544 }
 0x24d   : > { %v1248_v41 = vpop.f32.mrf.mxu2  ;;  %v1717_v15 = vrot.slane %v4573_v10, 2  ;;  %v1541_v1 = vrot.slane %v4573_v10, 1 }
 0x24e   : > { %v1300_v0 = vadd.f32 %v1248_v41, %v1124_v32  ;;  %3273 = vmatmul.msk.f32.gmra.mxu3 %vm1914_vm8, %v1880_v52  ;;  %3303 = vmatmul.msk.f32.gmra.mxu0 %vm1914_vm8, %v1880_v52  ;;  %v787_v41 = vsel %vm755_vm4, %v4294_v16, %v545_v25  ;;  %vm3073_vm4 = vcmask 261120  }
 0x24f   : > { %3334 = vmatmul.msk.f32.gmra.mxu1 %vm1914_vm8, %v1880_v52  ;;  %v1718_v6 = vsel %vm578_vm2, %v1716_v36, %v1717_v15  ;;  %v1544_v57 = vsel %vm401_vm1, %v1541_v1, %v1543_v54  ;;  %v1542_v47 = vsel %vm401_vm1, %v1540_v28, %v1541_v1 }
 0x250   : > { %1786 = vrot.lane.b32.xlu0 %v1718_v6, %s3490_s13  ;;  %1612 = vrot.lane.b32.xlu1 %v1544_v57, %s3488_s11  ;;  %v1335_v56 = vadd.f32 %v4222_v12, %v1300_v0 }
 0x251   : > { %1610 = vrot.lane.b32.xlu2 %v1542_v47, %s3488_s11 }
 0x252   : > { %v1583_v61 = vpop.permute.xlu0 %1582  ;;  %v1411_v39 = vrot.slane %v1335_v56, 6  ;;  %v1585_v3 = vpop.permute.xlu1 %1584  ;;  %v1133_v56 = vadd.f32 %v1132_v53, %v4183_v2 }
 0x253   : > { %v1848_v49 = vsel %vm788_vm5, %v4319_v44, %v1583_v61  ;;  %v1720_v44 = vsel %vm578_vm2, %v1717_v15, %v1719_v33  ;;  %v1849_v0 = vsel %vm788_vm5, %v4324_v5, %v1585_v3 }
 0x254   : > { %v1881_v50 = vsel %vm1874_vm7, %v1848_v49, %v1759_v63  ;;  %v4604_v23 = vsel %vm288_vm0, 0.0, %v1411_v39  ;;  %v1138_v61 = vpop.f32.mrf.mxu3 }
 0x255   : > { %v1251_v11 = vpop.f32.mrf.mxu2  ;;  %v1545_v20 = vrot.slane %v4604_v23, 1  ;;  %v1721_v52 = vrot.slane %v4604_v23, 2 }
 0x256   : > { %v1301_v38 = vadd.f32 %v1251_v11, %v1127_v37  ;;  %3274 = vmatmul.msk.f32.gmra.mxu3 %vm1914_vm8, %v1881_v50  ;;  %3304 = vmatmul.msk.f32.gmra.mxu0 %vm1914_vm8, %v1881_v50  ;;  %v1587_v37 = vpop.permute.xlu2 %1586 }
 0x257   : > { %3335 = vmatmul.msk.f32.gmra.mxu1 %vm1914_vm8, %v1881_v50  ;;  %v1850_v2 = vsel %vm788_vm5, %v4364_v35, %v1587_v37 }
 0x258   : > { %v1336_v18 = vadd.f32 %v4222_v12, %v1301_v38  ;;  %v1136_v38 = vadd.f32 %v1135_v24, %v4188_v40 }
 0x259   : > { %1788 = vrot.lane.b32.xlu2 %v1720_v44, %s3490_s13 }
 0x25a   : > { %v1412_v19 = vrot.slane %v1336_v18, 6  ;;  %v720_v21 = vpop.permute.xlu0 %719  ;;  %v722_v1 = vpop.permute.xlu1 %721 }
 0x25b   : > { %v819_v22 = vsel %vm788_vm5, %v786_v62, %v720_v21  ;;  %v820_v28 = vsel %vm788_vm5, %v787_v41, %v722_v1 }
 0x25c   : > { %v4609_v31 = vsel %vm288_vm0, %v1411_v39, %v1412_v19  ;;  %3263 = vmatmul.msk.f32.gmra.mxu2 %vm826_vm6, %v819_v22  ;;  %v1548_v55 = vrot.slane %v1412_v19, 1  ;;  %v1724_v47 = vrot.slane %v1412_v19, 2 }
 0x25d   : > { %v1254_v32 = vpop.f32.mrf.mxu2  ;;  %v1546_v30 = vrot.slane %v4609_v31, 1  ;;  %v1722_v54 = vrot.slane %v4609_v31, 2 }
 0x25e   : > { %v1302_v4 = vadd.f32 %v1254_v32, %v1130_v48  ;;  %v1141_v48 = vpop.f32.mrf.mxu3 }
 0x25f   : > { %v1547_v46 = vsel %vm401_vm1, %v1545_v20, %v1546_v30  ;;  %v1723_v36 = vsel %vm578_vm2, %v1721_v52, %v1722_v54  ;;  %v1549_v15 = vsel %vm401_vm1, %v1546_v30, %v1548_v55  ;;  %v1725_v50 = vsel %vm578_vm2, %v1722_v54, %v1724_v47  ;;  %v1765_v30 = vpop.permute.xlu2 %1764  ;;  %v4681_v47 = vpop.f32.mrf.mxu0 }
 0x260   : > { %1614 = vrot.lane.b32.xlu0 %v1547_v46, %s3488_s11  ;;  %1790 = vrot.lane.b32.xlu1 %v1723_v36, %s3490_s13  ;;  %v1337_v16 = vadd.f32 %v4222_v12, %v1302_v4  ;;  %v1139_v4 = vadd.f32 %v1138_v61, %v4193_v34  ;;  %v4674_v34 = vld [vmem:[%s5368_s2] ss:$0 sm:$0xff] }
 0x261   : > { %1616 = vrot.lane.b32.xlu2 %v1549_v15, %s3488_s11 }
 0x262   : > { %v1761_v6 = vpop.permute.xlu0 %1760  ;;  %v1414_v49 = vrot.slane %v1337_v16, 6  ;;  %v1589_v62 = vpop.permute.xlu1 %1588 }
 0x263   : > { %v1882_v57 = vsel %vm1874_vm7, %v1849_v0, %v1761_v6  ;;  %v1851_v20 = vsel %vm788_vm5, %v4369_v7, %v1589_v62 }
 0x264   : > { %3264 = vmatmul.msk.f32.gmra.mxu2 %vm826_vm6, %v820_v28  ;;  %3275 = vmatmul.msk.f32.gmra.mxu3 %vm1914_vm8, %v1882_v57  ;;  %v4640_v53 = vsel %vm288_vm0, 0.0, %v1414_v49  ;;  %v1884_v54 = vsel %vm1874_vm7, %v1851_v20, %v1765_v30  ;;  %vm3077_vm6 = vcmask 523264  }
 0x265   : > { %3305 = vmatmul.msk.f32.gmra.mxu0 %vm1914_vm8, %v1882_v57  ;;  %3336 = vmatmul.msk.f32.gmra.mxu1 %vm1914_vm8, %v1882_v57  ;;  %v1257_v63 = vpop.f32.mrf.mxu2  ;;  %v1550_v21 = vrot.slane %v4640_v53, 1  ;;  %v1726_v22 = vrot.slane %v4640_v53, 2 }
 0x266   : > { %v1303_v5 = vadd.f32 %v1257_v63, %v1133_v56  ;;  %v1144_v16 = vpop.f32.mrf.mxu3 }
 0x268   : > { %v1338_v33 = vadd.f32 %v4222_v12, %v1303_v5  ;;  %1792 = vrot.lane.b32.xlu0 %v1725_v50, %s3490_s13 }
 0x26a   : > { %v1415_v11 = vrot.slane %v1338_v33, 6  ;;  %v1763_v39 = vpop.permute.xlu0 %1762 }
 0x26b   : > { %v1883_v3 = vsel %vm1874_vm7, %v1850_v2, %v1763_v39  ;;  %v1593_v2 = vpop.permute.xlu2 %1592 }
 0x26c   : > { %v4645_v18 = vsel %vm288_vm0, %v1414_v49, %v1415_v11  ;;  %3276 = vmatmul.msk.f32.gmra.mxu3 %vm1914_vm8, %v1883_v3  ;;  %v1553_v44 = vrot.slane %v1415_v11, 1  ;;  %v1729_v41 = vrot.slane %v1415_v11, 2 }
 0x26d   : > { %3306 = vmatmul.msk.f32.gmra.mxu0 %vm1914_vm8, %v1883_v3  ;;  %3337 = vmatmul.msk.f32.gmra.mxu1 %vm1914_vm8, %v1883_v3  ;;  %v1260_v35 = vpop.f32.mrf.mxu2  ;;  %v1551_v19 = vrot.slane %v4645_v18, 1  ;;  %v1727_v40 = vrot.slane %v4645_v18, 2 }
 0x26e   : > { %v1304_v24 = vadd.f32 %v1260_v35, %v1136_v38  ;;  %v4704_v35 = vpop.f32.mrf.mxu3 }
 0x26f   : > { %v1554_v55 = vsel %vm401_vm1, %v1551_v19, %v1553_v44  ;;  %v1552_v25 = vsel %vm401_vm1, %v1550_v21, %v1551_v19  ;;  %v1728_v32 = vsel %vm578_vm2, %v1726_v22, %v1727_v40  ;;  %v1730_v1 = vsel %vm578_vm2, %v1727_v40, %v1729_v41  ;;  %v4709_v40 = vpop.f32.mrf.mxu0 }
 0x270   : > { %1620 = vrot.lane.b32.xlu0 %v1554_v55, %s3488_s11  ;;  %1618 = vrot.lane.b32.xlu1 %v1552_v25, %s3488_s11  ;;  %v1339_v52 = vadd.f32 %v4222_v12, %v1304_v24  ;;  %v1853_v44 = vsel %vm788_vm5, %v4406_v9, %v1593_v2  ;;  %v1145_v21 = vadd.f32 %v1144_v16, %v4205_v60 }
 0x271   : > { %1794 = vrot.lane.b32.xlu2 %v1728_v32, %s3490_s13 }
 0x272   : > { %v1591_v46 = vpop.permute.xlu0 %1590  ;;  %v1417_v36 = vrot.slane %v1339_v52, 6  ;;  %v1767_v28 = vpop.permute.xlu1 %1766 }
 0x273   : > { %v1852_v12 = vsel %vm788_vm5, %v4401_v43, %v1591_v46  ;;  %v1142_v43 = vadd.f32 %v1141_v48, %v4199_v13  ;;  %v1771_v20 = vpop.permute.xlu2 %1770 }
 0x274   : > { %3277 = vmatmul.msk.f32.gmra.mxu3 %vm1914_vm8, %v1884_v54  ;;  %v4679_v6 = vsel %vm288_vm0, 0.0, %v1417_v36  ;;  %v1885_v56 = vsel %vm1874_vm7, %v1852_v12, %v1767_v28 }
 0x275   : > { %3307 = vmatmul.msk.f32.gmra.mxu0 %vm1914_vm8, %v1884_v54  ;;  %3338 = vmatmul.msk.f32.gmra.mxu1 %vm1914_vm8, %v1884_v54  ;;  %v1263_v7 = vpop.f32.mrf.mxu2  ;;  %v1731_v5 = vrot.slane %v4679_v6, 2  ;;  %v1555_v33 = vrot.slane %v4679_v6, 1 }
 0x276   : > { %v1305_v15 = vadd.f32 %v1263_v7, %v1139_v4 }
 0x277   : > { %v4737_v16 = vpop.f32.mrf.mxu0 }
 0x278   : > { %v1340_v0 = vadd.f32 %v4674_v34, %v1305_v15  ;;  %1796 = vrot.lane.b32.xlu1 %v1730_v1, %s3490_s13 }
 0x27a   : > { %v1418_v57 = vrot.slane %v1340_v0, 6  ;;  %v1769_v38 = vpop.permute.xlu0 %1768 }
 0x27b   : > { %v1886_v19 = vsel %vm1874_vm7, %v1853_v44, %v1769_v38 }
 0x27c   : > { %v4686_v61 = vsel %vm288_vm0, %v1417_v36, %v1418_v57  ;;  %3278 = vmatmul.msk.f32.gmra.mxu3 %vm1914_vm8, %v1885_v56  ;;  %v1558_v63 = vrot.slane %v1418_v57, 1  ;;  %v1734_v22 = vrot.slane %v1418_v57, 2 }
 0x27d   : > { %3308 = vmatmul.msk.f32.gmra.mxu0 %vm1914_vm8, %v1885_v56  ;;  %3339 = vmatmul.msk.f32.gmra.mxu1 %vm1914_vm8, %v1885_v56  ;;  %v1266_v49 = vpop.f32.mrf.mxu2  ;;  %v1732_v37 = vrot.slane %v4686_v61, 2  ;;  %v1556_v50 = vrot.slane %v4686_v61, 1 }
 0x27e   : > { %v1306_v13 = vadd.f32 %v1266_v49, %v1142_v43 }
 0x27f   : > { %v1733_v11 = vsel %vm578_vm2, %v1731_v5, %v1732_v37  ;;  %v1559_v39 = vsel %vm401_vm1, %v1556_v50, %v1558_v63  ;;  %v1557_v3 = vsel %vm401_vm1, %v1555_v33, %v1556_v50  ;;  %v1735_v60 = vsel %vm578_vm2, %v1732_v37, %v1734_v22  ;;  %v1599_v5 = vpop.permute.xlu2 %1598  ;;  %v4750_v33 = vpop.f32.mrf.mxu0 }
 0x280   : > { %1798 = vrot.lane.b32.xlu0 %v1733_v11, %s3490_s13  ;;  %1624 = vrot.lane.b32.xlu1 %v1559_v39, %s3488_s11  ;;  %v1341_v62 = vadd.f32 %v4674_v34, %v1306_v13 }
 0x281   : > { %1622 = vrot.lane.b32.xlu2 %v1557_v3, %s3488_s11 }
 0x282   : > { %v1420_v9 = vrot.slane %v1341_v62, 6  ;;  %v1597_v1 = vpop.permute.xlu0 %1596 }
 0x283   : > { %v1595_v24 = vpop.permute.xlu1 %1594  ;;  %v1855_v56 = vsel %vm788_vm5, %v4440_v59, %v1597_v1  ;;  %v1856_v59 = vsel %vm788_vm5, %v4459_v58, %v1599_v5 }
 0x284   : > { %3279 = vmatmul.msk.f32.gmra.mxu3 %vm1914_vm8, %v1886_v19  ;;  %v1854_v25 = vsel %vm788_vm5, %v4435_v14, %v1595_v24  ;;  %v4719_v30 = vsel %vm288_vm0, 0.0, %v1420_v9  ;;  %v4726_v14 = vpop.f32.mrf.mxu3 }
 0x285   : > { %3309 = vmatmul.msk.f32.gmra.mxu0 %vm1914_vm8, %v1886_v19  ;;  %3340 = vmatmul.msk.f32.gmra.mxu1 %vm1914_vm8, %v1886_v19  ;;  %v1269_v48 = vpop.f32.mrf.mxu2  ;;  %v1887_v54 = vsel %vm1874_vm7, %v1854_v25, %v1771_v20  ;;  %v1560_v46 = vrot.slane %v4719_v30, 1  ;;  %v1736_v36 = vrot.slane %v4719_v30, 2 }
 0x286   : > { %v1307_v55 = vadd.f32 %v1269_v48, %v1145_v21 }
 0x287   : > { %v1777_v3 = vpop.permute.xlu2 %1776 }
 0x288   : > { %v1342_v32 = vadd.f32 %v4674_v34, %v1307_v55 }
 0x289   : > { %1800 = vrot.lane.b32.xlu2 %v1735_v60, %s3490_s13 }
 0x28a   : > { %v1421_v52 = vrot.slane %v1342_v32, 6 }
 0x28b   : > { %v1773_v57 = vpop.permute.xlu1 %1772 }
 0x28c   : > { %v4723_v41 = vsel %vm288_vm0, %v1420_v9, %v1421_v52  ;;  %3280 = vmatmul.msk.f32.gmra.mxu3 %vm1914_vm8, %v1887_v54  ;;  %v1563_v4 = vrot.slane %v1421_v52, 1  ;;  %v1888_v43 = vsel %vm1874_vm7, %v1855_v56, %v1773_v57  ;;  %v1739_v63 = vrot.slane %v1421_v52, 2  ;;  %v2024_v49 = vpop.f32.mrf.mxu3 }
 0x28d   : > { %3310 = vmatmul.msk.f32.gmra.mxu0 %vm1914_vm8, %v1887_v54  ;;  %3341 = vmatmul.msk.f32.gmra.mxu1 %vm1914_vm8, %v1887_v54  ;;  %v1561_v7 = vrot.slane %v4723_v41, 1  ;;  %v1737_v15 = vrot.slane %v4723_v41, 2 }
 0x28f   : > { %v1562_v28 = vsel %vm401_vm1, %v1560_v46, %v1561_v7  ;;  %v1738_v12 = vsel %vm578_vm2, %v1736_v36, %v1737_v15  ;;  %v1564_v0 = vsel %vm401_vm1, %v1561_v7, %v1563_v4  ;;  %v1740_v37 = vsel %vm578_vm2, %v1737_v15, %v1739_v63  ;;  %v1605_v9 = vpop.permute.xlu2 %1604 }
 0x290   : > { %1626 = vrot.lane.b32.xlu0 %v1562_v28, %s3488_s11  ;;  %1802 = vrot.lane.b32.xlu1 %v1738_v12, %s3490_s13  ;;  %v2138_v15 = vadd.f32 %v4681_v47, %v2024_v49 }
 0x291   : > { %1628 = vrot.lane.b32.xlu2 %v1564_v0, %s3488_s11 }
 0x292   : > { %v1775_v50 = vpop.permute.xlu0 %1774 }
 0x293   : > { %v1889_v13 = vsel %vm1874_vm7, %v1856_v59, %v1775_v50  ;;  %v1601_v2 = vpop.permute.xlu1 %1600 }
 0x294   : > { %3281 = vmatmul.msk.f32.gmra.mxu3 %vm1914_vm8, %v1888_v43  ;;  %v4758_v11 = vpop.f32.mrf.mxu3  ;;  %v1857_v39 = vsel %vm788_vm5, %v4464_v8, %v1601_v2 }
 0x295   : > { %3311 = vmatmul.msk.f32.gmra.mxu0 %vm1914_vm8, %v1888_v43  ;;  %3342 = vmatmul.msk.f32.gmra.mxu1 %vm1914_vm8, %v1888_v43  ;;  %v1890_v44 = vsel %vm1874_vm7, %v1857_v39, %v1777_v3  ;;  %v4805_v43 = vld [vmem:[%s5370_s4] ss:$0 sm:$0xff] }
 0x298   : > { %1804 = vrot.lane.b32.xlu0 %v1740_v37, %s3490_s13 }
 0x29b   : > { %v1783_v46 = vpop.permute.xlu2 %1782 }
 0x29c   : > { %3282 = vmatmul.msk.f32.gmra.mxu3 %vm1914_vm8, %v1889_v13 }
 0x29d   : > { %3312 = vmatmul.msk.f32.gmra.mxu0 %vm1914_vm8, %v1889_v13  ;;  %3343 = vmatmul.msk.f32.gmra.mxu1 %vm1914_vm8, %v1889_v13 }
 0x2a2   : > { %v1603_v62 = vpop.permute.xlu0 %1602  ;;  %v1779_v21 = vpop.permute.xlu1 %1778 }
 0x2a3   : > { %v4762_v38 = vpop.f32.mrf.mxu0  ;;  %v1858_v19 = vsel %vm788_vm5, %v4493_v27, %v1603_v62  ;;  %v1859_v27 = vsel %vm788_vm5, %v4500_v26, %v1605_v9 }
 0x2a4   : > { %v2260_v58 = vpop.f32.mrf.mxu1  ;;  %3283 = vmatmul.msk.f32.gmra.mxu3 %vm1914_vm8, %v1890_v44  ;;  %v1891_v8 = vsel %vm1874_vm7, %v1858_v19, %v1779_v21 }
 0x2a5   : > { %3313 = vmatmul.msk.f32.gmra.mxu0 %vm1914_vm8, %v1890_v44  ;;  %3344 = vmatmul.msk.f32.gmra.mxu1 %vm1914_vm8, %v1890_v44  ;;  %v2356_v56 = vadd.f32 %v2260_v58, %v2138_v15 }
 0x2a9   : > { %v2030_v22 = vpop.f32.mrf.mxu3 }
 0x2aa   : > { %v1781_v55 = vpop.permute.xlu0 %1780  ;;  %v2144_v1 = vadd.f32 %v4737_v16, %v2030_v22  ;;  %v2391_v16 = vadd.f32 %v4805_v43, %v2356_v56 }
 0x2ab   : > { %v4771_v24 = vpop.f32.mrf.mxu0  ;;  %v1892_v32 = vsel %vm1874_vm7, %v1859_v27, %v1781_v55 }
 0x2ac   : > { %v4773_v48 = vpop.f32.mrf.mxu1  ;;  %3284 = vmatmul.msk.f32.gmra.mxu3 %vm1914_vm8, %v1891_v8  ;;  %v2423_v2 = vsel %vm1874_vm7, %v2391_v16, -inf  ;;  %v1148_v16 = vadd.f32 %v4704_v35, %v4211_v51 }
 0x2ad   : > { %3314 = vmatmul.msk.f32.gmra.mxu0 %vm1914_vm8, %v1891_v8  ;;  %3345 = vmatmul.msk.f32.gmra.mxu1 %vm1914_vm8, %v1891_v8 }
 0x2b1   : > { %v4778_v25 = vpop.f32.mrf.mxu3 }
 0x2b2   : > { %v1607_v52 = vpop.permute.xlu1 %1606  ;;  %v1609_v28 = vpop.permute.xlu0 %1608 }
 0x2b3   : > { %v2155_v60 = vpop.f32.mrf.mxu0  ;;  %v1860_v54 = vsel %vm788_vm5, %v4529_v17, %v1607_v52  ;;  %v1861_v57 = vsel %vm788_vm5, %v4537_v42, %v1609_v28  ;;  %v1611_v42 = vpop.permute.xlu2 %1610 }
 0x2b4   : > { %v2266_v20 = vpop.f32.mrf.mxu1  ;;  %3285 = vmatmul.msk.f32.gmra.mxu3 %vm1914_vm8, %v1892_v32  ;;  %v1893_v7 = vsel %vm1874_vm7, %v1860_v54, %v1783_v46  ;;  %v1862_v13 = vsel %vm788_vm5, %v4569_v45, %v1611_v42 }
 0x2b5   : > { %3315 = vmatmul.msk.f32.gmra.mxu0 %vm1914_vm8, %v1892_v32  ;;  %3346 = vmatmul.msk.f32.gmra.mxu1 %vm1914_vm8, %v1892_v32  ;;  %v2358_v12 = vadd.f32 %v2266_v20, %v2144_v1 }
 0x2b7   : > { %v2393_v47 = vadd.f32 %v4805_v43, %v2358_v12 }
 0x2b9   : > { %v2036_v4 = vpop.f32.mrf.mxu3  ;;  %v2424_v50 = vsel %vm1874_vm7, %v2393_v47, -inf  ;;  %v2147_v47 = vadd.f32 %v4750_v33, %v4778_v25 }
 0x2ba   : > { %v1785_v17 = vpop.permute.xlu1 %1784  ;;  %v4818_v3 = vmax.f32 %v2423_v2, %v2424_v50  ;;  %v2150_v62 = vadd.f32 %v4762_v38, %v2036_v4 }
 0x2bb   : > { %v4792_v26 = vpop.f32.mrf.mxu0  ;;  %v1894_v63 = vsel %vm1874_vm7, %v1861_v57, %v1785_v17  ;;  %v1789_v9 = vpop.permute.xlu2 %1788 }
 0x2bc   : > { %v4789_v36 = vpop.f32.mrf.mxu1  ;;  %3286 = vmatmul.msk.f32.gmra.mxu3 %vm1914_vm8, %v1893_v7  ;;  %v2472_v45 = vsel %vm2471_vm9, %v4818_v3, -inf }
 0x2bd   : > { %3316 = vmatmul.msk.f32.gmra.mxu0 %vm1914_vm8, %v1893_v7  ;;  %3347 = vmatmul.msk.f32.gmra.mxu1 %vm1914_vm8, %v1893_v7  ;;  %v2473_v55 = vrot.slane %v2472_v45, 4 }
 0x2c1   : > { %v4798_v0 = vpop.f32.mrf.mxu3 }
 0x2c2   : > { %v1787_v37 = vpop.permute.xlu0 %1786  ;;  %v1613_v58 = vpop.permute.xlu1 %1612 }
 0x2c3   : > { %v2161_v49 = vpop.f32.mrf.mxu0  ;;  %v1895_v39 = vsel %vm1874_vm7, %v1862_v13, %v1787_v37  ;;  %v1863_v19 = vsel %vm788_vm5, %v4573_v10, %v1613_v58  ;;  %v2474_v10 = vmax.f32 %v2472_v45, %v2473_v55  ;;  %v2643_v55 = vsel %vm2642_vm12, %v4818_v3, -inf }
 0x2c4   : > { %v2272_v5 = vpop.f32.mrf.mxu1  ;;  %3287 = vmatmul.msk.f32.gmra.mxu3 %vm1914_vm8, %v1894_v63  ;;  %v1896_v32 = vsel %vm1874_vm7, %v1863_v19, %v1789_v9 }
 0x2c5   : > { %3317 = vmatmul.msk.f32.gmra.mxu0 %vm1914_vm8, %v1894_v63  ;;  %3348 = vmatmul.msk.f32.gmra.mxu1 %vm1914_vm8, %v1894_v63  ;;  %v2360_v21 = vadd.f32 %v2272_v5, %v2150_v62  ;;  %v2475_v12 = vrot.slane %v2474_v10, 2  ;;  %v2141_v5 = vadd.f32 %v4709_v40, %v4758_v11  ;;  %v2586_v62 = vsel %vm2585_vm11, %v4818_v3, -inf }
 0x2c7   : > { %v2395_v38 = vadd.f32 %v4805_v43, %v2360_v21  ;;  %v2476_v42 = vmax.f32 %v2474_v10, %v2475_v12  ;;  %v2357_v40 = vadd.f32 %v4773_v48, %v2141_v5  ;;  %v1151_v21 = vadd.f32 %v4726_v14, %v4215_v29 }
 0x2c9   : > { %v2042_v59 = vpop.f32.mrf.mxu3  ;;  %v2429_v7 = vsel %vm1874_vm7, %v2395_v38, -inf  ;;  %v2477_v25 = vrot.slane %v2476_v42, 1  ;;  %v2392_v9 = vadd.f32 %v4805_v43, %v2357_v40 }
 0x2ca   : > { %v2156_v27 = vadd.f32 %v2155_v60, %v2042_v59  ;;  %v2359_v59 = vadd.f32 %v4789_v36, %v2147_v47  ;;  %v2529_v36 = vsel %vm2528_vm10, %v4818_v3, -inf }
 0x2cb   : > { %v4830_v22 = vpop.f32.mrf.mxu0 }
 0x2cc   : > { %v4820_v44 = vpop.f32.mrf.mxu1  ;;  %3288 = vmatmul.msk.f32.gmra.mxu3 %vm1914_vm8, %v1895_v39  ;;  %v2394_v48 = vadd.f32 %v4805_v43, %v2359_v59 }
 0x2cd   : > { %3318 = vmatmul.msk.f32.gmra.mxu0 %vm1914_vm8, %v1895_v39  ;;  %3349 = vmatmul.msk.f32.gmra.mxu1 %vm1914_vm8, %v1895_v39 }
 0x2ce   : > { %v2427_v10 = vsel %vm1874_vm7, %v2394_v48, -inf }
 0x2d1   : > { %v4832_v8 = vpop.f32.mrf.mxu3 }
 0x2d2   : > { %v1615_v52 = vpop.permute.xlu0 %1614  ;;  %v1791_v60 = vpop.permute.xlu1 %1790 }
 0x2d3   : > { %v1864_v46 = vsel %vm788_vm5, %v4604_v23, %v1615_v52  ;;  %v4849_v56 = vpop.f32.mrf.mxu0 }
 0x2d4   : > { %v2278_v20 = vpop.f32.mrf.mxu1  ;;  %3289 = vmatmul.msk.f32.gmra.mxu3 %vm1914_vm8, %v1896_v32  ;;  %v1897_v57 = vsel %vm1874_vm7, %v1864_v46, %v1791_v60  ;;  %v2426_v60 = vsel %vm1874_vm7, %v2392_v9, -inf }
 0x2d5   : > { %v2362_v54 = vadd.f32 %v2278_v20, %v2156_v27  ;;  %3319 = vmatmul.msk.f32.gmra.mxu0 %vm1914_vm8, %v1896_v32  ;;  %3350 = vmatmul.msk.f32.gmra.mxu1 %vm1914_vm8, %v1896_v32  ;;  %v2478_v27 = vmax.f32 %v2476_v42, %v2477_v25  ;;  %v2530_v32 = vrot.slane %v2529_v36, 4  ;;  %v2587_v20 = vrot.slane %v2586_v62, 4 }
 0x2d7   : > { %v2397_v4 = vadd.f32 %v4805_v43, %v2362_v54  ;;  %v2588_v5 = vmax.f32 %v2586_v62, %v2587_v20 }
 0x2d9   : > { %v2430_v15 = vsel %vm1874_vm7, %v2397_v4, -inf  ;;  %v2048_v1 = vpop.f32.mrf.mxu3 }
 0x2da   : > { %v4844_v28 = vmax.f32 %v2429_v7, %v2430_v15  ;;  %v4846_v17 = vadd.f32 %v2161_v49, %v2048_v1  ;;  %v1617_v49 = vpop.permute.xlu2 %1616  ;;  %v1793_v13 = vpop.permute.xlu0 %1792  ;;  %v2644_v7 = vrot.slane %v2643_v55, 4 }
 0x2db   : > { %v1865_v33 = vsel %vm788_vm5, %v4609_v31, %v1617_v49 }
 0x2dc   : > { %v2479_v63 = vsel %vm2471_vm9, %v4844_v28, -inf  ;;  %3290 = vmatmul.msk.f32.gmra.mxu3 %vm1914_vm8, %v1897_v57  ;;  %v1898_v35 = vsel %vm1874_vm7, %v1865_v33, %v1793_v13 }
 0x2dd   : > { %v2480_v23 = vrot.slane %v2479_v63, 4  ;;  %3320 = vmatmul.msk.f32.gmra.mxu0 %vm1914_vm8, %v1897_v57  ;;  %3351 = vmatmul.msk.f32.gmra.mxu1 %vm1914_vm8, %v1897_v57  ;;  %v2531_v57 = vmax.f32 %v2529_v36, %v2530_v32  ;;  %v2153_v32 = vadd.f32 %v4771_v24, %v4798_v0 }
 0x2df   : > { %v2481_v37 = vmax.f32 %v2479_v63, %v2480_v23  ;;  %v1272_v50 = vpop.f32.mrf.mxu2  ;;  %v2428_v63 = vmax.f32 %v2426_v60, %v2427_v10  ;;  %v2532_v42 = vrot.slane %v2531_v57, 2  ;;  %v2361_v24 = vadd.f32 %v4820_v44, %v2153_v32 }
 0x2e0   : > { %v1308_v39 = vadd.f32 %v1272_v50, %v1148_v16 }
 0x2e1   : > { %v2482_v2 = vrot.slane %v2481_v37, 2  ;;  %v2699_v49 = vsel %vm2471_vm9, %v2428_v63, -inf  ;;  %v2867_v48 = vsel %vm2642_vm12, %v2428_v63, -inf }
 0x2e2   : > { %v4866_v11 = vpop.f32.mrf.mxu1  ;;  %v4869_v58 = vpop.f32.mrf.mxu0  ;;  %v1343_v45 = vadd.f32 %v4674_v34, %v1308_v39  ;;  %v2811_v39 = vsel %vm2585_vm11, %v2428_v63, -inf  ;;  %v2700_v62 = vrot.slane %v2699_v49, 4  ;;  %v2868_v10 = vrot.slane %v2867_v48, 4 }
 0x2e3   : > { %v2483_v51 = vmax.f32 %v2481_v37, %v2482_v2  ;;  %v1619_v19 = vpop.permute.xlu1 %1618  ;;  %v1795_v15 = vpop.permute.xlu2 %1794  ;;  %v2589_v2 = vrot.slane %v2588_v5, 2 }
 0x2e4   : > { %3291 = vmatmul.msk.f32.gmra.mxu3 %vm1914_vm8, %v1898_v35  ;;  %v1866_v4 = vsel %vm788_vm5, %v4640_v53, %v1619_v19  ;;  %v1423_v46 = vrot.slane %v1343_v45, 6  ;;  %v1621_v37 = vpop.permute.xlu0 %1620 }
 0x2e5   : > { %v2484_v31 = vrot.slane %v2483_v51, 1  ;;  %3321 = vmatmul.msk.f32.gmra.mxu0 %vm1914_vm8, %v1898_v35  ;;  %3352 = vmatmul.msk.f32.gmra.mxu1 %vm1914_vm8, %v1898_v35  ;;  %v1899_v23 = vsel %vm1874_vm7, %v1866_v4, %v1795_v15  ;;  %v1867_v45 = vsel %vm788_vm5, %v4645_v18, %v1621_v37  ;;  %v2533_v18 = vmax.f32 %v2531_v57, %v2532_v42 }
 0x2e6   : > { %v4897_v53 = vsel %vm288_vm0, 0.0, %v1423_v46  ;;  %v2650_v42 = vsel %vm2642_vm12, %v4844_v28, -inf }
 0x2e7   : > { %v2485_v38 = vmax.f32 %v2483_v51, %v2484_v31  ;;  %v1275_v52 = vpop.f32.mrf.mxu2  ;;  %v2051_v54 = vpop.f32.mrf.mxu3  ;;  %v1741_v40 = vrot.slane %v4897_v53, 2  ;;  %v1565_v36 = vrot.slane %v4897_v53, 1  ;;  %v2159_v31 = vadd.f32 %v4792_v26, %v4832_v8 }
 0x2e8   : > { %v1309_v29 = vadd.f32 %v1275_v52, %v1151_v21  ;;  %v2165_v14 = vadd.f32 %v4830_v22, %v2051_v54  ;;  %v2590_v8 = vmax.f32 %v2588_v5, %v2589_v2  ;;  %v2812_v52 = vrot.slane %v2811_v39, 4 }
 0x2e9   : > { %v4890_v3 = vsel %vm2931_vm13, %v2485_v38, %v2478_v27  ;;  %v2363_v20 = vadd.f32 %v4866_v11, %v2159_v31  ;;  %v2701_v54 = vmax.f32 %v2699_v49, %v2700_v62  ;;  %v2536_v5 = vsel %vm2528_vm10, %v4844_v28, -inf }
 0x2ea   : > { %v1344_v1 = vadd.f32 %v4674_v34, %v1309_v29  ;;  %v2284_v12 = vpop.f32.mrf.mxu1  ;;  %v4901_v47 = vpop.f32.mrf.mxu0  ;;  %v2645_v34 = vmax.f32 %v2643_v55, %v2644_v7  ;;  %v2534_v7 = vrot.slane %v2533_v18, 1  ;;  %v2591_v15 = vrot.slane %v2590_v8, 1 }
 0x2eb   : > { %v4904_v16 = vadd.f32 %v2284_v12, %v4846_v17  ;;  %v2755_v17 = vsel %vm2528_vm10, %v2428_v63, -inf  ;;  %v1797_v33 = vpop.permute.xlu1 %1796  ;;  %v1623_v29 = vpop.permute.xlu2 %1622  ;;  %v2813_v12 = vmax.f32 %v2811_v39, %v2812_v52  ;;  %v2702_v57 = vrot.slane %v2701_v54, 2 }
 0x2ec   : > { %3292 = vmatmul.msk.f32.gmra.mxu3 %vm1914_vm8, %v1899_v23  ;;  %v4899_v22 = vrot.slane %v1344_v1, 6  ;;  %v2646_v27 = vrot.slane %v2645_v34, 2  ;;  %v1900_v26 = vsel %vm1874_vm7, %v1867_v45, %v1797_v33  ;;  %v2756_v38 = vrot.slane %v2755_v17, 4 }
 0x2ed   : > { %3322 = vmatmul.msk.f32.gmra.mxu0 %vm1914_vm8, %v1899_v23  ;;  %3353 = vmatmul.msk.f32.gmra.mxu1 %vm1914_vm8, %v1899_v23  ;;  %v2869_v63 = vmax.f32 %v2867_v48, %v2868_v10  ;;  %v2396_v23 = vadd.f32 %v4805_v43, %v2361_v24  ;;  %v2814_v39 = vrot.slane %v2813_v12, 2 }
 0x2ee   : > { %v4911_v50 = vsel %vm288_vm0, %v1423_v46, %v4899_v22  ;;  %v1568_v13 = vrot.slane %v4899_v22, 1  ;;  %v2647_v4 = vmax.f32 %v2645_v34, %v2646_v27  ;;  %v1744_v60 = vrot.slane %v4899_v22, 2 }
 0x2ef   : > { %v2054_v59 = vpop.f32.mrf.mxu3  ;;  %v1742_v51 = vrot.slane %v4911_v50, 2  ;;  %v1566_v35 = vrot.slane %v4911_v50, 1  ;;  %v2757_v1 = vmax.f32 %v2755_v17, %v2756_v38  ;;  %v2399_v22 = vadd.f32 %v4805_v43, %v4904_v16 }
 0x2f0   : > { %v2168_v25 = vadd.f32 %v4849_v56, %v2054_v59  ;;  %v2648_v37 = vrot.slane %v2647_v4, 1  ;;  %v2432_v16 = vsel %vm1874_vm7, %v2396_v23, -inf  ;;  %v4986_v52 = vmax.f32 %v2813_v12, %v2814_v39 }
 0x2f1   : > { %v1743_v56 = vsel %vm578_vm2, %v1741_v40, %v1742_v51  ;;  %v1569_v9 = vsel %vm401_vm1, %v1566_v35, %v1568_v13  ;;  %v1567_v55 = vsel %vm401_vm1, %v1565_v36, %v1566_v35  ;;  %v1745_v2 = vsel %vm578_vm2, %v1742_v51, %v1744_v60 }
 0x2f2   : > { %v2287_v19 = vpop.f32.mrf.mxu1  ;;  %1806 = vrot.lane.b32.xlu2 %v1743_v56, %s3490_s13  ;;  %1632 = vrot.lane.b32.xlu0 %v1569_v9, %s3488_s11  ;;  %v4942_v0 = vpop.f32.mrf.mxu0  ;;  %v2758_v17 = vrot.slane %v2757_v1, 2  ;;  %v2537_v40 = vrot.slane %v2536_v5, 4  ;;  %v2651_v35 = vrot.slane %v2650_v42, 4  ;;  %v4967_v51 = vmax.f32 %v2701_v54, %v2702_v57 }
 0x2f3   : > { %v4926_v21 = vadd.f32 %v2287_v19, %v2165_v14  ;;  %1630 = vrot.lane.b32.xlu1 %v1567_v55, %s3488_s11  ;;  %v2398_v14 = vadd.f32 %v4805_v43, %v2363_v20  ;;  %v1799_v44 = vpop.permute.xlu0 %1798  ;;  %v1625_v36 = vpop.permute.xlu1 %1624  ;;  %v2435_v48 = vsel %vm1874_vm7, %v2399_v22, -inf  ;;  %v4974_v9 = vmax.f32 %v2647_v4, %v2648_v37  ;;  %s3101_s11 = sshll.u32 %s3097_s23, 4  ;;  %s3102_s11 = int_to_ptr.hbm [resolvable:$true] %s3101_s11 }
 0x2f4   : > { %3293 = vmatmul.msk.f32.gmra.mxu3 %vm1914_vm8, %v1900_v26  ;;  %v2538_v55 = vmax.f32 %v2536_v5, %v2537_v40  ;;  %v1869_v32 = vsel %vm788_vm5, %v4686_v61, %v1625_v36  ;;  %v4984_v38 = vmax.f32 %v2757_v1, %v2758_v17  ;;  %v2652_v54 = vmax.f32 %v2650_v42, %v2651_v35  ;;  %v1801_v4 = vpop.permute.xlu2 %1800  ;;  %s3437_s30 = sshra.s32 %s3102_s11, 4  ;;  %s3438_s30 = int_to_ptr.hbm [resolvable:$true] %s3437_s30 }
 0x2f5   : > { %3323 = vmatmul.msk.f32.gmra.mxu0 %vm1914_vm8, %v1900_v26  ;;  %3354 = vmatmul.msk.f32.gmra.mxu1 %vm1914_vm8, %v1900_v26  ;;  %v2433_v59 = vsel %vm1874_vm7, %v2398_v14, -inf  ;;  %v4982_v26 = vmax.f32 %v2533_v18, %v2534_v7  ;;  %v2400_v18 = vadd.f32 %v4805_v43, %v4926_v21  ;;  %v1902_v60 = vsel %vm1874_vm7, %v1869_v32, %v1801_v4  ;;  %p3444_p0 = scmp.lt.s32.totalorder %s3438_s30, %s5371_s5 }
 0x2f6   : > { %v2434_v62 = vmax.f32 %v2432_v16, %v2433_v59  ;;  %v2539_v7 = vrot.slane %v2538_v55, 2  ;;  %v2760_v36 = vrot.slane %v4984_v38, 1  ;;  %vm2937_vm0 = vcmask 1044484  }
 0x2f7   : > { %v2057_v11 = vpop.f32.mrf.mxu3  ;;  %vm2939_vm1 = vcmask 1045509   ;;  %vm2941_vm2 = vcmask 1046534  }
 0x2f8   : > { %v2171_v46 = vadd.f32 %v4869_v58, %v2057_v11  ;;  %v1868_v58 = vsel %vm788_vm5, %v4679_v6, %v1623_v29  ;;  %v2870_v6 = vrot.slane %v2869_v63, 2  ;;  %v2818_v11 = vsel %vm2585_vm11, %v2434_v62, -inf }
 0x2f9   : > { %v1901_v13 = vsel %vm1874_vm7, %v1868_v58, %v1799_v44  ;;  %v2706_v1 = vsel %vm2471_vm9, %v2434_v62, -inf  ;;  %v2653_v44 = vrot.slane %v2652_v54, 2  ;;  %v2762_v57 = vsel %vm2528_vm10, %v2434_v62, -inf }
 0x2fa   : > { %v2290_v34 = vpop.f32.mrf.mxu1  ;;  %v4980_v20 = vpop.f32.mrf.mxu0  ;;  %v4990_v24 = vmax.f32 %v2869_v63, %v2870_v6  ;;  %v2874_v5 = vsel %vm2642_vm12, %v2434_v62, -inf  ;;  %v2707_v22 = vrot.slane %v2706_v1, 4  ;;  %v2763_v6 = vrot.slane %v2762_v57, 4 }
 0x2fb   : > { %v2366_v49 = vadd.f32 %v2290_v34, %v2168_v25  ;;  %1808 = vrot.lane.b32.xlu1 %v1745_v2, %s3490_s13  ;;  %v2593_v25 = vsel %vm2585_vm11, %v4844_v28, -inf  ;;  %v4976_v28 = vmax.f32 %v2590_v8, %v2591_v15  ;;  %v2704_v8 = vrot.slane %v4967_v51, 1 }
 0x2fc   : > { %3294 = vmatmul.msk.f32.gmra.mxu3 %vm1914_vm8, %v1901_v13  ;;  %v2594_v27 = vrot.slane %v2593_v25, 4  ;;  %v2875_v16 = vrot.slane %v2874_v5, 4  ;;  %v2816_v62 = vrot.slane %v4986_v52, 1 }
 0x2fd   : > { %v2401_v33 = vadd.f32 %v4805_v43, %v2366_v49  ;;  %3324 = vmatmul.msk.f32.gmra.mxu0 %vm1914_vm8, %v1901_v13  ;;  %3355 = vmatmul.msk.f32.gmra.mxu1 %vm1914_vm8, %v1901_v13  ;;  %v2438_v49 = vsel %vm1874_vm7, %v2400_v18, -inf  ;;  %v2764_v18 = vmax.f32 %v2762_v57, %v2763_v6 }
 0x2fe   : > { %v2595_v15 = vmax.f32 %v2593_v25, %v2594_v27 }
 0x2ff   : > { %v2436_v31 = vsel %vm1874_vm7, %v2401_v33, -inf  ;;  %v2060_v45 = vpop.f32.mrf.mxu3 }
 0x300   : > { %v2437_v19 = vmax.f32 %v2435_v48, %v2436_v31  ;;  %v4972_v56 = vadd.f32 %v4901_v47, %v2060_v45  ;;  %v2596_v33 = vrot.slane %v2595_v15, 2  ;;  %v2654_v45 = vmax.f32 %v2652_v54, %v2653_v44 }
 0x302   : > { %v2486_v47 = vsel %vm2471_vm9, %v2437_v19, -inf  ;;  %v2293_v10 = vpop.f32.mrf.mxu1  ;;  %v2657_v29 = vsel %vm2642_vm12, %v2437_v19, -inf  ;;  %v2600_v63 = vsel %vm2585_vm11, %v2437_v19, -inf  ;;  %v1627_v21 = vpop.permute.xlu0 %1626  ;;  %v2543_v2 = vsel %vm2528_vm10, %v2437_v19, -inf }
 0x303   : > { %v2487_v61 = vrot.slane %v2486_v47, 4  ;;  %v2367_v14 = vadd.f32 %v2293_v10, %v2171_v46  ;;  %v2819_v46 = vrot.slane %v2818_v11, 4  ;;  %v2658_v42 = vrot.slane %v2657_v29, 4  ;;  %v1803_v40 = vpop.permute.xlu1 %1802 }
 0x304   : > { %3295 = vmatmul.msk.f32.gmra.mxu3 %vm1914_vm8, %v1902_v60  ;;  %v2601_v17 = vrot.slane %v2600_v63, 4  ;;  %v1870_v39 = vsel %vm788_vm5, %v4719_v30, %v1627_v21  ;;  %v2544_v19 = vrot.slane %v2543_v2, 4  ;;  %v2872_v30 = vrot.slane %v4990_v24, 1 }
 0x305   : > { %v2488_v12 = vmax.f32 %v2486_v47, %v2487_v61  ;;  %v2402_v23 = vadd.f32 %v4805_v43, %v2367_v14  ;;  %3325 = vmatmul.msk.f32.gmra.mxu0 %vm1914_vm8, %v1902_v60  ;;  %3356 = vmatmul.msk.f32.gmra.mxu1 %vm1914_vm8, %v1902_v60  ;;  %v2820_v48 = vmax.f32 %v2818_v11, %v2819_v46 }
 0x306   : > { %v2659_v31 = vmax.f32 %v2657_v29, %v2658_v42  ;;  %v1903_v32 = vsel %vm1874_vm7, %v1870_v39, %v1803_v40  ;;  %v5015_v47 = vmax.f32 %v2538_v55, %v2539_v7  ;;  %v2708_v10 = vmax.f32 %v2706_v1, %v2707_v22  ;;  %v1629_v1 = vpop.permute.xlu2 %1628 }
 0x307   : > { %v2489_v34 = vrot.slane %v2488_v12, 2  ;;  %v2063_v58 = vpop.f32.mrf.mxu3  ;;  %v2439_v37 = vsel %vm1874_vm7, %v2402_v23, -inf  ;;  %v2602_v4 = vmax.f32 %v2600_v63, %v2601_v17  ;;  %v2597_v61 = vmax.f32 %v2595_v15, %v2596_v33 }
 0x308   : > { %v2177_v59 = vadd.f32 %v4942_v0, %v2063_v58  ;;  %v2440_v25 = vmax.f32 %v2438_v49, %v2439_v37  ;;  %v2182_v0 = vpop.f32.mrf.mxu0  ;;  %v2876_v14 = vmax.f32 %v2874_v5, %v2875_v16  ;;  %v2821_v54 = vrot.slane %v2820_v48, 2 }
 0x309   : > { %v2490_v13 = vmax.f32 %v2488_v12, %v2489_v34  ;;  %v2660_v29 = vrot.slane %v2659_v31, 2  ;;  %v5021_v12 = vmax.f32 %v4986_v52, %v2816_v62  ;;  %v5024_v55 = vmax.f32 %v4984_v38, %v2760_v36 }
 0x30a   : > { %v2296_v35 = vpop.f32.mrf.mxu1  ;;  %v2655_v7 = vrot.slane %v2654_v45, 1  ;;  %v2545_v63 = vmax.f32 %v2543_v2, %v2544_v19  ;;  %v2709_v57 = vrot.slane %v2708_v10, 2  ;;  %v2603_v23 = vrot.slane %v2602_v4, 2 }
 0x30b   : > { %v2491_v27 = vrot.slane %v2490_v13, 1  ;;  %v2368_v11 = vadd.f32 %v2296_v35, %v4972_v56  ;;  %v1805_v56 = vpop.permute.xlu0 %1804  ;;  %v5030_v21 = vmax.f32 %v4967_v51, %v2704_v8  ;;  %v2541_v52 = vrot.slane %v5015_v47, 1 }
 0x30c   : > { %3296 = vmatmul.msk.f32.gmra.mxu3 %vm1914_vm8, %v1903_v32  ;;  %v2598_v46 = vrot.slane %v2597_v61, 1  ;;  %v2765_v38 = vrot.slane %v2764_v18, 2  ;;  %v2877_v5 = vrot.slane %v2876_v14, 2  ;;  %v2822_v42 = vmax.f32 %v2820_v48, %v2821_v54 }
 0x30d   : > { %3357 = vmatmul.msk.f32.gmra.mxu1 %vm1914_vm8, %v1903_v32  ;;  %v2492_v44 = vmax.f32 %v2490_v13, %v2491_v27  ;;  %v1871_v58 = vsel %vm788_vm5, %v4723_v41, %v1629_v1  ;;  %v2546_v49 = vrot.slane %v2545_v63, 2  ;;  %v2656_v13 = vmax.f32 %v2654_v45, %v2655_v7 }
 0x30e   : > { %v1904_v37 = vsel %vm1874_vm7, %v1871_v58, %v1805_v56  ;;  %v2710_v8 = vmax.f32 %v2708_v10, %v2709_v57  ;;  %v2604_v2 = vmax.f32 %v2602_v4, %v2603_v23  ;;  %v2713_v17 = vsel %vm2471_vm9, %v2440_v25, -inf }
 0x30f   : > { %v2066_v60 = vpop.f32.mrf.mxu3  ;;  %v5040_v51 = vsel %vm2933_vm14, %v2492_v44, %v4890_v3  ;;  %v2769_v39 = vsel %vm2528_vm10, %v2440_v25, -inf  ;;  %v2766_v41 = vmax.f32 %v2764_v18, %v2765_v38  ;;  %v2825_v33 = vsel %vm2585_vm11, %v2440_v25, -inf }
 0x310   : > { %v2180_v15 = vadd.f32 %v4980_v20, %v2066_v60  ;;  %v2661_v20 = vmax.f32 %v2659_v31, %v2660_v29  ;;  %v2185_v40 = vpop.f32.mrf.mxu0  ;;  %v2881_v6 = vsel %vm2642_vm12, %v2440_v25, -inf  ;;  %v2823_v16 = vrot.slane %v2822_v42, 1 }
 0x311   : > { %v2599_v36 = vmax.f32 %v2597_v61, %v2598_v46  ;;  %v5049_v62 = vmax.f32 %v4990_v24, %v2872_v30  ;;  %v2547_v48 = vmax.f32 %v2545_v63, %v2546_v49  ;;  %v2714_v31 = vrot.slane %v2713_v17, 4 }
 0x312   : > { %v2299_v34 = vpop.f32.mrf.mxu1  ;;  %v2662_v3 = vrot.slane %v2661_v20, 1  ;;  %v2770_v45 = vrot.slane %v2769_v39, 4  ;;  %v2605_v19 = vrot.slane %v2604_v2, 1  ;;  %v2826_v32 = vrot.slane %v2825_v33, 4 }
 0x313   : > { %v5035_v22 = vadd.f32 %v2299_v34, %v2177_v59  ;;  %v2878_v59 = vmax.f32 %v2876_v14, %v2877_v5  ;;  %v2882_v10 = vrot.slane %v2881_v6, 4  ;;  %v2990_v4 = vsel %vm2931_vm13, %v2656_v13, %v4974_v9 }
 0x314   : > { %3297 = vmatmul.msk.f32.gmra.mxu3 %vm1914_vm8, %v1904_v37  ;;  %v2711_v25 = vrot.slane %v2710_v8, 1  ;;  %v2767_v18 = vrot.slane %v2766_v41, 1  ;;  %v2542_v29 = vmax.f32 %v5015_v47, %v2541_v52  ;;  %v2403_v61 = vadd.f32 %v4805_v43, %v2368_v11 }
 0x315   : > { %3358 = vmatmul.msk.f32.gmra.mxu1 %vm1914_vm8, %v1904_v37  ;;  %v2879_v14 = vrot.slane %v2878_v59, 1  ;;  %v2663_v30 = vmax.f32 %v2661_v20, %v2662_v3  ;;  %v2824_v60 = vmax.f32 %v2822_v42, %v2823_v16  ;;  %v2548_v7 = vrot.slane %v2547_v48, 1 }
 0x316   : > { %v2715_v1 = vmax.f32 %v2713_v17, %v2714_v31  ;;  %v2972_v44 = vsel %vm2931_vm13, %v2599_v36, %v4976_v28  ;;  %v2827_v63 = vmax.f32 %v2825_v33, %v2826_v32  ;;  %v2883_v57 = vmax.f32 %v2881_v6, %v2882_v10 }
 0x317   : > { %v2069_v35 = vpop.f32.mrf.mxu3  ;;  %v2606_v23 = vmax.f32 %v2604_v2, %v2605_v19  ;;  %v2954_v56 = vsel %vm2931_vm13, %v2542_v29, %v4982_v26  ;;  %v5060_v47 = vmax.f32 %v2766_v41, %v2767_v18  ;;  %v5062_v11 = vmax.f32 %v2710_v8, %v2711_v25 }
 0x318   : > { %v2183_v27 = vadd.f32 %v2182_v0, %v2069_v35  ;;  %v2771_v0 = vmax.f32 %v2769_v39, %v2770_v45  ;;  %v2441_v52 = vsel %vm1874_vm7, %v2403_v61, -inf  ;;  %v2188_v46 = vpop.f32.mrf.mxu0  ;;  %v5069_v5 = vsel %vm2933_vm14, %v2663_v30, %v2990_v4 }
 0x319   : > { %v5073_v34 = vsel %vm2931_vm13, %v2824_v60, %v5021_v12  ;;  %v2716_v26 = vrot.slane %v2715_v1, 2  ;;  %v2828_v49 = vrot.slane %v2827_v63, 2  ;;  %v2884_v37 = vrot.slane %v2883_v57, 2 }
 0x31a   : > { %v2302_v54 = vpop.f32.mrf.mxu1  ;;  %v2772_v42 = vrot.slane %v2771_v0, 2  ;;  %v5076_v13 = vsel %vm2933_vm14, %v2606_v23, %v2972_v44  ;;  %v2549_v8 = vmax.f32 %v2547_v48, %v2548_v7  ;;  %v2404_v35 = vadd.f32 %v4805_v43, %v5035_v22 }
 0x31b   : > { %v2370_v24 = vadd.f32 %v2302_v54, %v2180_v15  ;;  %v5064_v15 = vmax.f32 %v2878_v59, %v2879_v14  ;;  %v2829_v32 = vmax.f32 %v2827_v63, %v2828_v49  ;;  %v5086_v10 = vmax.f32 %v2883_v57, %v2884_v37 }
 0x31c   : > { %v2773_v3 = vmax.f32 %v2771_v0, %v2772_v42  ;;  %v2444_v60 = vsel %vm1874_vm7, %v2404_v35, -inf }
 0x31d   : > { %v2405_v9 = vadd.f32 %v4805_v43, %v2370_v24  ;;  %v2955_v24 = vsel %vm2933_vm14, %v2549_v8, %v2954_v56  ;;  %v2830_v44 = vrot.slane %v2829_v32, 1 }
 0x31e   : > { %v2774_v30 = vrot.slane %v2773_v3, 1 }
 0x31f   : > { %v2442_v38 = vsel %vm1874_vm7, %v2405_v9, -inf  ;;  %v2072_v28 = vpop.f32.mrf.mxu3 }
 0x320   : > { %v2443_v58 = vmax.f32 %v2441_v52, %v2442_v38  ;;  %v2186_v20 = vadd.f32 %v2185_v40, %v2072_v28  ;;  %v5082_v40 = vmax.f32 %v2715_v1, %v2716_v26  ;;  %v2191_v7 = vpop.f32.mrf.mxu0  ;;  %v2886_v52 = vrot.slane %v5086_v10, 1 }
 0x322   : > { %v2493_v2 = vsel %vm2471_vm9, %v2443_v58, -inf  ;;  %v2550_v17 = vsel %vm2528_vm10, %v2443_v58, -inf  ;;  %v2607_v39 = vsel %vm2585_vm11, %v2443_v58, -inf  ;;  %v2664_v41 = vsel %vm2642_vm12, %v2443_v58, -inf  ;;  %v2305_v12 = vpop.f32.mrf.mxu1 }
 0x323   : > { %v2494_v59 = vrot.slane %v2493_v2, 4  ;;  %v2551_v33 = vrot.slane %v2550_v17, 4  ;;  %v2608_v6 = vrot.slane %v2607_v39, 4  ;;  %v2665_v16 = vrot.slane %v2664_v41, 4 }
 0x324   : > { %v2371_v36 = vadd.f32 %v2305_v12, %v2183_v27  ;;  %v2718_v61 = vrot.slane %v5082_v40, 1 }
 0x325   : > { %v2495_v48 = vmax.f32 %v2493_v2, %v2494_v59  ;;  %v2552_v31 = vmax.f32 %v2550_v17, %v2551_v33  ;;  %v2609_v45 = vmax.f32 %v2607_v39, %v2608_v6  ;;  %v2666_v19 = vmax.f32 %v2664_v41, %v2665_v16 }
 0x326   : > { %v2406_v4 = vadd.f32 %v4805_v43, %v2371_v36 }
 0x327   : > { %v2496_v25 = vrot.slane %v2495_v48, 2  ;;  %v2553_v18 = vrot.slane %v2552_v31, 2  ;;  %v2610_v14 = vrot.slane %v2609_v45, 2  ;;  %v2667_v54 = vrot.slane %v2666_v19, 2  ;;  %v2075_v29 = vpop.f32.mrf.mxu3 }
 0x328   : > { %v2445_v22 = vsel %vm1874_vm7, %v2406_v4, -inf  ;;  %v2189_v27 = vadd.f32 %v2188_v46, %v2075_v29  ;;  %v2719_v29 = vmax.f32 %v5082_v40, %v2718_v61 }
 0x329   : > { %v2611_v1 = vmax.f32 %v2609_v45, %v2610_v14  ;;  %v2668_v0 = vmax.f32 %v2666_v19, %v2667_v54  ;;  %v2497_v63 = vmax.f32 %v2495_v48, %v2496_v25  ;;  %v2554_v57 = vmax.f32 %v2552_v31, %v2553_v18 }
 0x32a   : > { %v2446_v9 = vmax.f32 %v2444_v60, %v2445_v22  ;;  %v2308_v23 = vpop.f32.mrf.mxu1  ;;  %v2831_v31 = vmax.f32 %v2829_v32, %v2830_v44  ;;  %v2775_v54 = vmax.f32 %v2773_v3, %v2774_v30  ;;  %v2194_v60 = vpop.f32.mrf.mxu0  ;;  %v2887_v32 = vmax.f32 %v5086_v10, %v2886_v52 }
 0x32b   : > { %v5094_v38 = vadd.f32 %v2308_v23, %v2186_v20  ;;  %v2669_v28 = vrot.slane %v2668_v0, 1  ;;  %v2612_v26 = vrot.slane %v2611_v1, 1  ;;  %v2498_v17 = vrot.slane %v2497_v63, 1 }
 0x32c   : > { %v2720_v46 = vsel %vm2471_vm9, %v2446_v9, -inf  ;;  %v2776_v56 = vsel %vm2528_vm10, %v2446_v9, -inf  ;;  %v2832_v42 = vsel %vm2585_vm11, %v2446_v9, -inf  ;;  %v2888_v58 = vsel %vm2642_vm12, %v2446_v9, -inf }
 0x32d   : > { %v2721_v49 = vrot.slane %v2720_v46, 4  ;;  %v2777_v37 = vrot.slane %v2776_v56, 4  ;;  %v2833_v8 = vrot.slane %v2832_v42, 4  ;;  %v2889_v2 = vrot.slane %v2888_v58, 4 }
 0x32e   : > { %v2670_v39 = vmax.f32 %v2668_v0, %v2669_v28  ;;  %v2613_v41 = vmax.f32 %v2611_v1, %v2612_v26  ;;  %v2555_v12 = vrot.slane %v2554_v57, 1  ;;  %v2499_v22 = vmax.f32 %v2497_v63, %v2498_v17 }
 0x32f   : > { %v2722_v20 = vmax.f32 %v2720_v46, %v2721_v49  ;;  %v2778_v59 = vmax.f32 %v2776_v56, %v2777_v37  ;;  %v2834_v33 = vmax.f32 %v2832_v42, %v2833_v8  ;;  %v2890_v6 = vmax.f32 %v2888_v58, %v2889_v2  ;;  %v2078_v16 = vpop.f32.mrf.mxu3 }
 0x330   : > { %v2192_v35 = vadd.f32 %v2191_v7, %v2078_v16  ;;  %v5102_v36 = vsel %vm2935_vm15, %v2670_v39, %v5069_v5  ;;  %v5106_v48 = vsel %vm2935_vm15, %v2613_v41, %v5076_v13  ;;  %v2556_v14 = vmax.f32 %v2554_v57, %v2555_v12 }
 0x331   : > { %v2723_v45 = vrot.slane %v2722_v20, 2  ;;  %v2779_v19 = vrot.slane %v2778_v59, 2  ;;  %v2835_v4 = vrot.slane %v2834_v33, 2  ;;  %v2891_v25 = vrot.slane %v2890_v6, 2 }
 0x332   : > { %v2311_v18 = vpop.f32.mrf.mxu1  ;;  %v5110_v13 = vsel %vm2935_vm15, %v2556_v14, %v2955_v24  ;;  %v5115_v44 = vsel %vm2935_vm15, %v2499_v22, %v5040_v51  ;;  %v3045_v61 = vsel %vm2933_vm14, %v2831_v31, %v5073_v34  ;;  %v3008_v24 = vsel %vm2931_vm13, %v5062_v11, %v5030_v21  ;;  %v2197_v58 = vpop.f32.mrf.mxu0 }
 0x333   : > { %v2724_v7 = vmax.f32 %v2722_v20, %v2723_v45  ;;  %v2780_v1 = vmax.f32 %v2778_v59, %v2779_v19  ;;  %v2836_v5 = vmax.f32 %v2834_v33, %v2835_v4  ;;  %v2892_v0 = vmax.f32 %v2890_v6, %v2891_v25 }
 0x334   : > { %v2373_v9 = vadd.f32 %v2311_v18, %v2189_v27  ;;  %v3026_v27 = vsel %vm2931_vm13, %v5060_v47, %v5024_v55  ;;  %v3062_v51 = vsel %vm2931_vm13, %v5064_v15, %v5049_v62  ;;  %v3009_v46 = vsel %vm2933_vm14, %v2719_v29, %v3008_v24 }
 0x335   : > { %v2837_v57 = vrot.slane %v2836_v5, 1  ;;  %v2781_v3 = vrot.slane %v2780_v1, 1  ;;  %v2725_v30 = vrot.slane %v2724_v7, 1  ;;  %v2893_v40 = vrot.slane %v2892_v0, 1 }
 0x336   : > { %v3027_v34 = vsel %vm2933_vm14, %v2775_v54, %v3026_v27  ;;  %v3063_v55 = vsel %vm2933_vm14, %v2887_v32, %v3062_v51  ;;  %v2407_v56 = vadd.f32 %v4805_v43, %v5094_v38  ;;  %v2408_v31 = vadd.f32 %v4805_v43, %v2373_v9 }
 0x337   : > { %v2081_v10 = vpop.f32.mrf.mxu3  ;;  %v2838_v63 = vmax.f32 %v2836_v5, %v2837_v57  ;;  %v2782_v23 = vmax.f32 %v2780_v1, %v2781_v3  ;;  %v2726_v52 = vmax.f32 %v2724_v7, %v2725_v30  ;;  %v2894_v28 = vmax.f32 %v2892_v0, %v2893_v40 }
 0x338   : > { %v2195_v26 = vadd.f32 %v2194_v60, %v2081_v10  ;;  %v2447_v37 = vsel %vm1874_vm7, %v2407_v56, -inf  ;;  %v2450_v1 = vsel %vm1874_vm7, %v2408_v31, -inf }
 0x339   : > { %v5132_v47 = vsel %vm2935_vm15, %v2838_v63, %v3045_v61  ;;  %v5135_v21 = vsel %vm2935_vm15, %v2782_v23, %v3027_v34  ;;  %v5138_v62 = vsel %vm2935_vm15, %v2726_v52, %v3009_v46  ;;  %v5141_v11 = vsel %vm2935_vm15, %v2894_v28, %v3063_v55 }
 0x33a   : > { %v2314_v15 = vpop.f32.mrf.mxu1  ;;  %v2200_v54 = vpop.f32.mrf.mxu0 }
 0x33b   : > { %v2374_v42 = vadd.f32 %v2314_v15, %v2192_v35 }
 0x33d   : > { %v2409_v49 = vadd.f32 %v4805_v43, %v2374_v42 }
 0x33f   : > { %v2448_v8 = vsel %vm1874_vm7, %v2409_v49, -inf  ;;  %v2084_v2 = vpop.f32.mrf.mxu3 }
 0x340   : > { %v2449_v17 = vmax.f32 %v2447_v37, %v2448_v8  ;;  %v2198_v39 = vadd.f32 %v2197_v58, %v2084_v2 }
 0x342   : > { %v2500_v41 = vsel %vm2471_vm9, %v2449_v17, -inf  ;;  %v2557_v12 = vsel %vm2528_vm10, %v2449_v17, -inf  ;;  %v2614_v20 = vsel %vm2585_vm11, %v2449_v17, -inf  ;;  %v2671_v59 = vsel %vm2642_vm12, %v2449_v17, -inf  ;;  %v2317_v38 = vpop.f32.mrf.mxu1 }
 0x343   : > { %v2501_v33 = vrot.slane %v2500_v41, 4  ;;  %v2558_v6 = vrot.slane %v2557_v12, 4  ;;  %v2615_v16 = vrot.slane %v2614_v20, 4  ;;  %v2672_v35 = vrot.slane %v2671_v59, 4 }
 0x344   : > { %v2375_v45 = vadd.f32 %v2317_v38, %v2195_v26 }
 0x345   : > { %v2559_v19 = vmax.f32 %v2557_v12, %v2558_v6  ;;  %v2616_v4 = vmax.f32 %v2614_v20, %v2615_v16  ;;  %v2673_v25 = vmax.f32 %v2671_v59, %v2672_v35  ;;  %v2502_v18 = vmax.f32 %v2500_v41, %v2501_v33  ;;  %v2203_v20 = vpop.f32.mrf.mxu0 }
 0x346   : > { %v2410_v14 = vadd.f32 %v4805_v43, %v2375_v45 }
 0x347   : > { %v2560_v29 = vrot.slane %v2559_v19, 2  ;;  %v2617_v22 = vrot.slane %v2616_v4, 2  ;;  %v2674_v60 = vrot.slane %v2673_v25, 2  ;;  %v2087_v7 = vpop.f32.mrf.mxu3  ;;  %v2503_v3 = vrot.slane %v2502_v18, 2 }
 0x348   : > { %v2451_v5 = vsel %vm1874_vm7, %v2410_v14, -inf  ;;  %v2201_v0 = vadd.f32 %v2200_v54, %v2087_v7 }
 0x349   : > { %v2452_v32 = vmax.f32 %v2450_v1, %v2451_v5  ;;  %v2675_v57 = vmax.f32 %v2673_v25, %v2674_v60  ;;  %v2618_v9 = vmax.f32 %v2616_v4, %v2617_v22  ;;  %v2561_v30 = vmax.f32 %v2559_v19, %v2560_v29 }
 0x34a   : > { %v2320_v24 = vpop.f32.mrf.mxu1  ;;  %v2504_v42 = vmax.f32 %v2502_v18, %v2503_v3 }
 0x34b   : > { %v2727_v40 = vsel %vm2471_vm9, %v2452_v32, -inf  ;;  %v2783_v43 = vsel %vm2528_vm10, %v2452_v32, -inf  ;;  %v2839_v61 = vsel %vm2585_vm11, %v2452_v32, -inf  ;;  %v2895_v27 = vsel %vm2642_vm12, %v2452_v32, -inf }
 0x34c   : > { %v2728_v51 = vrot.slane %v2727_v40, 4  ;;  %v2784_v10 = vrot.slane %v2783_v43, 4  ;;  %v2840_v63 = vrot.slane %v2839_v61, 4  ;;  %v2896_v23 = vrot.slane %v2895_v27, 4 }
 0x34d   : > { %v2376_v52 = vadd.f32 %v2320_v24, %v2198_v39  ;;  %v2676_v28 = vrot.slane %v2675_v57, 1  ;;  %v2619_v26 = vrot.slane %v2618_v9, 1  ;;  %v2562_v34 = vrot.slane %v2561_v30, 1 }
 0x34e   : > { %v2729_v46 = vmax.f32 %v2727_v40, %v2728_v51  ;;  %v2785_v55 = vmax.f32 %v2783_v43, %v2784_v10  ;;  %v2841_v15 = vmax.f32 %v2839_v61, %v2840_v63  ;;  %v2897_v56 = vmax.f32 %v2895_v27, %v2896_v23 }
 0x34f   : > { %v2090_v58 = vpop.f32.mrf.mxu3  ;;  %v2677_v49 = vmax.f32 %v2675_v57, %v2676_v28  ;;  %v2620_v37 = vmax.f32 %v2618_v9, %v2619_v26  ;;  %v2563_v8 = vmax.f32 %v2561_v30, %v2562_v34  ;;  %v2505_v45 = vrot.slane %v2504_v42, 1 }
 0x350   : > { %v2730_v2 = vrot.slane %v2729_v46, 2  ;;  %v2786_v17 = vrot.slane %v2785_v55, 2  ;;  %v2842_v41 = vrot.slane %v2841_v15, 2  ;;  %v2898_v12 = vrot.slane %v2897_v56, 2 }
 0x351   : > { %v5162_v39 = vsel %vm2937_vm0, %v2677_v49, %v5102_v36  ;;  %v5166_v59 = vsel %vm2937_vm0, %v2620_v37, %v5106_v48  ;;  %v5170_v38 = vsel %vm2937_vm0, %v2563_v8, %v5110_v13  ;;  %v2506_v14 = vmax.f32 %v2504_v42, %v2505_v45  ;;  %v1807_v37 = vpop.permute.xlu2 %1806 }
 0x352   : > { %v2843_v33 = vmax.f32 %v2841_v15, %v2842_v41  ;;  %v2787_v6 = vmax.f32 %v2785_v55, %v2786_v17  ;;  %v2323_v16 = vpop.f32.mrf.mxu1  ;;  %v2731_v35 = vmax.f32 %v2729_v46, %v2730_v2  ;;  %v2899_v31 = vmax.f32 %v2897_v56, %v2898_v12 }
 0x353   : > { %v2377_v19 = vadd.f32 %v2323_v16, %v2201_v0  ;;  %v5174_v13 = vsel %vm2937_vm0, %v2506_v14, %v5115_v44  ;;  %v2204_v32 = vadd.f32 %v2203_v20, %v2090_v58  ;;  %v2206_v44 = vpop.f32.mrf.mxu0 }
 0x354   : > { %v2844_v4 = vrot.slane %v2843_v33, 1  ;;  %v2788_v25 = vrot.slane %v2787_v6, 1  ;;  %v2732_v18 = vrot.slane %v2731_v35, 1  ;;  %v2900_v36 = vrot.slane %v2899_v31, 1 }
 0x356   : > { %v2845_v54 = vmax.f32 %v2843_v33, %v2844_v4  ;;  %v2789_v29 = vmax.f32 %v2787_v6, %v2788_v25  ;;  %v2733_v48 = vmax.f32 %v2731_v35, %v2732_v18  ;;  %v2901_v22 = vmax.f32 %v2899_v31, %v2900_v36 }
 0x357   : > { %v2093_v1 = vpop.f32.mrf.mxu3 }
 0x358   : > { %v5178_v60 = vsel %vm2937_vm0, %v2845_v54, %v5132_v47  ;;  %v5182_v7 = vsel %vm2937_vm0, %v2789_v29, %v5135_v21  ;;  %v5186_v5 = vsel %vm2937_vm0, %v2733_v48, %v5138_v62  ;;  %v5190_v0 = vsel %vm2937_vm0, %v2901_v22, %v5141_v11  ;;  %v5195_v47 = vld [vmem:[%s5370_s4] ss:$0 sm:$0xff] }
 0x359   : > { %v2411_v21 = vadd.f32 %v5195_v47, %v2376_v52  ;;  %v2412_v11 = vadd.f32 %v5195_v47, %v2377_v19  ;;  %v2207_v43 = vadd.f32 %v2206_v44, %v2093_v1 }
 0x35a   : > { %v2326_v57 = vpop.f32.mrf.mxu1 }
 0x35b   : > { %v2378_v9 = vadd.f32 %v2326_v57, %v2204_v32  ;;  %v2453_v62 = vsel %vm1874_vm7, %v2411_v21, -inf  ;;  %v5208_v34 = vpop.f32.mrf.mxu0  ;;  %v2456_v8 = vsel %vm1874_vm7, %v2412_v11, -inf }
 0x35d   : > { %v2413_v3 = vadd.f32 %v5195_v47, %v2378_v9 }
 0x35f   : > { %v2454_v30 = vsel %vm1874_vm7, %v2413_v3, -inf  ;;  %v5206_v10 = vpop.f32.mrf.mxu3 }
 0x360   : > { %v2455_v40 = vmax.f32 %v2453_v62, %v2454_v30 }
 0x362   : > { %v2507_v61 = vsel %vm2471_vm9, %v2455_v40, -inf  ;;  %v2564_v27 = vsel %vm2528_vm10, %v2455_v40, -inf  ;;  %v2621_v24 = vsel %vm2585_vm11, %v2455_v40, -inf  ;;  %v2678_v51 = vsel %vm2642_vm12, %v2455_v40, -inf  ;;  %v2329_v63 = vpop.f32.mrf.mxu1 }
 0x363   : > { %v2508_v23 = vrot.slane %v2507_v61, 4  ;;  %v2565_v52 = vrot.slane %v2564_v27, 4  ;;  %v2622_v28 = vrot.slane %v2621_v24, 4  ;;  %v2679_v26 = vrot.slane %v2678_v51, 4  ;;  %v5223_v57 = vpop.f32.mrf.mxu0 }
 0x364   : > { %v2379_v46 = vadd.f32 %v2329_v63, %v2207_v43  ;;  %v1633_v36 = vpop.permute.xlu0 %1632 }
 0x365   : > { %v2566_v55 = vmax.f32 %v2564_v27, %v2565_v52  ;;  %v2623_v15 = vmax.f32 %v2621_v24, %v2622_v28  ;;  %v2680_v56 = vmax.f32 %v2678_v51, %v2679_v26  ;;  %v2509_v42 = vmax.f32 %v2507_v61, %v2508_v23  ;;  %v1631_v49 = vpop.permute.xlu1 %1630 }
 0x366   : > { %v2414_v58 = vadd.f32 %v5195_v47, %v2379_v46  ;;  %v1872_v2 = vsel %vm788_vm5, %v4897_v53, %v1631_v49  ;;  %v1873_v62 = vsel %vm788_vm5, %v4911_v50, %v1633_v36  ;;  %vm3075_vm5 = vcmask 392192  }
 0x367   : > { %v2681_v17 = vrot.slane %v2680_v56, 2  ;;  %v1905_v12 = vsel %vm1874_vm7, %v1872_v2, %v1807_v37  ;;  %v2624_v20 = vrot.slane %v2623_v15, 2  ;;  %v2567_v33 = vrot.slane %v2566_v55, 2  ;;  %v5221_v22 = vpop.f32.mrf.mxu3 }
 0x368   : > { %v2457_v41 = vsel %vm1874_vm7, %v2414_v58, -inf  ;;  %3359 = vmatmul.msk.f32.gmra.mxu1 %vm1914_vm8, %v1905_v12  ;;  %v2510_v35 = vrot.slane %v2509_v42, 2 }
 0x369   : > { %v2458_v6 = vmax.f32 %v2456_v8, %v2457_v41  ;;  %v2682_v16 = vmax.f32 %v2680_v56, %v2681_v17  ;;  %v2625_v45 = vmax.f32 %v2623_v15, %v2624_v20  ;;  %v2568_v19 = vmax.f32 %v2566_v55, %v2567_v33 }
 0x36a   : > { %v2332_v31 = vpop.f32.mrf.mxu1  ;;  %v2511_v61 = vmax.f32 %v2509_v42, %v2510_v35 }
 0x36b   : > { %v2734_v4 = vsel %vm2471_vm9, %v2458_v6, -inf  ;;  %v2790_v25 = vsel %vm2528_vm10, %v2458_v6, -inf  ;;  %v2846_v53 = vsel %vm2585_vm11, %v2458_v6, -inf  ;;  %v2902_v18 = vsel %vm2642_vm12, %v2458_v6, -inf  ;;  %v2215_v6 = vpop.f32.mrf.mxu0 }
 0x36c   : > { %v2735_v14 = vrot.slane %v2734_v4, 4  ;;  %v2791_v54 = vrot.slane %v2790_v25, 4  ;;  %v2847_v29 = vrot.slane %v2846_v53, 4  ;;  %v2903_v48 = vrot.slane %v2902_v18, 4 }
 0x36d   : > { %v2683_v1 = vrot.slane %v2682_v16, 1  ;;  %v2626_v32 = vrot.slane %v2625_v45, 1  ;;  %v2569_v44 = vrot.slane %v2568_v19, 1  ;;  %v1809_v30 = vpop.permute.xlu1 %1808  ;;  %v2512_v42 = vrot.slane %v2511_v61, 1 }
 0x36e   : > { %v2736_v21 = vmax.f32 %v2734_v4, %v2735_v14  ;;  %v2792_v9 = vmax.f32 %v2790_v25, %v2791_v54  ;;  %v2848_v3 = vmax.f32 %v2846_v53, %v2847_v29  ;;  %v2904_v40 = vmax.f32 %v2902_v18, %v2903_v48 }
 0x36f   : > { %v1906_v11 = vsel %vm1874_vm7, %v1873_v62, %v1809_v30  ;;  %v2684_v43 = vmax.f32 %v2682_v16, %v2683_v1  ;;  %v2627_v27 = vmax.f32 %v2625_v45, %v2626_v32  ;;  %v2570_v24 = vmax.f32 %v2568_v19, %v2569_v44  ;;  %v2102_v17 = vpop.f32.mrf.mxu3 }
 0x370   : > { %v2849_v51 = vrot.slane %v2848_v3, 2  ;;  %v2793_v63 = vrot.slane %v2792_v9, 2  ;;  %3360 = vmatmul.msk.f32.gmra.mxu1 %vm1914_vm8, %v1906_v11  ;;  %v2737_v52 = vrot.slane %v2736_v21, 2  ;;  %v2905_v56 = vrot.slane %v2904_v40, 2 }
 0x371   : > { %v5231_v23 = vsel %vm2939_vm1, %v2684_v43, %v5162_v39  ;;  %v5235_v50 = vsel %vm2939_vm1, %v2627_v27, %v5166_v59  ;;  %v5239_v26 = vsel %vm2939_vm1, %v2570_v24, %v5170_v38  ;;  %v2210_v39 = vadd.f32 %v5208_v34, %v5206_v10 }
 0x372   : > { %v2335_v28 = vpop.f32.mrf.mxu1  ;;  %v2850_v46 = vmax.f32 %v2848_v3, %v2849_v51  ;;  %v2794_v55 = vmax.f32 %v2792_v9, %v2793_v63  ;;  %v2738_v15 = vmax.f32 %v2736_v21, %v2737_v52  ;;  %v2906_v8 = vmax.f32 %v2904_v40, %v2905_v56 }
 0x373   : > { %v2513_v2 = vmax.f32 %v2511_v61, %v2512_v42  ;;  %v2380_v12 = vadd.f32 %v2332_v31, %v2210_v39  ;;  %v2216_v34 = vadd.f32 %v2215_v6, %v2102_v17  ;;  %v2218_v32 = vpop.f32.mrf.mxu0  ;;  %v2213_v62 = vadd.f32 %v5223_v57, %v5221_v22 }
 0x374   : > { %v2851_v58 = vrot.slane %v2850_v46, 1  ;;  %v2795_v49 = vrot.slane %v2794_v55, 1  ;;  %v2739_v37 = vrot.slane %v2738_v15, 1  ;;  %v2907_v38 = vrot.slane %v2906_v8, 1 }
 0x375   : > { %v2940_v33 = vsel %vm2939_vm1, %v2513_v2, %v5174_v13  ;;  %v2415_v19 = vadd.f32 %v5195_v47, %v2380_v12  ;;  %v2381_v11 = vadd.f32 %v2335_v28, %v2213_v62  ;;  %vm3079_vm8 = vcmask 654336  }
 0x376   : > { %v2852_v59 = vmax.f32 %v2850_v46, %v2851_v58  ;;  %v2796_v41 = vmax.f32 %v2794_v55, %v2795_v49  ;;  %v2740_v20 = vmax.f32 %v2738_v15, %v2739_v37  ;;  %v2908_v31 = vmax.f32 %v2906_v8, %v2907_v38 }
 0x377   : > { %v2459_v25 = vsel %vm1874_vm7, %v2415_v19, -inf  ;;  %v2416_v52 = vadd.f32 %v5195_v47, %v2381_v11 }
 0x378   : > { %v5247_v16 = vsel %vm2939_vm1, %v2852_v59, %v5178_v60  ;;  %v5251_v10 = vsel %vm2939_vm1, %v2796_v41, %v5182_v7  ;;  %v5255_v35 = vsel %vm2939_vm1, %v2740_v20, %v5186_v5  ;;  %v5260_v13 = vsel %vm2939_vm1, %v2908_v31, %v5190_v0  ;;  %v2105_v0 = vpop.f32.mrf.mxu3 }
 0x379   : > { %v2219_v9 = vadd.f32 %v2218_v32, %v2105_v0  ;;  %v2462_v28 = vsel %vm1874_vm7, %v2416_v52, -inf }
 0x37a   : > { %v2338_v45 = vpop.f32.mrf.mxu1 }
 0x37b   : > { %v2382_v4 = vadd.f32 %v2338_v45, %v2216_v34  ;;  %v2221_v3 = vpop.f32.mrf.mxu0 }
 0x37d   : > { %v2417_v60 = vadd.f32 %v5195_v47, %v2382_v4 }
 0x37f   : > { %v2460_v7 = vsel %vm1874_vm7, %v2417_v60, -inf }
 0x380   : > { %v2461_v53 = vmax.f32 %v2459_v25, %v2460_v7  ;;  %v2108_v21 = vpop.f32.mrf.mxu3 }
 0x381   : > { %v2222_v12 = vadd.f32 %v2221_v3, %v2108_v21 }
 0x382   : > { %v2514_v18 = vsel %vm2471_vm9, %v2461_v53, -inf  ;;  %v2341_v44 = vpop.f32.mrf.mxu1  ;;  %v2685_v40 = vsel %vm2642_vm12, %v2461_v53, -inf  ;;  %v2628_v43 = vsel %vm2585_vm11, %v2461_v53, -inf  ;;  %v2571_v63 = vsel %vm2528_vm10, %v2461_v53, -inf }
 0x383   : > { %v2515_v5 = vrot.slane %v2514_v18, 4  ;;  %v2383_v30 = vadd.f32 %v2341_v44, %v2219_v9  ;;  %v2686_v27 = vrot.slane %v2685_v40, 4  ;;  %v2629_v51 = vrot.slane %v2628_v43, 4  ;;  %v2224_v57 = vpop.f32.mrf.mxu0 }
 0x384   : > { %v2572_v22 = vrot.slane %v2571_v63, 4 }
 0x385   : > { %v2516_v36 = vmax.f32 %v2514_v18, %v2515_v5  ;;  %v2418_v61 = vadd.f32 %v5195_v47, %v2383_v30  ;;  %v2687_v15 = vmax.f32 %v2685_v40, %v2686_v27  ;;  %v2630_v56 = vmax.f32 %v2628_v43, %v2629_v51 }
 0x386   : > { %v2573_v49 = vmax.f32 %v2571_v63, %v2572_v22 }
 0x387   : > { %v2517_v14 = vrot.slane %v2516_v36, 2  ;;  %v2463_v55 = vsel %vm1874_vm7, %v2418_v61, -inf  ;;  %v2688_v58 = vrot.slane %v2687_v15, 2  ;;  %v2631_v39 = vrot.slane %v2630_v56, 2 }
 0x388   : > { %v2111_v46 = vpop.f32.mrf.mxu3  ;;  %v2464_v42 = vmax.f32 %v2462_v28, %v2463_v55  ;;  %v2574_v17 = vrot.slane %v2573_v49, 2 }
 0x389   : > { %v2518_v54 = vmax.f32 %v2516_v36, %v2517_v14  ;;  %v2689_v2 = vmax.f32 %v2687_v15, %v2688_v58  ;;  %v2632_v41 = vmax.f32 %v2630_v56, %v2631_v39  ;;  %v2225_v53 = vadd.f32 %v2224_v57, %v2111_v46 }
 0x38a   : > { %v2344_v24 = vpop.f32.mrf.mxu1  ;;  %v2853_v8 = vsel %vm2585_vm11, %v2464_v42, -inf  ;;  %v2797_v38 = vsel %vm2528_vm10, %v2464_v42, -inf  ;;  %v2575_v45 = vmax.f32 %v2573_v49, %v2574_v17  ;;  %v2909_v5 = vsel %vm2642_vm12, %v2464_v42, -inf }
 0x38b   : > { %v2519_v29 = vrot.slane %v2518_v54, 1  ;;  %v2854_v20 = vrot.slane %v2853_v8, 4  ;;  %v2227_v6 = vpop.f32.mrf.mxu0  ;;  %v2384_v34 = vadd.f32 %v2344_v24, %v2222_v12  ;;  %v2690_v31 = vrot.slane %v2689_v2, 1 }
 0x38c   : > { %v2633_v19 = vrot.slane %v2632_v41, 1  ;;  %v2798_v4 = vrot.slane %v2797_v38, 4  ;;  %v2910_v3 = vrot.slane %v2909_v5, 4 }
 0x38d   : > { %v2520_v48 = vmax.f32 %v2518_v54, %v2519_v29  ;;  %v2855_v7 = vmax.f32 %v2853_v8, %v2854_v20  ;;  %v2419_v36 = vadd.f32 %v5195_v47, %v2384_v34  ;;  %v2691_v54 = vmax.f32 %v2689_v2, %v2690_v31 }
 0x38e   : > { %v2576_v29 = vrot.slane %v2575_v45, 1  ;;  %v2799_v0 = vmax.f32 %v2797_v38, %v2798_v4  ;;  %v5295_v15 = vmax.f32 %v2909_v5, %v2910_v3 }
 0x38f   : > { %v5267_v1 = vsel %vm2941_vm2, %v2520_v48, %v2940_v33  ;;  %v2741_v33 = vsel %vm2471_vm9, %v2464_v42, -inf  ;;  %v2634_v48 = vmax.f32 %v2632_v41, %v2633_v19  ;;  %v2856_v9 = vrot.slane %v2855_v7, 2 }
 0x390   : > { %v2114_v59 = vpop.f32.mrf.mxu3  ;;  %v2742_v60 = vrot.slane %v2741_v33, 4  ;;  %v2465_v30 = vsel %vm1874_vm7, %v2419_v36, -inf  ;;  %v5288_v11 = vsel %vm2941_vm2, %v2691_v54, %v5231_v23  ;;  %v2577_v43 = vmax.f32 %v2575_v45, %v2576_v29 }
 0x391   : > { %v2228_v25 = vadd.f32 %v2227_v6, %v2114_v59  ;;  %v2977_v24 = vsel %vm2941_vm2, %v2634_v48, %v5235_v50  ;;  %v2800_v51 = vrot.slane %v2799_v0, 2  ;;  %v5293_v55 = vmax.f32 %v2855_v7, %v2856_v9 }
 0x392   : > { %v2347_v37 = vpop.f32.mrf.mxu1  ;;  %v2743_v32 = vmax.f32 %v2741_v33, %v2742_v60  ;;  %v2959_v39 = vsel %vm2941_vm2, %v2577_v43, %v5239_v26  ;;  %v2912_v33 = vrot.slane %v5295_v15, 2 }
 0x393   : > { %v2385_v44 = vadd.f32 %v2347_v37, %v2225_v53  ;;  %v2230_v61 = vpop.f32.mrf.mxu0  ;;  %v2801_v37 = vmax.f32 %v2799_v0, %v2800_v51  ;;  %v2858_v38 = vrot.slane %v5293_v55, 1 }
 0x394   : > { %v2744_v63 = vrot.slane %v2743_v32, 2 }
 0x395   : > { %v2420_v52 = vadd.f32 %v5195_v47, %v2385_v44  ;;  %v2802_v4 = vrot.slane %v2801_v37, 1 }
 0x396   : > { %v2745_v8 = vmax.f32 %v2743_v32, %v2744_v63 }
 0x397   : > { %v2468_v20 = vsel %vm1874_vm7, %v2420_v52, -inf }
 0x398   : > { %v2117_v62 = vpop.f32.mrf.mxu3  ;;  %v2746_v60 = vrot.slane %v2745_v8, 1 }
 0x399   : > { %v2231_v46 = vadd.f32 %v2230_v61, %v2117_v62 }
 0x3e5   : > { %v2350_v18 = vpop.f32.mrf.mxu1 }
 0x3e6   : > { %v2386_v14 = vadd.f32 %v2350_v18, %v2228_v25 }
 0x3e8   : > { %v2421_v21 = vadd.f32 %v5195_v47, %v2386_v14 }
 0x3ea   : > { %v2466_v40 = vsel %vm1874_vm7, %v2421_v21, -inf }
 0x3eb   : > { %v2467_v27 = vmax.f32 %v2465_v30, %v2466_v40 }
 0x3ed   : > { %v2353_v22 = vpop.f32.mrf.mxu1  ;;  %v2692_v57 = vsel %vm2642_vm12, %v2467_v27, -inf  ;;  %v2635_v23 = vsel %vm2585_vm11, %v2467_v27, -inf  ;;  %v2578_v56 = vsel %vm2528_vm10, %v2467_v27, -inf  ;;  %v2521_v28 = vsel %vm2471_vm9, %v2467_v27, -inf }
 0x3ee   : > { %v2387_v42 = vadd.f32 %v2353_v22, %v2231_v46  ;;  %v2693_v50 = vrot.slane %v2692_v57, 4  ;;  %v2636_v58 = vrot.slane %v2635_v23, 4  ;;  %v2579_v49 = vrot.slane %v2578_v56, 4 }
 0x3ef   : > { %v2522_v2 = vrot.slane %v2521_v28, 4 }
 0x3f0   : > { %v2422_v17 = vadd.f32 %v5195_v47, %v2387_v42  ;;  %v2694_v59 = vmax.f32 %v2692_v57, %v2693_v50  ;;  %v2637_v41 = vmax.f32 %v2635_v23, %v2636_v58  ;;  %v2580_v12 = vmax.f32 %v2578_v56, %v2579_v49 }
 0x3f1   : > { %v2523_v6 = vmax.f32 %v2521_v28, %v2522_v2  ;;  %v2859_v50 = vmax.f32 %v5293_v55, %v2858_v38  ;;  %v2747_v2 = vmax.f32 %v2745_v8, %v2746_v60 }
 0x3f2   : > { %v2469_v34 = vsel %vm1874_vm7, %v2422_v17, -inf  ;;  %v2695_v31 = vrot.slane %v2694_v59, 2  ;;  %v2638_v45 = vrot.slane %v2637_v41, 2  ;;  %v2581_v26 = vrot.slane %v2580_v12, 2 }
 0x3f3   : > { %v2470_v19 = vmax.f32 %v2468_v20, %v2469_v34  ;;  %v2524_v25 = vrot.slane %v2523_v6, 2  ;;  %v2913_v17 = vmax.f32 %v5295_v15, %v2912_v33 }
 0x3f4   : > { %v2696_v47 = vmax.f32 %v2694_v59, %v2695_v31  ;;  %v2639_v7 = vmax.f32 %v2637_v41, %v2638_v45  ;;  %v2582_v53 = vmax.f32 %v2580_v12, %v2581_v26 }
 0x3f5   : > { %v2860_v18 = vsel %vm2585_vm11, %v2470_v19, -inf  ;;  %v2804_v5 = vsel %vm2528_vm10, %v2470_v19, -inf  ;;  %v2748_v36 = vsel %vm2471_vm9, %v2470_v19, -inf  ;;  %v2916_v14 = vsel %vm2642_vm12, %v2470_v19, -inf }
 0x3f6   : > { %v2697_v54 = vrot.slane %v2696_v47, 1  ;;  %v2640_v29 = vrot.slane %v2639_v7, 1  ;;  %v2583_v48 = vrot.slane %v2582_v53, 1  ;;  %v2861_v0 = vrot.slane %v2860_v18, 4 }
 0x3f7   : > { %v2805_v32 = vrot.slane %v2804_v5, 4  ;;  %v2749_v44 = vrot.slane %v2748_v36, 4  ;;  %v2917_v21 = vrot.slane %v2916_v14, 4  ;;  %v2525_v9 = vmax.f32 %v2523_v6, %v2524_v25 }
 0x3f8   : > { %v2698_v3 = vmax.f32 %v2696_v47, %v2697_v54  ;;  %v2641_v62 = vmax.f32 %v2639_v7, %v2640_v29  ;;  %v2584_v30 = vmax.f32 %v2582_v53, %v2583_v48  ;;  %v2862_v40 = vmax.f32 %v2860_v18, %v2861_v0 }
 0x3f9   : > { %v2806_v43 = vmax.f32 %v2804_v5, %v2805_v32  ;;  %v2750_v61 = vmax.f32 %v2748_v36, %v2749_v44  ;;  %v2918_v27 = vmax.f32 %v2916_v14, %v2917_v21  ;;  %v2526_v51 = vrot.slane %v2525_v9, 1 }
 0x3fa   : > { %v2996_v63 = vsel %vm2943_vm3, %v2698_v3, %v5288_v11  ;;  %v2978_v52 = vsel %vm2943_vm3, %v2641_v62, %v2977_v24  ;;  %v2960_v46 = vsel %vm2943_vm3, %v2584_v30, %v2959_v39  ;;  %v2863_v22 = vrot.slane %v2862_v40, 2 }
 0x3fb   : > { %2997 = vrot.lane.b32.xlu1 %v2996_v63, %s3491_s6  ;;  %2979 = vrot.lane.b32.xlu0 %v2978_v52, %s3492_s10  ;;  %v2807_v57 = vrot.slane %v2806_v43, 2  ;;  %v2751_v23 = vrot.slane %v2750_v61, 2  ;;  %v2919_v56 = vrot.slane %v2918_v27, 2  ;;  %v2527_v28 = vmax.f32 %v2525_v9, %v2526_v51  ;;  %s3439_s6 = scalar_lea.hbm %s3438_s30, 8 }
 0x3fc   : > { %2961 = vrot.lane.b32.xlu2 %v2960_v46, %s3490_s13  ;;  %v2864_v42 = vmax.f32 %v2862_v40, %v2863_v22  ;;  %v2803_v39 = vmax.f32 %v2801_v37, %v2802_v4  ;;  %v3049_v6 = vsel %vm2941_vm2, %v2859_v50, %v5247_v16  ;;  %v2914_v37 = vrot.slane %v2913_v17, 1  ;;  %s3493_s13 = smov 96   ;;  %p3440_p11 = scmp.ne.s32.totalorder %s3438_s30, %s3439_s6 }
 0x3fd   : > { %v2808_v58 = vmax.f32 %v2806_v43, %v2807_v57  ;;  %v2752_v11 = vmax.f32 %v2750_v61, %v2751_v23  ;;  %v2944_v24 = vsel %vm2943_vm3, %v2527_v28, %v5267_v1  ;;  %v2920_v12 = vmax.f32 %v2918_v27, %v2919_v56 }
 0x3fe   : > { %v2865_v49 = vrot.slane %v2864_v42, 1  ;;  %v3031_v38 = vsel %vm2941_vm2, %v2803_v39, %v5251_v10  ;;  %v3013_v1 = vsel %vm2941_vm2, %v2747_v2, %v5255_v35  ;;  %v2915_v16 = vmax.f32 %v2913_v17, %v2914_v37  ;;  %p3441_p12 = pnand %p3440_p11, %p3565_p5 }
 0x3ff   : > { %v2809_v59 = vrot.slane %v2808_v58, 1  ;;  %v2753_v41 = vrot.slane %v2752_v11, 1  ;;  %v2921_v33 = vrot.slane %v2920_v12, 1  ;;  %vm3081_vm9 = vcmask 785408  }
 0x400   : > { %v2866_v20 = vmax.f32 %v2864_v42, %v2865_v49  ;;  %v3067_v10 = vsel %vm2941_vm2, %v2915_v16, %v5260_v13  ;;  %p3442_p13 = pneg %p3441_p12 }
 0x401   : > { %v2810_v34 = vmax.f32 %v2808_v58, %v2809_v59  ;;  %v2754_v31 = vmax.f32 %v2752_v11, %v2753_v41  ;;  %v2922_v45 = vmax.f32 %v2920_v12, %v2921_v33 }
 0x402   : > { %v3050_v55 = vsel %vm2943_vm3, %v2866_v20, %v3049_v6 }
 0x403   : > { %3051 = vrot.lane.b32.xlu1 %v3050_v55, %s3493_s13  ;;  %v3032_v15 = vsel %vm2943_vm3, %v2810_v34, %v3031_v38  ;;  %v3014_v8 = vsel %vm2943_vm3, %v2754_v31, %v3013_v1  ;;  %v3068_v35 = vsel %vm2943_vm3, %v2922_v45, %v3067_v10 }
 0x404   : > { %3033 = vrot.lane.b32.xlu0 %v3032_v15, %s3494_s7  ;;  %3015 = vrot.lane.b32.xlu2 %v3014_v8, %s3495_s8  ;;  %s3443_s7 = scalar_lea.hbm %s5371_s5, 16 }
 0x405   : > { %p3445_p1 = scmp.lt.s32.totalorder %s3443_s7, %s3439_s6 }
 0x407   : > { %p3446_p2 = por %p3445_p1, %p3444_p0 }
 0x409   : > { %p3447_p3 = pnand %p3446_p2, %p3442_p13 }
 0x40c   : > { %3069 = vrot.lane.b32.xlu2 %v3068_v35, %s3496_s12 }
 0x456   : > { %v2962_v26 = vpop.permute.xlu2 %2961 }
 0x457   : > { %v3072_v25 = vsel %vm1874_vm7, %v2944_v24, %v2962_v26  ;;  %vm3083_vm7 = vcmask 916480  }
 0x45e   : > { %v3016_v60 = vpop.permute.xlu2 %3015 }
 0x466   : > { %v3070_v36 = vpop.permute.xlu2 %3069 }
 0x46d   : > { %v2998_v19 = vpop.permute.xlu1 %2997  ;;  %v2980_v4 = vpop.permute.xlu0 %2979 }
 0x46e   : > { %v3074_v47 = vsel %vm3073_vm4, %v3072_v25, %v2980_v4 }
 0x46f   : > { %v3076_v13 = vsel %vm3075_vm5, %v3074_v47, %v2998_v19 }
 0x470   : > { %v3078_v18 = vsel %vm3077_vm6, %v3076_v13, %v3016_v60 }
 0x475   : > { %v3052_v7 = vpop.permute.xlu1 %3051 }
 0x476   : > { %v3034_v53 = vpop.permute.xlu0 %3033 }
 0x477   : > { %v3080_v5 = vsel %vm3079_vm8, %v3078_v18, %v3034_v53 }
 0x478   : > { %v3082_v14 = vsel %vm3081_vm9, %v3080_v5, %v3052_v7 }
 0x479   : > { %v3084_v54 = vsel %vm3083_vm7, %v3082_v14, %v3070_v36 }
 0x47a   : > { %3085 = vst [vmem:[%s217_s25] sm:$0xff] %v3084_v54 }
 0x47b   : > { %3450 = shalt.err (!%p3447_p3)
}
 0x47c   : > { %3370 = dma.vmem_to_hbm [thread:$0]  (%p3565_p5), %s3100_s26, 128, %s3102_s11, %s3087_s22  }
 0x47d PF: > { %p3376_p4 = scmp.ge.s32.totalorder %s3485_s21, 2  ;;  %s3113_s9 = sand.u32 1, %s3473_s18  }
 0x47e   : > { %s3114_s14 = scalar_lea.sflag [#allocation3], %s3113_s9 }
 0x47f   : > { %p3373_p7 = pnand %p3376_p4, %p3569_p6 }
 0x481   : > { %p3374_p8 = pneg %p3373_p7 }
 0x483   : > { %3468 = dma.done.wait (%p3374_p8), %s3114_s14, 128  }
 0x484   : > { %3470 = vsyncadd (%p3374_p8), %s3114_s14, 4294967168  ;;  %p15_p9 = scmp.ge.s32.totalorder %s3552_s24, 4   ;;  %s5374_s18 = smov %s3477_s19 }
 0x485   : > { %s5375_s19 = smov %s3481_s20  ;;  %s5376_s20 = smov %s3563_s27 }
 0x486   : > { %s5377_s21 = smov %s3552_s24  ;;  %17 = sbr.rel (!%p15_p9) target bundleno = 3 (0x3), region = 79 }
 0x48b   :  { %3120 = vsyncpa [#allocation3], 1 }
 0x48c   :  { %3122 = vsyncpa [#allocation3 + $0x1], 1 }

</bundles_post_ra>
